<compile_context>
chip_gen: v7x
topology: tpu7x:2x2x1
jax: 0.10.0
libtpu: 0.0.40
codegen_flags: <defaults>
</compile_context>

<pallas_src>
import functools

import jax
import jax.numpy as jnp
from jax import lax
from jax.experimental import pallas as pl
from jax.experimental.pallas import tpu as pltpu


def _round_up(x, m):
    return (x + m - 1) // m * m


def fold_bn(gamma, beta, mean, var, eps=1e-5):
    scale = gamma / jnp.sqrt(var + eps)
    shift = beta - mean * scale
    return scale.astype(jnp.float32), shift.astype(jnp.float32)


# ----------------------------- fused Pallas kernel ----------------------------

def _make_fused_residual_kernel(B, Ho, Wo, Ws, K1, Cp):
    """conv1+BN1+ReLU -> bf16 VMEM scratch -> conv2+BN2 + shortcut + ReLU, B images/step."""
    M = Ho * Wo
    BM = B * M

    def kernel(x1_ref, w1c_ref, b1_ref, w2_ref, bsd_ref, o_ref, o1_scr):
        # ---- conv1 (all 9 taps, K = 9*Cin) AND the shortcut in ONE MXU pass ------------
        # RHS = [w1_folded | shortcut_weight@centre_tap] -> (K1, 2*Cp): columns [:Cp] are
        # the conv1 pre-activation, columns [Cp:] are the shortcut projection.
        x1 = x1_ref[...].reshape(BM, K1)                                  # bf16, taps in lanes
        y = jnp.dot(x1, w1c_ref[...], preferred_element_type=jnp.float32)  # (BM, 2*Cp) f32
        out1 = jnp.maximum(y[:, :Cp] + b1_ref[...], 0.0)                  # + BN1 shift, ReLU
        acc2 = y[:, Cp:] + bsd_ref[...]                                   # shortcut + shifts

        # ---- park conv1 activation in a bf16 VMEM scratch with a 1-px zero halo --------
        # Zero only the halo strips (interior is fully overwritten every step); per-step
        # strip zeroing is safe under megacore sharding (each TC has its own scratch).
        zrow = jnp.zeros((B, 1, Ws, Cp), jnp.bfloat16)
        o1_scr[:, 0:1, :, :] = zrow
        o1_scr[:, Ho + 1:Ho + 2, :, :] = zrow
        zcol = jnp.zeros((B, Ho, 1, Cp), jnp.bfloat16)
        o1_scr[:, 1:Ho + 1, 0:1, :] = zcol
        o1_scr[:, 1:Ho + 1, Wo + 1:Wo + 2, :] = zcol
        o1_scr[:, 1:Ho + 1, 1:Wo + 1, :] = (
            out1.astype(jnp.bfloat16).reshape(B, Ho, Wo, Cp))

        # ---- conv2 (3x3, stride 1, K = Cp): 9-tap MXU accumulation over shifted views --
        for kh in range(3):
            for kw in range(3):
                lhs = o1_scr[:, kh:kh + Ho, kw:kw + Wo, :].reshape(BM, Cp)   # bf16, no casts
                acc2 = acc2 + jnp.dot(lhs, w2_ref[kh * 3 + kw],
                                      preferred_element_type=jnp.float32)

        o_ref[...] = jnp.maximum(acc2, 0.0).reshape(B, M, Cp).astype(o_ref.dtype)

    return kernel


# --------------------------------- wrapper -------------------------------------

def residual_block_forward(x_nchw, params, *, stride, needs_projection, eps=1e-5):
    assert stride in (1, 2)
    assert needs_projection or stride == 1, "identity shortcut requires stride 1"

    x = jnp.transpose(x_nchw, (0, 2, 3, 1)).astype(jnp.bfloat16)   # NHWC, bf16 activations
    N, H, W, Cin = x.shape
    Cout = params["w1"].shape[-1]
    Ho = (H + 2 - 3) // stride + 1
    Wo = (W + 2 - 3) // stride + 1
    M = Ho * Wo
    Cp = _round_up(Cout, 128)                 # lane-dense output channels
    pad_c = Cp - Cout
    K1 = 9 * Cin

    # ---- fold BN into conv weights / shift vectors (inference-mode BN) -----------------
    s1, b1 = fold_bn(params["g1"], params["be1"], params["m1"], params["v1"], eps)
    s2, b2 = fold_bn(params["g2"], params["be2"], params["m2"], params["v2"], eps)
    w1f = jnp.pad((params["w1"] * s1).reshape(K1, Cout), ((0, 0), (0, pad_c)))
    w2f = jnp.pad((params["w2"] * s2).reshape(9, Cout, Cout),
                  ((0, 0), (0, pad_c), (0, pad_c))).astype(jnp.bfloat16)
    if needs_projection:
        sd, bd = fold_bn(params["gd"], params["bed"], params["md"], params["vd"], eps)
        wd2d = jnp.pad(params["wd"].reshape(Cin, Cout) * sd, ((0, 0), (0, pad_c)))
    else:
        wd2d = jnp.pad(jnp.eye(Cin, dtype=jnp.float32), ((0, 0), (0, Cp - Cin)))
        bd = jnp.zeros((Cout,), jnp.float32)
    # The shortcut reads x at the centre tap of the 3x3 window, so its 1x1 weight can live
    # at rows [4*Cin:5*Cin] of a (K1, Cp) matrix and be fused into conv1's matmul.
    wdp = jnp.zeros((K1, Cp), jnp.float32).at[4 * Cin:5 * Cin, :].set(wd2d)
    w1cat = jnp.concatenate([w1f, wdp], axis=1).astype(jnp.bfloat16)     # (K1, 2*Cp)
    b1p = jnp.pad(b1, (0, pad_c)).reshape(1, Cp)
    bsd = jnp.pad(b2 + bd, (0, pad_c)).reshape(1, Cp)                    # BN2 + shortcut-BN

    # ---- host-side tap packing for conv1 (small Cin): (N, M, 9*Cin) bf16 patches --------
    xp = jnp.pad(x, ((0, 0), (1, 1), (1, 1), (0, 0)))
    taps = [xp[:, kh:kh + (Ho - 1) * stride + 1:stride,
               kw:kw + (Wo - 1) * stride + 1:stride, :]
            for kh in range(3) for kw in range(3)]
    x1 = jnp.concatenate(taps, axis=-1).reshape(N, M, K1)

    # ---- batch blocking: B images per grid step so each matmul sees >= ~256 rows --------
    B = max(1, min(N, -(-256 // M)))
    while N % B:
        B -= 1
    G = N // B
    Ws = _round_up(Wo + 2, 16)                # bf16 sublane tile is 16 rows

    kernel = _make_fused_residual_kernel(B, Ho, Wo, Ws, K1, Cp)

    in_specs = [
        pl.BlockSpec((B, M, K1), lambda g: (g, 0, 0)),      # packed conv1 patches
        pl.BlockSpec((K1, 2 * Cp), lambda g: (0, 0)),       # [w1 | shortcut] fused RHS
        pl.BlockSpec((1, Cp), lambda g: (0, 0)),            # BN1 shift
        pl.BlockSpec((9, Cp, Cp), lambda g: (0, 0, 0)),     # w2 (scale-folded, taps first)
        pl.BlockSpec((1, Cp), lambda g: (0, 0)),            # BN2 + shortcut-BN shift
    ]
    out_specs = pl.BlockSpec((B, M, Cp), lambda g: (g, 0, 0))   # lane-dense (128) stores

    # right-sized VMEM budget: double-buffered blocks + scratch + headroom
    blk_bytes = (B * M * K1 * 2 + K1 * 2 * Cp * 2 + Cp * 4
                 + 9 * Cp * Cp * 2 + Cp * 4 + B * M * Cp * 2)
    scratch_bytes = B * (Ho + 2) * Ws * Cp * 2
    vmem_limit = min(max(2 * blk_bytes + scratch_bytes + (4 << 20), 16 << 20), 64 << 20)

    out = pl.pallas_call(
        kernel,
        out_shape=jax.ShapeDtypeStruct((N, M, Cp), jnp.bfloat16),
        grid=(G,),
        in_specs=in_specs,
        out_specs=out_specs,
        scratch_shapes=[pltpu.VMEM((B, Ho + 2, Ws, Cp), jnp.bfloat16)],
        compiler_params=pltpu.CompilerParams(
            dimension_semantics=("parallel",),
            vmem_limit_bytes=vmem_limit),
    )(x1, w1cat, b1p, w2f, bsd)

    out = out[:, :, :Cout].astype(jnp.float32).reshape(N, Ho, Wo, Cout)
    return jnp.transpose(out, (0, 3, 1, 2))                 # back to NCHW


# ----------------------------- pure-JAX reference ------------------------------

def _conv_nhwc(x, w, stride, pad):
    return lax.conv_general_dilated(
        x, w, window_strides=(stride, stride),
        padding=((pad, pad), (pad, pad)),
        dimension_numbers=("NHWC", "HWIO", "NHWC"),
        preferred_element_type=jnp.float32)


def residual_block_reference(x_nchw, params, *, stride, needs_projection, eps=1e-5):
    """Reference with the same bf16-weight / f32-accumulation numerics as the kernel."""
    x = jnp.transpose(x_nchw, (0, 2, 3, 1)).astype(jnp.bfloat16)
    s1, b1 = fold_bn(params["g1"], params["be1"], params["m1"], params["v1"], eps)
    s2, b2 = fold_bn(params["g2"], params["be2"], params["m2"], params["v2"], eps)
    out = _conv_nhwc(x, (params["w1"] * s1).astype(jnp.bfloat16), stride, 1) + b1
    out = jnp.maximum(out, 0.0).astype(jnp.bfloat16)
    out = _conv_nhwc(out, (params["w2"] * s2).astype(jnp.bfloat16), 1, 1) + b2
    if needs_projection:
        sd, bd = fold_bn(params["gd"], params["bed"], params["md"], params["vd"], eps)
        ident = _conv_nhwc(x, (params["wd"] * sd).astype(jnp.bfloat16), stride, 0) + bd
    else:
        ident = x.astype(jnp.float32)
    out = jnp.maximum(out + ident, 0.0)
    return jnp.transpose(out, (0, 3, 1, 2))


# ------------------------------------ main --------------------------------------

if __name__ == "__main__":
    in_channels, out_channels, downsample = 4, 8, True
    stride = 2 if downsample else 1
    needs_projection = downsample or (in_channels != out_channels)

    key = jax.random.PRNGKey(0)
    ks = jax.random.split(key, 8)

    def bn_params(k):
        a, b, c, d = jax.random.split(k, 4)
        gamma = 1.0 + 0.1 * jax.random.normal(a, (out_channels,), jnp.float32)
        beta = 0.1 * jax.random.normal(b, (out_channels,), jnp.float32)
        mean = 0.1 * jax.random.normal(c, (out_channels,), jnp.float32)
        var = jnp.abs(jax.random.normal(d, (out_channels,), jnp.float32)) + 0.5
        return gamma, beta, mean, var

    g1, be1, m1, v1 = bn_params(ks[1])
    g2, be2, m2, v2 = bn_params(ks[3])
    gd, bed, md, vd = bn_params(ks[5])

    params = {
        "w1": 0.2 * jax.random.normal(ks[0], (3, 3, in_channels, out_channels), jnp.float32),
        "g1": g1, "be1": be1, "m1": m1, "v1": v1,
        "w2": 0.2 * jax.random.normal(ks[2], (3, 3, out_channels, out_channels), jnp.float32),
        "g2": g2, "be2": be2, "m2": m2, "v2": v2,
        "wd": 0.2 * jax.random.normal(ks[4], (1, 1, in_channels, out_channels), jnp.float32),
        "gd": gd, "bed": bed, "md": md, "vd": vd,
    }

    x = jax.random.normal(ks[6], (2, in_channels, 16, 16), jnp.float32)   # NCHW

    fwd = jax.jit(functools.partial(residual_block_forward,
                                    stride=stride, needs_projection=needs_projection))
    out = jax.block_until_ready(fwd(x, params))

    ref = jax.block_until_ready(
        residual_block_reference(x, params, stride=stride,
                                 needs_projection=needs_projection))

    assert out.shape == ref.shape, (out.shape, ref.shape)
    max_err = float(jnp.max(jnp.abs(out - ref)))
    assert jnp.allclose(out, ref, atol=3e-2, rtol=3e-2), max_err

    print("KERNEL_OK")
</pallas_src>

<mosaic_0001>
module attributes {stable_mosaic.version = 11 : i64} {
  func.func @kernel(%arg0: i32, %arg1: memref<2x64x36xbf16, #tpu.memory_space<vmem>>, %arg2: memref<36x256xbf16, #tpu.memory_space<vmem>>, %arg3: memref<1x128xf32, #tpu.memory_space<vmem>>, %arg4: memref<9x128x128xbf16, #tpu.memory_space<vmem>>, %arg5: memref<1x128xf32, #tpu.memory_space<vmem>>, %arg6: memref<2x64x128xbf16, #tpu.memory_space<vmem>>, %arg7: memref<2x10x16x128xbf16, #tpu.memory_space<vmem>>) attributes {dimension_semantics = [#tpu.dimension_semantics<parallel>], iteration_bounds = array<i64: 1>, scalar_prefetch = 0 : i64, scratch_operands = 1 : i64, tpu.core_type = #tpu.core_type<tc>, window_params = [{transform_indices = @transform_0, window_bounds = array<i64: 2, 64, 36>}, {pipeline_mode = #tpu.pipeline_mode<synchronous>, transform_indices = @transform_1, window_bounds = array<i64: 36, 256>}, {pipeline_mode = #tpu.pipeline_mode<synchronous>, transform_indices = @transform_2, window_bounds = array<i64: 1, 128>}, {pipeline_mode = #tpu.pipeline_mode<synchronous>, transform_indices = @transform_3, window_bounds = array<i64: 9, 128, 128>}, {pipeline_mode = #tpu.pipeline_mode<synchronous>, transform_indices = @transform_4, window_bounds = array<i64: 1, 128>}, {transform_indices = @transform_5, window_bounds = array<i64: 2, 64, 128>}]} {
    %c0 = arith.constant 0 : index
    %c0_0 = arith.constant 0 : index
    %c0_1 = arith.constant 0 : index
    %0 = vector.load %arg1[%c0, %c0_0, %c0_1] : memref<2x64x36xbf16, #tpu.memory_space<vmem>>, vector<2x64x36xbf16>
    %1 = vector.shape_cast %0 : vector<2x64x36xbf16> to vector<128x36xbf16>
    %c0_2 = arith.constant 0 : index
    %c0_3 = arith.constant 0 : index
    %2 = vector.load %arg2[%c0_2, %c0_3] : memref<36x256xbf16, #tpu.memory_space<vmem>>, vector<36x256xbf16>
    %cst = arith.constant dense<0.000000e+00> : vector<128x256xf32>
    %3 = tpu.matmul %1, %2, %cst {dimension_numbers = #tpu.dot_dimension_numbers<[1], [0], [0], [1], [0, 0, 1, 1], [], []>} : vector<128x36xbf16>, vector<36x256xbf16>, vector<128x256xf32> -> vector<128x256xf32>
    %4 = vector.extract_strided_slice %3 {offsets = [0, 0], sizes = [128, 128], strides = [1, 1]} : vector<128x256xf32> to vector<128x128xf32>
    %c0_4 = arith.constant 0 : index
    %c0_5 = arith.constant 0 : index
    %5 = vector.load %arg3[%c0_4, %c0_5] : memref<1x128xf32, #tpu.memory_space<vmem>>, vector<1x128xf32>
    %6 = vector.broadcast %5 : vector<1x128xf32> to vector<128x128xf32>
    %7 = arith.addf %4, %6 : vector<128x128xf32>
    %cst_6 = arith.constant 0.000000e+00 : f32
    %8 = vector.broadcast %cst_6 : f32 to vector<128x128xf32>
    %9 = arith.maximumf %7, %8 : vector<128x128xf32>
    %10 = vector.extract_strided_slice %3 {offsets = [0, 128], sizes = [128, 128], strides = [1, 1]} : vector<128x256xf32> to vector<128x128xf32>
    %c0_7 = arith.constant 0 : index
    %c0_8 = arith.constant 0 : index
    %11 = vector.load %arg5[%c0_7, %c0_8] : memref<1x128xf32, #tpu.memory_space<vmem>>, vector<1x128xf32>
    %12 = vector.broadcast %11 : vector<1x128xf32> to vector<128x128xf32>
    %13 = arith.addf %10, %12 : vector<128x128xf32>
    %cst_9 = arith.constant 0.000000e+00 : bf16
    %14 = vector.broadcast %cst_9 : bf16 to vector<2x1x16x128xbf16>
    %c0_10 = arith.constant 0 : index
    %c0_11 = arith.constant 0 : index
    %c0_12 = arith.constant 0 : index
    %c0_13 = arith.constant 0 : index
    %15 = vector.load %arg7[%c0_10, %c0_11, %c0_12, %c0_13] : memref<2x10x16x128xbf16, #tpu.memory_space<vmem>>, vector<2x1x16x128xbf16>
    tpu.vector_store %arg7[%c0_10, %c0_11, %c0_12, %c0_13], %14 {strides = array<i32>} : memref<2x10x16x128xbf16, #tpu.memory_space<vmem>>, vector<2x1x16x128xbf16>,
    %c0_14 = arith.constant 0 : index
    %c9 = arith.constant 9 : index
    %c0_15 = arith.constant 0 : index
    %c0_16 = arith.constant 0 : index
    %16 = vector.load %arg7[%c0_14, %c9, %c0_15, %c0_16] : memref<2x10x16x128xbf16, #tpu.memory_space<vmem>>, vector<2x1x16x128xbf16>
    tpu.vector_store %arg7[%c0_14, %c9, %c0_15, %c0_16], %14 {strides = array<i32>} : memref<2x10x16x128xbf16, #tpu.memory_space<vmem>>, vector<2x1x16x128xbf16>,
    %cst_17 = arith.constant 0.000000e+00 : bf16
    %17 = vector.broadcast %cst_17 : bf16 to vector<2x8x1x128xbf16>
    %c0_18 = arith.constant 0 : index
    %c1 = arith.constant 1 : index
    %c0_19 = arith.constant 0 : index
    %c0_20 = arith.constant 0 : index
    %18 = vector.load %arg7[%c0_18, %c1, %c0_19, %c0_20] : memref<2x10x16x128xbf16, #tpu.memory_space<vmem>>, vector<2x8x1x128xbf16>
    tpu.vector_store %arg7[%c0_18, %c1, %c0_19, %c0_20], %17 {strides = array<i32>} : memref<2x10x16x128xbf16, #tpu.memory_space<vmem>>, vector<2x8x1x128xbf16>,
    %c0_21 = arith.constant 0 : index
    %c1_22 = arith.constant 1 : index
    %c9_23 = arith.constant 9 : index
    %c0_24 = arith.constant 0 : index
    %19 = vector.load %arg7[%c0_21, %c1_22, %c9_23, %c0_24] : memref<2x10x16x128xbf16, #tpu.memory_space<vmem>>, vector<2x8x1x128xbf16>
    tpu.vector_store %arg7[%c0_21, %c1_22, %c9_23, %c0_24], %17 {strides = array<i32>} : memref<2x10x16x128xbf16, #tpu.memory_space<vmem>>, vector<2x8x1x128xbf16>,
    %20 = arith.truncf %9 : vector<128x128xf32> to vector<128x128xbf16>
    %21 = vector.shape_cast %20 : vector<128x128xbf16> to vector<2x8x8x128xbf16>
    %c0_25 = arith.constant 0 : index
    %c1_26 = arith.constant 1 : index
    %c1_27 = arith.constant 1 : index
    %c0_28 = arith.constant 0 : index
    %22 = vector.load %arg7[%c0_25, %c1_26, %c1_27, %c0_28] : memref<2x10x16x128xbf16, #tpu.memory_space<vmem>>, vector<2x8x8x128xbf16>
    tpu.vector_store %arg7[%c0_25, %c1_26, %c1_27, %c0_28], %21 {strides = array<i32>} : memref<2x10x16x128xbf16, #tpu.memory_space<vmem>>, vector<2x8x8x128xbf16>,
    %c0_29 = arith.constant 0 : index
    %c0_30 = arith.constant 0 : index
    %c0_31 = arith.constant 0 : index
    %c0_32 = arith.constant 0 : index
    %23 = vector.load %arg7[%c0_29, %c0_30, %c0_31, %c0_32] : memref<2x10x16x128xbf16, #tpu.memory_space<vmem>>, vector<2x8x8x128xbf16>
    %24 = vector.shape_cast %23 : vector<2x8x8x128xbf16> to vector<128x128xbf16>
    %c0_33 = arith.constant 0 : index
    %c0_34 = arith.constant 0 : index
    %c0_35 = arith.constant 0 : index
    %25 = vector.load %arg4[%c0_33, %c0_34, %c0_35] : memref<9x128x128xbf16, #tpu.memory_space<vmem>>, vector<1x128x128xbf16>
    %26 = vector.shape_cast %25 : vector<1x128x128xbf16> to vector<128x128xbf16>
    %cst_36 = arith.constant dense<0.000000e+00> : vector<128x128xf32>
    %27 = tpu.matmul %24, %26, %cst_36 {dimension_numbers = #tpu.dot_dimension_numbers<[1], [0], [0], [1], [0, 0, 1, 1], [], []>} : vector<128x128xbf16>, vector<128x128xbf16>, vector<128x128xf32> -> vector<128x128xf32>
    %28 = arith.addf %13, %27 : vector<128x128xf32>
    %c0_37 = arith.constant 0 : index
    %c0_38 = arith.constant 0 : index
    %c1_39 = arith.constant 1 : index
    %c0_40 = arith.constant 0 : index
    %29 = vector.load %arg7[%c0_37, %c0_38, %c1_39, %c0_40] : memref<2x10x16x128xbf16, #tpu.memory_space<vmem>>, vector<2x8x8x128xbf16>
    %30 = vector.shape_cast %29 : vector<2x8x8x128xbf16> to vector<128x128xbf16>
    %c1_41 = arith.constant 1 : index
    %c0_42 = arith.constant 0 : index
    %c0_43 = arith.constant 0 : index
    %31 = vector.load %arg4[%c1_41, %c0_42, %c0_43] : memref<9x128x128xbf16, #tpu.memory_space<vmem>>, vector<1x128x128xbf16>
    %32 = vector.shape_cast %31 : vector<1x128x128xbf16> to vector<128x128xbf16>
    %cst_44 = arith.constant dense<0.000000e+00> : vector<128x128xf32>
    %33 = tpu.matmul %30, %32, %cst_44 {dimension_numbers = #tpu.dot_dimension_numbers<[1], [0], [0], [1], [0, 0, 1, 1], [], []>} : vector<128x128xbf16>, vector<128x128xbf16>, vector<128x128xf32> -> vector<128x128xf32>
    %34 = arith.addf %28, %33 : vector<128x128xf32>
    %c0_45 = arith.constant 0 : index
    %c0_46 = arith.constant 0 : index
    %c2 = arith.constant 2 : index
    %c0_47 = arith.constant 0 : index
    %35 = vector.load %arg7[%c0_45, %c0_46, %c2, %c0_47] : memref<2x10x16x128xbf16, #tpu.memory_space<vmem>>, vector<2x8x8x128xbf16>
    %36 = vector.shape_cast %35 : vector<2x8x8x128xbf16> to vector<128x128xbf16>
    %c2_48 = arith.constant 2 : index
    %c0_49 = arith.constant 0 : index
    %c0_50 = arith.constant 0 : index
    %37 = vector.load %arg4[%c2_48, %c0_49, %c0_50] : memref<9x128x128xbf16, #tpu.memory_space<vmem>>, vector<1x128x128xbf16>
    %38 = vector.shape_cast %37 : vector<1x128x128xbf16> to vector<128x128xbf16>
    %cst_51 = arith.constant dense<0.000000e+00> : vector<128x128xf32>
    %39 = tpu.matmul %36, %38, %cst_51 {dimension_numbers = #tpu.dot_dimension_numbers<[1], [0], [0], [1], [0, 0, 1, 1], [], []>} : vector<128x128xbf16>, vector<128x128xbf16>, vector<128x128xf32> -> vector<128x128xf32>
    %40 = arith.addf %34, %39 : vector<128x128xf32>
    %c0_52 = arith.constant 0 : index
    %c1_53 = arith.constant 1 : index
    %c0_54 = arith.constant 0 : index
    %c0_55 = arith.constant 0 : index
    %41 = vector.load %arg7[%c0_52, %c1_53, %c0_54, %c0_55] : memref<2x10x16x128xbf16, #tpu.memory_space<vmem>>, vector<2x8x8x128xbf16>
    %42 = vector.shape_cast %41 : vector<2x8x8x128xbf16> to vector<128x128xbf16>
    %c3 = arith.constant 3 : index
    %c0_56 = arith.constant 0 : index
    %c0_57 = arith.constant 0 : index
    %43 = vector.load %arg4[%c3, %c0_56, %c0_57] : memref<9x128x128xbf16, #tpu.memory_space<vmem>>, vector<1x128x128xbf16>
    %44 = vector.shape_cast %43 : vector<1x128x128xbf16> to vector<128x128xbf16>
    %cst_58 = arith.constant dense<0.000000e+00> : vector<128x128xf32>
    %45 = tpu.matmul %42, %44, %cst_58 {dimension_numbers = #tpu.dot_dimension_numbers<[1], [0], [0], [1], [0, 0, 1, 1], [], []>} : vector<128x128xbf16>, vector<128x128xbf16>, vector<128x128xf32> -> vector<128x128xf32>
    %46 = arith.addf %40, %45 : vector<128x128xf32>
    %c0_59 = arith.constant 0 : index
    %c1_60 = arith.constant 1 : index
    %c1_61 = arith.constant 1 : index
    %c0_62 = arith.constant 0 : index
    %47 = vector.load %arg7[%c0_59, %c1_60, %c1_61, %c0_62] : memref<2x10x16x128xbf16, #tpu.memory_space<vmem>>, vector<2x8x8x128xbf16>
    %48 = vector.shape_cast %47 : vector<2x8x8x128xbf16> to vector<128x128xbf16>
    %c4 = arith.constant 4 : index
    %c0_63 = arith.constant 0 : index
    %c0_64 = arith.constant 0 : index
    %49 = vector.load %arg4[%c4, %c0_63, %c0_64] : memref<9x128x128xbf16, #tpu.memory_space<vmem>>, vector<1x128x128xbf16>
    %50 = vector.shape_cast %49 : vector<1x128x128xbf16> to vector<128x128xbf16>
    %cst_65 = arith.constant dense<0.000000e+00> : vector<128x128xf32>
    %51 = tpu.matmul %48, %50, %cst_65 {dimension_numbers = #tpu.dot_dimension_numbers<[1], [0], [0], [1], [0, 0, 1, 1], [], []>} : vector<128x128xbf16>, vector<128x128xbf16>, vector<128x128xf32> -> vector<128x128xf32>
    %52 = arith.addf %46, %51 : vector<128x128xf32>
    %c0_66 = arith.constant 0 : index
    %c1_67 = arith.constant 1 : index
    %c2_68 = arith.constant 2 : index
    %c0_69 = arith.constant 0 : index
    %53 = vector.load %arg7[%c0_66, %c1_67, %c2_68, %c0_69] : memref<2x10x16x128xbf16, #tpu.memory_space<vmem>>, vector<2x8x8x128xbf16>
    %54 = vector.shape_cast %53 : vector<2x8x8x128xbf16> to vector<128x128xbf16>
    %c5 = arith.constant 5 : index
    %c0_70 = arith.constant 0 : index
    %c0_71 = arith.constant 0 : index
    %55 = vector.load %arg4[%c5, %c0_70, %c0_71] : memref<9x128x128xbf16, #tpu.memory_space<vmem>>, vector<1x128x128xbf16>
    %56 = vector.shape_cast %55 : vector<1x128x128xbf16> to vector<128x128xbf16>
    %cst_72 = arith.constant dense<0.000000e+00> : vector<128x128xf32>
    %57 = tpu.matmul %54, %56, %cst_72 {dimension_numbers = #tpu.dot_dimension_numbers<[1], [0], [0], [1], [0, 0, 1, 1], [], []>} : vector<128x128xbf16>, vector<128x128xbf16>, vector<128x128xf32> -> vector<128x128xf32>
    %58 = arith.addf %52, %57 : vector<128x128xf32>
    %c0_73 = arith.constant 0 : index
    %c2_74 = arith.constant 2 : index
    %c0_75 = arith.constant 0 : index
    %c0_76 = arith.constant 0 : index
    %59 = vector.load %arg7[%c0_73, %c2_74, %c0_75, %c0_76] : memref<2x10x16x128xbf16, #tpu.memory_space<vmem>>, vector<2x8x8x128xbf16>
    %60 = vector.shape_cast %59 : vector<2x8x8x128xbf16> to vector<128x128xbf16>
    %c6 = arith.constant 6 : index
    %c0_77 = arith.constant 0 : index
    %c0_78 = arith.constant 0 : index
    %61 = vector.load %arg4[%c6, %c0_77, %c0_78] : memref<9x128x128xbf16, #tpu.memory_space<vmem>>, vector<1x128x128xbf16>
    %62 = vector.shape_cast %61 : vector<1x128x128xbf16> to vector<128x128xbf16>
    %cst_79 = arith.constant dense<0.000000e+00> : vector<128x128xf32>
    %63 = tpu.matmul %60, %62, %cst_79 {dimension_numbers = #tpu.dot_dimension_numbers<[1], [0], [0], [1], [0, 0, 1, 1], [], []>} : vector<128x128xbf16>, vector<128x128xbf16>, vector<128x128xf32> -> vector<128x128xf32>
    %64 = arith.addf %58, %63 : vector<128x128xf32>
    %c0_80 = arith.constant 0 : index
    %c2_81 = arith.constant 2 : index
    %c1_82 = arith.constant 1 : index
    %c0_83 = arith.constant 0 : index
    %65 = vector.load %arg7[%c0_80, %c2_81, %c1_82, %c0_83] : memref<2x10x16x128xbf16, #tpu.memory_space<vmem>>, vector<2x8x8x128xbf16>
    %66 = vector.shape_cast %65 : vector<2x8x8x128xbf16> to vector<128x128xbf16>
    %c7 = arith.constant 7 : index
    %c0_84 = arith.constant 0 : index
    %c0_85 = arith.constant 0 : index
    %67 = vector.load %arg4[%c7, %c0_84, %c0_85] : memref<9x128x128xbf16, #tpu.memory_space<vmem>>, vector<1x128x128xbf16>
    %68 = vector.shape_cast %67 : vector<1x128x128xbf16> to vector<128x128xbf16>
    %cst_86 = arith.constant dense<0.000000e+00> : vector<128x128xf32>
    %69 = tpu.matmul %66, %68, %cst_86 {dimension_numbers = #tpu.dot_dimension_numbers<[1], [0], [0], [1], [0, 0, 1, 1], [], []>} : vector<128x128xbf16>, vector<128x128xbf16>, vector<128x128xf32> -> vector<128x128xf32>
    %70 = arith.addf %64, %69 : vector<128x128xf32>
    %c0_87 = arith.constant 0 : index
    %c2_88 = arith.constant 2 : index
    %c2_89 = arith.constant 2 : index
    %c0_90 = arith.constant 0 : index
    %71 = vector.load %arg7[%c0_87, %c2_88, %c2_89, %c0_90] : memref<2x10x16x128xbf16, #tpu.memory_space<vmem>>, vector<2x8x8x128xbf16>
    %72 = vector.shape_cast %71 : vector<2x8x8x128xbf16> to vector<128x128xbf16>
    %c8 = arith.constant 8 : index
    %c0_91 = arith.constant 0 : index
    %c0_92 = arith.constant 0 : index
    %73 = vector.load %arg4[%c8, %c0_91, %c0_92] : memref<9x128x128xbf16, #tpu.memory_space<vmem>>, vector<1x128x128xbf16>
    %74 = vector.shape_cast %73 : vector<1x128x128xbf16> to vector<128x128xbf16>
    %cst_93 = arith.constant dense<0.000000e+00> : vector<128x128xf32>
    %75 = tpu.matmul %72, %74, %cst_93 {dimension_numbers = #tpu.dot_dimension_numbers<[1], [0], [0], [1], [0, 0, 1, 1], [], []>} : vector<128x128xbf16>, vector<128x128xbf16>, vector<128x128xf32> -> vector<128x128xf32>
    %76 = arith.addf %70, %75 : vector<128x128xf32>
    %cst_94 = arith.constant 0.000000e+00 : f32
    %77 = vector.broadcast %cst_94 : f32 to vector<128x128xf32>
    %78 = arith.maximumf %76, %77 : vector<128x128xf32>
    %79 = vector.shape_cast %78 : vector<128x128xf32> to vector<2x64x128xf32>
    %80 = arith.truncf %79 : vector<2x64x128xf32> to vector<2x64x128xbf16>
    %c0_95 = arith.constant 0 : index
    %c0_96 = arith.constant 0 : index
    %c0_97 = arith.constant 0 : index
    %81 = vector.load %arg6[%c0_95, %c0_96, %c0_97] : memref<2x64x128xbf16, #tpu.memory_space<vmem>>, vector<2x64x128xbf16>
    tpu.vector_store %arg6[%c0_95, %c0_96, %c0_97], %80 {strides = array<i32>} : memref<2x64x128xbf16, #tpu.memory_space<vmem>>, vector<2x64x128xbf16>,
    return
  }
  func.func @transform_0(%arg0: i32) -> (i32, i32, i32) {
    %c0_i32 = arith.constant 0 : i32
    %c0_i32_0 = arith.constant 0 : i32
    %c0_i32_1 = arith.constant 0 : i32
    return %arg0, %c0_i32, %c0_i32_0 : i32, i32, i32
  }
  func.func @transform_1(%arg0: i32) -> (i32, i32) {
    %c0_i32 = arith.constant 0 : i32
    %c0_i32_0 = arith.constant 0 : i32
    %c0_i32_1 = arith.constant 0 : i32
    return %c0_i32, %c0_i32_0 : i32, i32
  }
  func.func @transform_2(%arg0: i32) -> (i32, i32) {
    %c0_i32 = arith.constant 0 : i32
    %c0_i32_0 = arith.constant 0 : i32
    %c0_i32_1 = arith.constant 0 : i32
    return %c0_i32, %c0_i32_0 : i32, i32
  }
  func.func @transform_3(%arg0: i32) -> (i32, i32, i32) {
    %c0_i32 = arith.constant 0 : i32
    %c0_i32_0 = arith.constant 0 : i32
    %c0_i32_1 = arith.constant 0 : i32
    %c0_i32_2 = arith.constant 0 : i32
    return %c0_i32, %c0_i32_0, %c0_i32_1 : i32, i32, i32
  }
  func.func @transform_4(%arg0: i32) -> (i32, i32) {
    %c0_i32 = arith.constant 0 : i32
    %c0_i32_0 = arith.constant 0 : i32
    %c0_i32_1 = arith.constant 0 : i32
    return %c0_i32, %c0_i32_0 : i32, i32
  }
  func.func @transform_5(%arg0: i32) -> (i32, i32, i32) {
    %c0_i32 = arith.constant 0 : i32
    %c0_i32_0 = arith.constant 0 : i32
    %c0_i32_1 = arith.constant 0 : i32
    return %arg0, %c0_i32, %c0_i32_0 : i32, i32, i32
  }
}

</mosaic_0001>

<bundles_post_ra>
// kernel: residual_block_forward.1
= control target key start
LH: loop header
LB: loop body
LE: loop exit
PB: predicated region body
PF: predicated region fallthrough
CT: control target
= control target key end

     0   :  { %v5567_v1 = vmov 0   ;;  %vm132_vm0 = vcmask 1041408   ;;  %vm107_vm1 = vcmask 293888   ;;  %vm320_vm2 = vcmask 1040384   ;;  %v323_v20 = vld [vmem:[#allocation2 + $0x8] sm:$0x1]  ;;  %s6552_s1 = inlined_call_operand.vmem [shape: bf16[36,256], index: 1, kind: input, shape index: {}]   ;;  %s6553_s0 = inlined_call_operand.vmem [shape: bf16[2,64,36], index: 0, kind: input, shape index: {}]   ;;  %s6554_s3 = inlined_call_operand.vmem [shape: bf16[9,128,128], index: 3, kind: input, shape index: {}]   ;;  %s6555_s2 = inlined_call_operand.vmem [shape: f32[1,128], index: 2, kind: input, shape index: {}]   ;;  %s6556_s4 = inlined_call_operand.vmem [shape: f32[1,128], index: 4, kind: input, shape index: {}]   ;;  %s6557_s5 = inlined_call_operand.vmem [shape: bf16[2,64,128], index: 5, kind: output, shape index: {}]  }
   0x1   :  { %v5262_v0 = vld [vmem:[%s6552_s1 + $0x4] ss:$8 sps:$4 sm:$0xff]   ;;  %171 = vmatprep.mubr.bf16.mxu0 %v5567_v1  ;;  %314 = vst [vmem:[#allocation2] sm:$0xff] %v5567_v1  ;;  %315 = vst [vmem:[#allocation2 + $0x50] sm:$0xff] %v5567_v1  ;;  %v5264_v2 = vld [vmem:[%s6552_s1] ss:$8 sps:$4 sm:$0xff]  }
   0x2   :  { %317 = vst [vmem:[#allocation2 + $0x48] sm:$0xff] %v5567_v1  ;;  %318 = vst [vmem:[#allocation2 + $0x98] sm:$0xff] %v5567_v1  ;;  %139 = vmatprep.subr.bf16.mxu0 %v5262_v0  ;;  %v5265_v3 = vld [vmem:[%s6552_s1 + $0x14] ss:$8 sps:$4 sm:$0xff]   ;;  %v41_v4 = vld [vmem:[%s6552_s1 + $0x20] sm:$0x33] }
   0x3   :  { %140 = vmatpush1.bf16.msra.mxu0 %v5264_v2  ;;  %v5267_v5 = vld [vmem:[%s6552_s1 + $0x10] ss:$8 sps:$4 sm:$0xff]   ;;  %v4194_v6 = vcombine.high %v41_v4, %v41_v4  ;;  %v4193_v7 = vcombine.low %v41_v4, %v41_v4  ;;  %v5270_v9 = vld [vmem:[%s6553_s0] sm:$0xff]   ;;  %v5271_v10 = vld [vmem:[%s6553_s0 + $0x8] sm:$0xff]   ;;  %vm321_vm3 = vsmask.f32 256 }
   0x4   :  { %141 = vmatprep.subr.bf16.mxu0 %v5265_v3  ;;  %v5272_v11 = vld [vmem:[%s6553_s0 + $0x10] sm:$0xff]   ;;  %v5273_v12 = vld [vmem:[%s6553_s0 + $0x18] sm:$0xff]   ;;  %v5274_v13 = vld [vmem:[%s6553_s0 + $0x20] sm:$0xff]   ;;  %vm371_vm4 = vcmask 1044484   ;;  %vm372_vm5 = vsmask.f32 7954 }
   0x5   :  { %v134_v8 = vsel %vm132_vm0, %v4193_v7, 0  ;;  %v5275_v14 = vld [vmem:[%s6553_s0 + $0x28] sm:$0xff]   ;;  %v5276_v15 = vld [vmem:[%s6553_s0 + $0x30] sm:$0xff]   ;;  %v5277_v16 = vld [vmem:[%s6553_s0 + $0x38] sm:$0xff]   ;;  %vm598_vm8 = vcmask 1044480   ;;  %vm1519_vm11 = vcmask 1042432  }
   0x6   :  { %v5278_v17 = vld [vmem:[%s6554_s3] sm:$0xff]   ;;  %v5279_v18 = vld [vmem:[%s6554_s3 + $0x8] sm:$0xff]   ;;  %vm5651_vm6 = vmand %vm320_vm2, %vm321_vm3  ;;  %vm599_vm9 = vsmask.f32 4354  ;;  %vm1520_vm12 = vcmask 1046532  }
   0x7   :  { %142 = vmatpush1.bf16.msra.mxu0 %v5267_v5  ;;  %4973 = vmatprep.subr.bf16.mxu1 %v5278_v17  ;;  %v374_v21 = vld [vmem:[#allocation2 + $0x8] sm:$0x10]  ;;  %v324_v22 = vsel %vm5651_vm6, 0, %v323_v20  ;;  %vm5657_vm7 = vmand %vm371_vm4, %vm372_vm5  ;;  %v5280_v24 = vld [vmem:[%s6554_s3 + $0x80] sm:$0xff]   ;;  %vm986_vm13 = vsmask.f32 3328 }
   0x8   :  { %4195 = vmatprep.subr.msk.bf16.mxu0 %vm132_vm0, %v4194_v6  ;;  %4974 = vmatpush3.bf16.msra.mxu1 %v5278_v17  ;;  %325 = vst [vmem:[#allocation2 + $0x8] sm:$0x1] %v324_v22  ;;  %v375_v25 = vsel %vm5657_vm7, 0, %v374_v21  ;;  %v326_v26 = vld [vmem:[#allocation2 + $0x10] sm:$0x1]  ;;  %v5282_v31 = vld [vmem:[%s6554_s3 + $0x88] sm:$0xff]   ;;  %vm5791_vm10 = vmand %vm598_vm8, %vm599_vm9 }
   0x9   :  { %4975 = vmatprep.subr.bf16.mxu1 %v5279_v18  ;;  %v377_v27 = vld [vmem:[#allocation2 + $0x10] sm:$0x10]  ;;  %376 = vst [vmem:[#allocation2 + $0x8] sm:$0x10] %v375_v25  ;;  %v327_v29 = vsel %vm5651_vm6, 0, %v326_v26  ;;  %v5283_v32 = vld [vmem:[%s6554_s3 + $0x18] sm:$0xff]   ;;  %vm5811_vm15 = vmor %vm1519_vm11, %vm1520_vm12 }
   0xa   :  { %v5281_v28 = vld [vmem:[%s6554_s3 + $0x10] sm:$0xff]   ;;  %v378_v30 = vsel %vm5657_vm7, 0, %v377_v27  ;;  %328 = vst [vmem:[#allocation2 + $0x10] sm:$0x1] %v327_v29  ;;  %v329_v33 = vld [vmem:[#allocation2 + $0x18] sm:$0x1] }
   0xb   :  { %144 = vmatpush1.bf16.msra.mxu0 %v134_v8  ;;  %379 = vst [vmem:[#allocation2 + $0x10] sm:$0x10] %v378_v30  ;;  %v5284_v34 = vld [vmem:[%s6554_s3 + $0x90] sm:$0xff]   ;;  %v330_v35 = vsel %vm5651_vm6, 0, %v329_v33  ;;  %v380_v36 = vld [vmem:[#allocation2 + $0x18] sm:$0x10] }
   0xc   :  { %4976 = vmatpush3.bf16.msra.mxu1 %v5279_v18  ;;  %5037 = vmatprep.subr.bf16.mxu0 %v5280_v24  ;;  %331 = vst [vmem:[#allocation2 + $0x18] sm:$0x1] %v330_v35  ;;  %v381_v37 = vsel %vm5657_vm7, 0, %v380_v36  ;;  %v332_v38 = vld [vmem:[#allocation2 + $0x20] sm:$0x1]  ;;  %v5286_v43 = vld [vmem:[%s6554_s3 + $0x98] sm:$0xff]  }
   0xd   :  { %4977 = vmatprep.subr.bf16.mxu1 %v5281_v28  ;;  %v5285_v39 = vld [vmem:[%s6554_s3 + $0x20] sm:$0xff]   ;;  %382 = vst [vmem:[#allocation2 + $0x18] sm:$0x10] %v381_v37  ;;  %v333_v40 = vsel %vm5651_vm6, 0, %v332_v38  ;;  %v5287_v44 = vld [vmem:[%s6554_s3 + $0x28] sm:$0xff]   ;;  %v5289_v54 = vld [vmem:[%s6554_s3 + $0x30] sm:$0xff]  }
   0xe   :  { %4196 = vmatmul.mubr.msk.bf16.vlgmr.msra.gmra.mrb[0].mxu0 %vm107_vm1, %v5270_v9  ;;  %v383_v41 = vld [vmem:[#allocation2 + $0x20] sm:$0x10]  ;;  %334 = vst [vmem:[#allocation2 + $0x20] sm:$0x1] %v333_v40  ;;  %v335_v45 = vld [vmem:[#allocation2 + $0x28] sm:$0x1] }
   0xf   :  { %181 = vmatprep.mubr.bf16.mxu0 %v5567_v1  ;;  %5038 = vmatpush3.bf16.msra.mxu0 %v5280_v24  ;;  %v384_v42 = vsel %vm5657_vm7, 0, %v383_v41  ;;  %v386_v46 = vld [vmem:[#allocation2 + $0x28] sm:$0x10]  ;;  %v5288_v47 = vld [vmem:[%s6554_s3 + $0xa0] sm:$0xff]   ;;  %v336_v48 = vsel %vm5651_vm6, 0, %v335_v45  ;;  %v5292_v56 = vld [vmem:[%s6554_s3 + $0x38] sm:$0xff]  }
  0x10   :  { %4978 = vmatpush3.bf16.msra.mxu1 %v5281_v28  ;;  %5039 = vmatprep.subr.bf16.mxu0 %v5282_v31  ;;  %385 = vst [vmem:[#allocation2 + $0x20] sm:$0x10] %v384_v42  ;;  %v387_v49 = vsel %vm5657_vm7, 0, %v386_v46  ;;  %337 = vst [vmem:[#allocation2 + $0x28] sm:$0x1] %v336_v48  ;;  %v5291_v55 = vld [vmem:[%s6554_s3 + $0xa8] sm:$0xff]  }
  0x11   :  { %4979 = vmatprep.subr.bf16.mxu1 %v5283_v32  ;;  %388 = vst [vmem:[#allocation2 + $0x28] sm:$0x10] %v387_v49  ;;  %v338_v50 = vld [vmem:[#allocation2 + $0x30] sm:$0x1]  ;;  %v389_v51 = vld [vmem:[#allocation2 + $0x30] sm:$0x10] }
  0x12   :  { %v339_v52 = vsel %vm5651_vm6, 0, %v338_v50  ;;  %v390_v53 = vsel %vm5657_vm7, 0, %v389_v51  ;;  %v341_v57 = vld [vmem:[#allocation2 + $0x38] sm:$0x1]  ;;  %v392_v58 = vld [vmem:[#allocation2 + $0x38] sm:$0x10] }
  0x13   :  { %5040 = vmatpush3.bf16.msra.mxu0 %v5282_v31  ;;  %340 = vst [vmem:[#allocation2 + $0x30] sm:$0x1] %v339_v52  ;;  %391 = vst [vmem:[#allocation2 + $0x30] sm:$0x10] %v390_v53  ;;  %v5293_v59 = vld [vmem:[%s6554_s3 + $0xb0] sm:$0xff]   ;;  %v342_v60 = vsel %vm5651_vm6, 0, %v341_v57 }
  0x14   :  { %4980 = vmatpush3.bf16.msra.mxu1 %v5283_v32  ;;  %5041 = vmatprep.subr.bf16.mxu0 %v5284_v34  ;;  %v393_v61 = vsel %vm5657_vm7, 0, %v392_v58  ;;  %343 = vst [vmem:[#allocation2 + $0x38] sm:$0x1] %v342_v60  ;;  %v344_v62 = vld [vmem:[#allocation2 + $0x40] sm:$0x1]  ;;  %v5299_v2 = vld [vmem:[%s6554_s3 + $0xb8] sm:$0xff]  }
  0x15   :  { %4981 = vmatprep.subr.bf16.mxu1 %v5285_v39  ;;  %394 = vst [vmem:[#allocation2 + $0x38] sm:$0x10] %v393_v61  ;;  %v395_v63 = vld [vmem:[#allocation2 + $0x40] sm:$0x10]  ;;  %v345_v0 = vsel %vm5651_vm6, 0, %v344_v62 }
  0x16   :  { %4197 = vmatmul.mubr.msk.bf16.gmra.mrb[4].mxu0 %vm107_vm1, %v5271_v10  ;;  %346 = vst [vmem:[#allocation2 + $0x40] sm:$0x1] %v345_v0  ;;  %v347_v3 = vld [vmem:[#allocation2 + $0x58] sm:$0x1]  ;;  %v398_v4 = vld [vmem:[#allocation2 + $0x58] sm:$0x10] }
  0x17   :  { %191 = vmatprep.mubr.bf16.mxu0 %v5567_v1  ;;  %5042 = vmatpush3.bf16.msra.mxu0 %v5284_v34  ;;  %v348_v5 = vsel %vm5651_vm6, 0, %v347_v3  ;;  %v399_v6 = vsel %vm5657_vm7, 0, %v398_v4  ;;  %v350_v7 = vld [vmem:[#allocation2 + $0x60] sm:$0x1]  ;;  %v401_v8 = vld [vmem:[#allocation2 + $0x60] sm:$0x10] }
  0x18   :  { %4982 = vmatpush3.bf16.msra.mxu1 %v5285_v39  ;;  %5043 = vmatprep.subr.bf16.mxu0 %v5286_v43  ;;  %349 = vst [vmem:[#allocation2 + $0x58] sm:$0x1] %v348_v5  ;;  %400 = vst [vmem:[#allocation2 + $0x58] sm:$0x10] %v399_v6  ;;  %v351_v9 = vsel %vm5651_vm6, 0, %v350_v7  ;;  %v402_v10 = vsel %vm5657_vm7, 0, %v401_v8 }
  0x19   :  { %4983 = vmatprep.subr.bf16.mxu1 %v5287_v44  ;;  %352 = vst [vmem:[#allocation2 + $0x60] sm:$0x1] %v351_v9  ;;  %403 = vst [vmem:[#allocation2 + $0x60] sm:$0x10] %v402_v10  ;;  %v359_v20 = vld [vmem:[#allocation2 + $0x78] sm:$0x1] }
  0x1a   :  { %v410_v21 = vld [vmem:[#allocation2 + $0x78] sm:$0x10]  ;;  %v360_v22 = vsel %vm5651_vm6, 0, %v359_v20  ;;  %v362_v25 = vld [vmem:[#allocation2 + $0x80] sm:$0x1] }
  0x1b   :  { %5044 = vmatpush3.bf16.msra.mxu0 %v5286_v43  ;;  %v411_v24 = vsel %vm5657_vm7, 0, %v410_v21  ;;  %361 = vst [vmem:[#allocation2 + $0x78] sm:$0x1] %v360_v22  ;;  %v413_v26 = vld [vmem:[#allocation2 + $0x80] sm:$0x10]  ;;  %v363_v28 = vsel %vm5651_vm6, 0, %v362_v25 }
  0x1c   :  { %4984 = vmatpush3.bf16.msra.mxu1 %v5287_v44  ;;  %5045 = vmatprep.subr.bf16.mxu0 %v5288_v47  ;;  %412 = vst [vmem:[#allocation2 + $0x78] sm:$0x10] %v411_v24  ;;  %v5756_v27 = vld [vmem:[%s6554_s3 + $0x40] sm:$0xff]   ;;  %v414_v29 = vsel %vm5657_vm7, 0, %v413_v26  ;;  %364 = vst [vmem:[#allocation2 + $0x80] sm:$0x1] %v363_v28 }
  0x1d   :  { %4985 = vmatprep.subr.bf16.mxu1 %v5289_v54  ;;  %415 = vst [vmem:[#allocation2 + $0x80] sm:$0x10] %v414_v29  ;;  %v365_v30 = vld [vmem:[#allocation2 + $0x88] sm:$0x1]  ;;  %v416_v31 = vld [vmem:[#allocation2 + $0x88] sm:$0x10] }
  0x1e   :  { %4198 = vmatmul.mubr.msk.bf16.gmra.mrb[8].mxu0 %vm107_vm1, %v5272_v11  ;;  %v353_v11 = vld [vmem:[#allocation2 + $0x68] sm:$0x1]  ;;  %v5766_v32 = vld [vmem:[%s6554_s3 + $0x100] sm:$0xff]   ;;  %v366_v33 = vsel %vm5651_vm6, 0, %v365_v30  ;;  %v417_v34 = vsel %vm5657_vm7, 0, %v416_v31 }
  0x1f   :  { %201 = vmatprep.mubr.bf16.mxu0 %v5567_v1  ;;  %5046 = vmatpush3.bf16.msra.mxu0 %v5288_v47  ;;  %367 = vst [vmem:[#allocation2 + $0x88] sm:$0x1] %v366_v33  ;;  %418 = vst [vmem:[#allocation2 + $0x88] sm:$0x10] %v417_v34  ;;  %v368_v35 = vld [vmem:[#allocation2 + $0x90] sm:$0x1] }
  0x20   :  { %4986 = vmatpush3.bf16.msra.mxu1 %v5289_v54  ;;  %5047 = vmatprep.subr.bf16.mxu0 %v5291_v55  ;;  %v419_v36 = vld [vmem:[#allocation2 + $0x90] sm:$0x10]  ;;  %v369_v37 = vsel %vm5651_vm6, 0, %v368_v35  ;;  %v5780_v39 = vld [vmem:[%s6555_s2] ss:$0 sm:$0xff] }
  0x21   :  { %4987 = vmatprep.subr.bf16.mxu1 %v5292_v56  ;;  %v420_v38 = vsel %vm5657_vm7, 0, %v419_v36  ;;  %370 = vst [vmem:[#allocation2 + $0x90] sm:$0x1] %v369_v37  ;;  %v890_v40 = vld [vmem:[#allocation2] sm:$0x1f] }
  0x22   :  { %421 = vst [vmem:[#allocation2 + $0x90] sm:$0x10] %v420_v38  ;;  %v4238_v45 = vcombine.low %v890_v40, %v890_v40  ;;  %v1423_v49 = vld [vmem:[#allocation2] sm:$0x1e]  ;;  %v898_v10 = vld [vmem:[#allocation2 + $0x50] sm:$0x1f] }
  0x23   :  { %5048 = vmatpush3.bf16.msra.mxu0 %v5291_v55  ;;  %v4302_v55 = vcombine.low %v1423_v49, %v1423_v49  ;;  %v4254_v20 = vcombine.low %v898_v10, %v898_v10  ;;  %vm987_vm14 = vsmask.f32 7440  ;;  %v607_v36 = vld [vmem:[#allocation2 + $0x18] sm:$0x1f] }
  0x24   :  { %4988 = vmatpush3.bf16.msra.mxu1 %v5292_v56  ;;  %5049 = vmatprep.subr.bf16.mxu0 %v5293_v59  ;;  %v990_v50 = vshrl.u32 %v4238_v45, 16  ;;  %v993_v51 = vshll.u32 %v4238_v45, 16  ;;  %v4239_v56 = vcombine.high %v890_v40, %v890_v40  ;;  %vm5820_vm0 = vmor %vm986_vm13, %vm987_vm14 }
  0x25   :  { %5005 = vmatprep.subr.bf16.mxu1 %v5756_v27 }
  0x26   :  { %4199 = vmatmul.mubr.msk.bf16.gmra.mrb[12].mxu0 %vm107_vm1, %v5273_v12  ;;  %v404_v12 = vld [vmem:[#allocation2 + $0x68] sm:$0x10]  ;;  %v992_v3 = vrot.slane %v990_v50, 4  ;;  %v995_v4 = vrot.slane %v993_v51, 5  ;;  %v610_v50 = vld [vmem:[#allocation2 + $0x20] sm:$0x1f] }
  0x27   :  { %211 = vmatprep.mubr.bf16.mxu0 %v5567_v1  ;;  %5050 = vmatpush3.bf16.msra.mxu0 %v5293_v59 }
  0x28   :  { %5051 = vmatprep.subr.bf16.mxu0 %v5299_v2 }
  0x2b   :  { %5052 = vmatpush3.bf16.msra.mxu0 %v5299_v2  ;;  %v4303_v2 = vcombine.high %v1423_v49, %v1423_v49 }
  0x2c   :  { %5101 = vmatprep.subr.bf16.mxu0 %v5766_v32 }
  0x2d   :  { %v5804_v25 = vrot.slane %v4303_v2, 5 }
  0x2e   :  { %4200 = vmatmul.mubr.msk.bf16.gmra.mrb[16].mxu0 %vm107_vm1, %v5274_v13  ;;  %v354_v13 = vsel %vm5651_vm6, 0, %v353_v11  ;;  %v604_v11 = vld [vmem:[#allocation2 + $0x10] sm:$0x1f] }
  0x2f   :  { %221 = vmatprep.mubr.bf16.mxu0 %v5567_v1  ;;  %355 = vst [vmem:[#allocation2 + $0x68] sm:$0x1] %v354_v13 }
  0x36   :  { %4201 = vmatmul.mubr.msk.bf16.gmra.mrb[20].mxu0 %vm107_vm1, %v5275_v14  ;;  %v405_v14 = vsel %vm5657_vm7, 0, %v404_v12  ;;  %v999_v12 = vshll.u32 %v4239_v56, 16 }
  0x37   :  { %231 = vmatprep.mubr.bf16.mxu0 %v5567_v1  ;;  %406 = vst [vmem:[#allocation2 + $0x68] sm:$0x10] %v405_v14 }
  0x38   :  { %v1001_v28 = vrot.slane %v999_v12, 5 }
  0x3e   :  { %4202 = vmatmul.mubr.msk.bf16.gmra.mrb[24].mxu0 %vm107_vm1, %v5276_v15  ;;  %v356_v15 = vld [vmem:[#allocation2 + $0x70] sm:$0x1] }
  0x3f   :  { %241 = vmatprep.mubr.bf16.mxu0 %v5567_v1  ;;  %v396_v1 = vsel %vm5657_vm7, 0, %v395_v63  ;;  %v357_v17 = vsel %vm5651_vm6, 0, %v356_v15  ;;  %v601_v63 = vld [vmem:[#allocation2 + $0x8] sm:$0x1f] }
  0x40   :  { %397 = vst [vmem:[#allocation2 + $0x40] sm:$0x10] %v396_v1  ;;  %358 = vst [vmem:[#allocation2 + $0x70] sm:$0x1] %v357_v17  ;;  %v5800_v17 = vrot.slane %v4302_v55, 9 }
  0x42   :  { %v1525_v51 = vsel %vm5811_vm15, %v5800_v17, %v5804_v25 }
  0x46   :  { %4203 = vmatmul.mubr.msk.bf16.gmra.mrb[28].mxu0 %vm107_vm1, %v5277_v16  ;;  %v407_v16 = vld [vmem:[#allocation2 + $0x70] sm:$0x10] }
  0x47   :  { %v408_v18 = vsel %vm5657_vm7, 0, %v407_v16 }
  0x48   :  { %409 = vst [vmem:[#allocation2 + $0x70] sm:$0x10] %v408_v18  ;;  %v996_v18 = vor.u32 %v995_v4, %v992_v3 }
  0x4a   :  { %v997_v40 = vrot.slane %v996_v18, 4 }
  0xe1   :  { %v173_v41 = vpop.f32.mrb[0].mxu0 }
  0xe2   :  { %v259_v42 = vadd.f32 %v5780_v39, %v173_v41  ;;  %v5783_v43 = vpop.f32.mrb[1].mxu0  ;;  %v4255_v41 = vcombine.high %v898_v10, %v898_v10 }
  0xe3   :  { %v177_v44 = vpop.f32.mrb[2].mxu0 }
  0xe4   :  { %v275_v19 = vmax.f32 %v259_v42, 0.0  ;;  %v260_v46 = vadd.f32 %v5780_v39, %v177_v44  ;;  %v5786_v23 = vpop.f32.mrb[3].mxu0  ;;  %v1102_v42 = vshrl.u32 %v4254_v20, 16 }
  0xe6   :  { %v4750_v47 = vpack.c.bf16 %v275_v19, %v275_v19  ;;  %v276_v48 = vmax.f32 %v260_v46, 0.0 }
  0xe8   :  { %v471_v52 = vshrl.u32 %v4750_v47, 16  ;;  %v4751_v53 = vpack.c.bf16 %v276_v48, %v276_v48  ;;  %v474_v58 = vshll.u32 %v4750_v47, 16  ;;  %v1431_v48 = vld [vmem:[#allocation2 + $0x50] sm:$0x1e] }
  0xe9   :  { %v183_v54 = vpop.f32.mrb[4].mxu0 }
  0xea   :  { %v473_v57 = vrot.slane %v471_v52, 7  ;;  %v478_v59 = vshrl.u32 %v4751_v53, 16  ;;  %v261_v60 = vadd.f32 %v5780_v39, %v183_v54  ;;  %v5789_v61 = vpop.f32.mrb[5].mxu0  ;;  %v481_v0 = vshll.u32 %v4751_v53, 16 }
  0xeb   :  { %v187_v1 = vpop.f32.mrb[6].mxu0  ;;  %v1105_v52 = vshll.u32 %v4254_v20, 16 }
  0xec   :  { %v476_v5 = vor.u32 %v474_v58, %v473_v57  ;;  %v480_v6 = vrot.slane %v478_v59, 7  ;;  %v277_v7 = vmax.f32 %v261_v60, 0.0  ;;  %v262_v8 = vadd.f32 %v5780_v39, %v187_v1  ;;  %v5796_v9 = vpop.f32.mrb[7].mxu0 }
  0xed   :  { %v4318_v59 = vcombine.low %v1431_v48, %v1431_v48  ;;  %v4319_v60 = vcombine.high %v1431_v48, %v1431_v48 }
  0xee   :  { %v602_v13 = vsel %vm5791_vm10, %v476_v5, %v601_v63  ;;  %v483_v14 = vor.u32 %v481_v0, %v480_v6  ;;  %v4752_v15 = vpack.c.bf16 %v277_v7, %v277_v7  ;;  %v278_v16 = vmax.f32 %v262_v8, 0.0  ;;  %v613_v7 = vld [vmem:[#allocation2 + $0x28] sm:$0x1f] }
  0xef   :  { %603 = vst [vmem:[#allocation2 + $0x8] sm:$0x1f] %v602_v13  ;;  %v5832_v63 = vsel %vm5820_vm0, %v997_v40, %v1001_v28  ;;  %v5834_v0 = vshll.u32 %v4255_v41, 16  ;;  %v5838_v5 = vrot.slane %v1102_v42, 4  ;;  %v5842_v13 = vrot.slane %v1105_v52, 5  ;;  %v5316_v52 = vld [vmem:[%s6554_s3 + $0x48] sm:$0xff]  }
  0xf0   :  { %v605_v21 = vsel %vm5791_vm10, %v483_v14, %v604_v11  ;;  %v485_v22 = vshrl.u32 %v4752_v15, 16  ;;  %v4753_v24 = vpack.c.bf16 %v278_v16, %v278_v16  ;;  %v488_v30 = vshll.u32 %v4752_v15, 16 }
  0xf1   :  { %606 = vst [vmem:[#allocation2 + $0x10] sm:$0x1f] %v605_v21  ;;  %v193_v26 = vpop.f32.mrb[8].mxu0 }
  0xf2   :  { %v487_v29 = vrot.slane %v485_v22, 7  ;;  %v492_v31 = vshrl.u32 %v4753_v24, 16  ;;  %v263_v33 = vadd.f32 %v5780_v39, %v193_v26  ;;  %v5807_v34 = vpop.f32.mrb[9].mxu0  ;;  %v495_v37 = vshll.u32 %v4753_v24, 16 }
  0xf3   :  { %v197_v38 = vpop.f32.mrb[10].mxu0 }
  0xf4   :  { %v490_v44 = vor.u32 %v488_v30, %v487_v29  ;;  %v494_v45 = vrot.slane %v492_v31, 7  ;;  %v279_v19 = vmax.f32 %v263_v33, 0.0  ;;  %v264_v46 = vadd.f32 %v5780_v39, %v197_v38  ;;  %v5816_v47 = vpop.f32.mrb[11].mxu0  ;;  %v616_v33 = vld [vmem:[#allocation2 + $0x30] sm:$0x1f] }
  0xf5   :  { %v5854_v38 = vrot.slane %v4319_v60, 5 }
  0xf6   :  { %v608_v53 = vsel %vm5791_vm10, %v490_v44, %v607_v36  ;;  %v497_v54 = vor.u32 %v495_v37, %v494_v45  ;;  %v4754_v55 = vpack.c.bf16 %v279_v19, %v279_v19  ;;  %v280_v56 = vmax.f32 %v264_v46, 0.0  ;;  %v5290_v57 = vld [vmem:[#allocation2] ss:$8 sps:$4 sm:$0xff]  }
  0xf7   :  { %609 = vst [vmem:[#allocation2 + $0x18] sm:$0x1f] %v608_v53  ;;  %v1424_v58 = vld [vmem:[#allocation2 + $0x8] sm:$0x1e]  ;;  %4989 = vmatprep.mubr.bf16.mxu1 %v5290_v57  ;;  %v5852_v37 = vrot.slane %v4318_v59, 9  ;;  %v1108_v53 = vor.u32 %v5842_v13, %v5838_v5 }
  0xf8   :  { %v611_v1 = vsel %vm5791_vm10, %v497_v54, %v610_v50  ;;  %v499_v2 = vshrl.u32 %v4754_v55, 16  ;;  %v4755_v3 = vpack.c.bf16 %v280_v56, %v280_v56  ;;  %v1425_v4 = vld [vmem:[#allocation2 + $0x10] sm:$0x1e]  ;;  %v502_v6 = vshll.u32 %v4754_v55, 16  ;;  %v5840_v12 = vld [vmem:[#allocation2 + $0x8] sm:$0x1f] }
  0xf9   :  { %612 = vst [vmem:[#allocation2 + $0x20] sm:$0x1f] %v611_v1  ;;  %v203_v8 = vpop.f32.mrb[12].mxu0  ;;  %v4304_v10 = vcombine.low %v1424_v58, %v1424_v58  ;;  %v4305_v11 = vcombine.high %v1424_v58, %v1424_v58  ;;  %v4306_v18 = vcombine.low %v1425_v4, %v1425_v4  ;;  %v4307_v25 = vcombine.high %v1425_v4, %v1425_v4  ;;  %v619_v5 = vld [vmem:[#allocation2 + $0x38] sm:$0x1f] }
  0xfa   :  { %v501_v14 = vrot.slane %v499_v2, 7  ;;  %v506_v15 = vshrl.u32 %v4755_v3, 16  ;;  %v265_v16 = vadd.f32 %v5780_v39, %v203_v8  ;;  %v5845_v17 = vpop.f32.mrb[13].mxu0  ;;  %v509_v20 = vshll.u32 %v4755_v3, 16 }
  0xfb   :  { %v207_v21 = vpop.f32.mrb[14].mxu0  ;;  %v4335_v22 = vrot.slane %v4304_v10, 9  ;;  %v1528_v24 = vrot.slane %v4305_v11, 5  ;;  %v5858_v40 = vcombine.low %v5840_v12, %v5840_v12  ;;  %v4336_v50 = vrot.slane %v4306_v18, 9  ;;  %v5322_v11 = vld [vmem:[%s6554_s3 + $0x50] sm:$0xff]  }
  0xfc   :  { %v504_v26 = vor.u32 %v502_v6, %v501_v14  ;;  %v508_v28 = vrot.slane %v506_v15, 7  ;;  %v281_v29 = vmax.f32 %v265_v16, 0.0  ;;  %v266_v30 = vadd.f32 %v5780_v39, %v207_v21  ;;  %v5848_v31 = vpop.f32.mrb[15].mxu0 }
  0xfd   :  { %v1529_v36 = vsel %vm5811_vm15, %v4335_v22, %v1528_v24  ;;  %v1113_v54 = vrot.slane %v5834_v0, 5  ;;  %v1532_v58 = vrot.slane %v4307_v25, 5  ;;  %v1004_v3 = vshrl.u32 %v5858_v40, 16  ;;  %v622_v22 = vld [vmem:[#allocation2 + $0x40] sm:$0x1f]  ;;  %v5346_v0 = vld [vmem:[%s6554_s3 + $0x128] sm:$0xff]  }
  0xfe   :  { %v614_v41 = vsel %vm5791_vm10, %v504_v26, %v613_v7  ;;  %v511_v42 = vor.u32 %v509_v20, %v508_v28  ;;  %v4756_v44 = vpack.c.bf16 %v281_v29, %v281_v29  ;;  %v282_v45 = vmax.f32 %v266_v30, 0.0  ;;  %v5298_v19 = vld [vmem:[#allocation2 + $0x10] ss:$8 sps:$4 sm:$0xff]  }
  0xff   :  { %615 = vst [vmem:[#allocation2 + $0x28] sm:$0x1f] %v614_v41  ;;  %v4366_v46 = vcombine.low %v1525_v51, %v1529_v36  ;;  %v1426_v48 = vld [vmem:[#allocation2 + $0x18] sm:$0x1e]  ;;  %4990 = vmatmul.mubr.bf16.vlgmr.msra.gmra.mrb[0].mxu1 %v5298_v19  ;;  %v4241_v29 = vcombine.high %v5840_v12, %v5840_v12  ;;  %v5887_v30 = vrot.slane %v1108_v53, 4  ;;  %v5897_v53 = vrot.slane %v1004_v3, 4 }
 0x100   :  { %v617_v55 = vsel %vm5791_vm10, %v511_v42, %v616_v33  ;;  %v513_v56 = vshrl.u32 %v4756_v44, 16  ;;  %v4757_v57 = vpack.c.bf16 %v282_v45, %v282_v45  ;;  %v1427_v59 = vld [vmem:[#allocation2 + $0x20] sm:$0x1e]  ;;  %v516_v51 = vshll.u32 %v4756_v44, 16  ;;  %5006 = vmatpush3.bf16.msra.mxu1 %v5756_v27  ;;  %v5324_v45 = vld [vmem:[%s6554_s3 + $0x108] sm:$0xff]   ;;  %v5325_v12 = vld [vmem:[%s6554_s3 + $0x58] sm:$0xff]  }
 0x101   :  { %618 = vst [vmem:[#allocation2 + $0x30] sm:$0x1f] %v617_v55  ;;  %5053 = vmatprep.mubr.bf16.mxu0 %v4366_v46  ;;  %v213_v60 = vpop.f32.mrb[16].mxu0  ;;  %v4308_v1 = vcombine.low %v1426_v48, %v1426_v48  ;;  %v4309_v2 = vcombine.high %v1426_v48, %v1426_v48  ;;  %v4310_v10 = vcombine.low %v1427_v59, %v1427_v59 }
 0x102   :  { %v515_v4 = vrot.slane %v513_v56, 7  ;;  %v520_v6 = vshrl.u32 %v4757_v57, 16  ;;  %v267_v7 = vadd.f32 %v5780_v39, %v213_v60  ;;  %v5872_v8 = vpop.f32.mrb[17].mxu0  ;;  %v523_v13 = vshll.u32 %v4757_v57, 16  ;;  %5007 = vmatprep.subr.bf16.mxu1 %v5316_v52 }
 0x103   :  { %v217_v14 = vpop.f32.mrb[18].mxu0  ;;  %v4337_v15 = vrot.slane %v4308_v1, 9  ;;  %v1536_v16 = vrot.slane %v4309_v2, 5  ;;  %v4311_v18 = vcombine.high %v1427_v59, %v1427_v59  ;;  %v1533_v27 = vsel %vm5811_vm15, %v4336_v50, %v1532_v58 }
 0x104   :  { %v518_v20 = vor.u32 %v516_v51, %v515_v4  ;;  %v522_v21 = vrot.slane %v520_v6, 7  ;;  %v283_v24 = vmax.f32 %v267_v7, 0.0  ;;  %v268_v25 = vadd.f32 %v5780_v39, %v217_v14  ;;  %v5879_v26 = vpop.f32.mrb[19].mxu0  ;;  %5008 = vmatpush3.bf16.msra.mxu1 %v5316_v52 }
 0x105   :  { %v1537_v28 = vsel %vm5811_vm15, %v4337_v15, %v1536_v16  ;;  %v4338_v48 = vrot.slane %v4310_v10, 9  ;;  %v1540_v50 = vrot.slane %v4311_v18, 5  ;;  %5009 = vmatprep.subr.bf16.mxu1 %v5322_v11  ;;  %v1007_v58 = vshll.u32 %v5858_v40, 16 }
 0x106   :  { %v620_v33 = vsel %vm5791_vm10, %v518_v20, %v619_v5  ;;  %v525_v36 = vor.u32 %v523_v13, %v522_v21  ;;  %v4758_v41 = vpack.c.bf16 %v283_v24, %v283_v24  ;;  %v284_v42 = vmax.f32 %v268_v25, 0.0  ;;  %v5304_v44 = vld [vmem:[#allocation2 + $0x20] ss:$8 sps:$4 sm:$0xff]   ;;  %v625_v5 = vld [vmem:[#allocation2 + $0x58] sm:$0x1f]  ;;  %v5330_v20 = vld [vmem:[%s6554_s3 + $0x110] sm:$0xff]  }
 0x107   :  { %621 = vst [vmem:[#allocation2 + $0x38] sm:$0x1f] %v620_v33  ;;  %v4367_v19 = vcombine.low %v1533_v27, %v1537_v28  ;;  %v1428_v46 = vld [vmem:[#allocation2 + $0x28] sm:$0x1e]  ;;  %4993 = vmatprep.mubr.bf16.mxu1 %v5304_v44  ;;  %v5902_v2 = vshll.u32 %v4241_v29, 16  ;;  %v5331_v21 = vld [vmem:[%s6554_s3 + $0x60] sm:$0xff]   ;;  %v1541_v27 = vsel %vm5811_vm15, %v4338_v48, %v1540_v50 }
 0x108   :  { %v623_v55 = vsel %vm5791_vm10, %v525_v36, %v622_v22  ;;  %v527_v52 = vshrl.u32 %v4758_v41, 16  ;;  %v4759_v56 = vpack.c.bf16 %v284_v42, %v284_v42  ;;  %v1429_v57 = vld [vmem:[#allocation2 + $0x30] sm:$0x1e]  ;;  %v4312_v51 = vcombine.low %v1428_v46, %v1428_v46  ;;  %5010 = vmatpush3.bf16.msra.mxu1 %v5322_v11  ;;  %v628_v13 = vld [vmem:[#allocation2 + $0x60] sm:$0x1f]  ;;  %v5926_v33 = vld [vmem:[%s6554_s3 + $0x118] sm:$0xff]  }
 0x109   :  { %624 = vst [vmem:[#allocation2 + $0x40] sm:$0x1f] %v623_v55  ;;  %5054 = vmatmul.mubr.bf16.vlgmr.msra.gmra.mrb[32].mxu0 %v4367_v19  ;;  %v223_v59 = vpop.f32.mrb[20].mxu0  ;;  %v4313_v60 = vcombine.high %v1428_v46, %v1428_v46  ;;  %v4314_v1 = vcombine.low %v1429_v57, %v1429_v57  ;;  %v530_v3 = vshll.u32 %v4758_v41, 16  ;;  %v4315_v18 = vcombine.high %v1429_v57, %v1429_v57  ;;  %v5334_v48 = vld [vmem:[%s6554_s3 + $0x68] sm:$0xff]  }
 0x10a   :  { %v529_v4 = vrot.slane %v527_v52, 7  ;;  %v534_v6 = vshrl.u32 %v4759_v56, 16  ;;  %v269_v7 = vadd.f32 %v5780_v39, %v223_v59  ;;  %v5905_v10 = vpop.f32.mrb[21].mxu0  ;;  %5102 = vmatpush3.bf16.msra.mxu0 %v5766_v32  ;;  %v537_v40 = vshll.u32 %v4759_v56, 16  ;;  %5011 = vmatprep.subr.bf16.mxu1 %v5325_v12 }
 0x10b   :  { %v227_v14 = vpop.f32.mrb[22].mxu0  ;;  %v4339_v15 = vrot.slane %v4312_v51, 9  ;;  %v1544_v16 = vrot.slane %v4313_v60, 5  ;;  %5103 = vmatprep.subr.bf16.mxu0 %v5324_v45  ;;  %v5921_v29 = vrot.slane %v4314_v1, 9  ;;  %v1009_v36 = vrot.slane %v1007_v58, 5 }
 0x10c   :  { %v532_v22 = vor.u32 %v530_v3, %v529_v4  ;;  %v536_v24 = vrot.slane %v534_v6, 7  ;;  %v285_v32 = vmax.f32 %v269_v7, 0.0  ;;  %v270_v11 = vadd.f32 %v5780_v39, %v227_v14  ;;  %v5915_v25 = vpop.f32.mrb[23].mxu0  ;;  %5012 = vmatpush3.bf16.msra.mxu1 %v5325_v12  ;;  %v5935_v58 = vld [vmem:[#allocation2 + $0x8] sm:$0x1f]  ;;  %v5340_v14 = vld [vmem:[%s6554_s3 + $0x70] sm:$0xff]  }
 0x10d   :  { %v1545_v28 = vsel %vm5811_vm15, %v4339_v15, %v1544_v16  ;;  %v1548_v52 = vrot.slane %v4315_v18, 5  ;;  %5013 = vmatprep.subr.bf16.mxu1 %v5331_v21  ;;  %v1010_v56 = vor.u32 %v1009_v36, %v5897_v53  ;;  %v1015_v57 = vrot.slane %v5902_v2, 5  ;;  %v631_v60 = vld [vmem:[#allocation2 + $0x68] sm:$0x1f]  ;;  %v5339_v2 = vld [vmem:[%s6554_s3 + $0x120] sm:$0xff]  }
 0x10e   :  { %v626_v41 = vsel %vm5791_vm10, %v532_v22, %v625_v5  ;;  %v539_v42 = vor.u32 %v537_v40, %v536_v24  ;;  %v4760_v44 = vpack.c.bf16 %v285_v32, %v285_v32  ;;  %v286_v19 = vmax.f32 %v270_v11, 0.0  ;;  %v5309_v46 = vld [vmem:[#allocation2 + $0x30] ss:$8 sps:$4 sm:$0xff]   ;;  %5104 = vmatpush3.bf16.msra.mxu0 %v5324_v45 }
 0x10f   :  { %627 = vst [vmem:[#allocation2 + $0x58] sm:$0x1f] %v626_v41  ;;  %v4368_v50 = vcombine.low %v1541_v27, %v1545_v28  ;;  %v1430_v55 = vld [vmem:[#allocation2 + $0x38] sm:$0x1e]  ;;  %5105 = vmatprep.subr.bf16.mxu0 %v5330_v20  ;;  %4994 = vmatmul.mubr.bf16.gmra.mrb[4].mxu1 %v5309_v46  ;;  %v1557_v53 = vsel %vm5811_vm15, %v5852_v37, %v5854_v38  ;;  %v1011_v5 = vrot.slane %v1010_v56, 4 }
 0x110   :  { %v629_v45 = vsel %vm5791_vm10, %v539_v42, %v628_v13  ;;  %v541_v12 = vshrl.u32 %v4760_v44, 16  ;;  %v544_v59 = vshll.u32 %v4760_v44, 16  ;;  %v4761_v51 = vpack.c.bf16 %v286_v19, %v286_v19  ;;  %5014 = vmatpush3.bf16.msra.mxu1 %v5331_v21  ;;  %v5952_v15 = vld [vmem:[#allocation2 + $0x10] sm:$0x1f] }
 0x111   :  { %630 = vst [vmem:[#allocation2 + $0x60] sm:$0x1f] %v629_v45  ;;  %5057 = vmatprep.mubr.bf16.mxu0 %v4368_v50  ;;  %v233_v1 = vpop.f32.mrb[24].mxu0  ;;  %v4316_v4 = vcombine.low %v1430_v55, %v1430_v55  ;;  %v4317_v3 = vcombine.high %v1430_v55, %v1430_v55  ;;  %v5956_v16 = vcombine.low %v5935_v58, %v5935_v58  ;;  %v634_v41 = vld [vmem:[#allocation2 + $0x70] sm:$0x1f] }
 0x112   :  { %v543_v6 = vrot.slane %v541_v12, 7  ;;  %v548_v7 = vshrl.u32 %v4761_v51, 16  ;;  %v271_v40 = vadd.f32 %v5780_v39, %v233_v1  ;;  %v5947_v13 = vpop.f32.mrb[25].mxu0  ;;  %5106 = vmatpush3.bf16.msra.mxu0 %v5330_v20  ;;  %v551_v18 = vshll.u32 %v4761_v51, 16  ;;  %5015 = vmatprep.subr.bf16.mxu1 %v5334_v48  ;;  %v637_v1 = vld [vmem:[#allocation2 + $0x78] sm:$0x1f] }
 0x113   :  { %v237_v22 = vpop.f32.mrb[26].mxu0  ;;  %v4341_v24 = vrot.slane %v4316_v4, 9  ;;  %v1552_v32 = vrot.slane %v4317_v3, 5  ;;  %5107 = vmatprep.subr.bf16.mxu0 %v5926_v33  ;;  %v5961_v20 = vsel %vm5820_vm0, %v1011_v5, %v1015_v57  ;;  %v1549_v42 = vsel %vm5811_vm15, %v5921_v29, %v1548_v52 }
 0x114   :  { %v546_v21 = vor.u32 %v544_v59, %v543_v6  ;;  %v550_v11 = vrot.slane %v548_v7, 7  ;;  %v287_v27 = vmax.f32 %v271_v40, 0.0  ;;  %v272_v28 = vadd.f32 %v5780_v39, %v237_v22  ;;  %v5964_v36 = vpop.f32.mrb[27].mxu0  ;;  %5016 = vmatpush3.bf16.msra.mxu1 %v5334_v48 }
 0x115   :  { %v1553_v44 = vsel %vm5811_vm15, %v4341_v24, %v1552_v32  ;;  %v4286_v19 = vcombine.low %v5832_v63, %v5961_v20  ;;  %v5978_v46 = vsel %vm5820_vm0, %v5887_v30, %v1113_v54  ;;  %5017 = vmatprep.subr.bf16.mxu1 %v5340_v14  ;;  %v5347_v54 = vld [vmem:[%s6554_s3 + $0x78] sm:$0xff]   ;;  %v4415_v30 = vcombine.high %v5935_v58, %v5935_v58  ;;  %v5352_v32 = vld [vmem:[%s6554_s3 + $0x130] sm:$0xff]   ;;  %v2041_v20 = vld [vmem:[#allocation2 + $0x20] sm:$0x1f] }
 0x116   :  { %v632_v50 = vsel %vm5791_vm10, %v546_v21, %v631_v60  ;;  %v553_v55 = vor.u32 %v551_v18, %v550_v11  ;;  %v4762_v56 = vpack.c.bf16 %v287_v27, %v287_v27  ;;  %v288_v57 = vmax.f32 %v272_v28, 0.0  ;;  %v5315_v29 = vld [vmem:[#allocation2 + $0x50] ss:$8 sps:$4 sm:$0xff]   ;;  %5108 = vmatpush3.bf16.msra.mxu0 %v5926_v33 }
 0x117   :  { %633 = vst [vmem:[#allocation2 + $0x68] sm:$0x1f] %v632_v50  ;;  %v4369_v52 = vcombine.low %v1549_v42, %v1553_v44  ;;  %v1432_v45 = vld [vmem:[#allocation2 + $0x58] sm:$0x1e]  ;;  %5109 = vmatprep.subr.bf16.mxu0 %v5339_v2  ;;  %v5993_v33 = vcombine.low %v5952_v15, %v5952_v15  ;;  %4997 = vmatprep.mubr.bf16.mxu1 %v5315_v29  ;;  %v2135_v60 = vshrl.u32 %v5956_v16, 16  ;;  %v6009_v42 = vld [vmem:[%s6554_s3 + $0xc0] sm:$0xff]  }
 0x118   :  { %v635_v48 = vsel %vm5791_vm10, %v553_v55, %v634_v41  ;;  %v555_v12 = vshrl.u32 %v4762_v56, 16  ;;  %v4763_v59 = vpack.c.bf16 %v288_v57, %v288_v57  ;;  %v1433_v51 = vld [vmem:[#allocation2 + $0x60] sm:$0x1e]  ;;  %v4320_v3 = vcombine.low %v1432_v45, %v1432_v45  ;;  %5018 = vmatpush3.bf16.msra.mxu1 %v5340_v14 }
 0x119   :  { %636 = vst [vmem:[#allocation2 + $0x70] sm:$0x1f] %v635_v48  ;;  %5058 = vmatmul.mubr.bf16.gmra.mrb[36].mxu0 %v4369_v52  ;;  %v243_v4 = vpop.f32.mrb[28].mxu0  ;;  %v4321_v5 = vcombine.high %v1432_v45, %v1432_v45  ;;  %v4322_v58 = vcombine.low %v1433_v51, %v1433_v51  ;;  %v4323_v6 = vcombine.high %v1433_v51, %v1433_v51  ;;  %v558_v40 = vshll.u32 %v4762_v56, 16  ;;  %v640_v56 = vld [vmem:[#allocation2 + $0x80] sm:$0x1f] }
 0x11a   :  { %v557_v7 = vrot.slane %v555_v12, 7  ;;  %v562_v18 = vshrl.u32 %v4763_v59, 16  ;;  %v273_v22 = vadd.f32 %v5780_v39, %v243_v4  ;;  %v5999_v24 = vpop.f32.mrb[29].mxu0  ;;  %5110 = vmatpush3.bf16.msra.mxu0 %v5339_v2  ;;  %v565_v21 = vshll.u32 %v4763_v59, 16  ;;  %5019 = vmatprep.subr.bf16.mxu1 %v5347_v54 }
 0x11b   :  { %v247_v11 = vpop.f32.mrb[30].mxu0  ;;  %v4343_v27 = vrot.slane %v4320_v3, 9  ;;  %v1560_v28 = vrot.slane %v4321_v5, 5  ;;  %v6004_v41 = vrot.slane %v4322_v58, 9  ;;  %5111 = vmatprep.subr.bf16.mxu0 %v5346_v0  ;;  %v1564_v29 = vrot.slane %v4323_v6, 5 }
 0x11c   :  { %v560_v44 = vor.u32 %v558_v40, %v557_v7  ;;  %v564_v2 = vrot.slane %v562_v18, 7  ;;  %v289_v14 = vmax.f32 %v273_v22, 0.0  ;;  %v274_v50 = vadd.f32 %v5780_v39, %v247_v11  ;;  %v6012_v55 = vpop.f32.mrb[31].mxu0  ;;  %5020 = vmatpush3.bf16.msra.mxu1 %v5347_v54  ;;  %v643_v6 = vld [vmem:[#allocation2 + $0x88] sm:$0x1f]  ;;  %v6040_v18 = vld [vmem:[%s6554_s3 + $0x180] sm:$0xff]  }
 0x11d   :  { %v1561_v57 = vsel %vm5811_vm15, %v4343_v27, %v1560_v28  ;;  %v4417_v52 = vcombine.high %v5952_v15, %v5952_v15  ;;  %v2137_v45 = vrot.slane %v2135_v60, 4  ;;  %v1565_v60 = vsel %vm5811_vm15, %v6004_v41, %v1564_v29  ;;  %5069 = vmatprep.subr.bf16.mxu1 %v6009_v42 }
 0x11e   :  { %v638_v48 = vsel %vm5791_vm10, %v560_v44, %v637_v1  ;;  %v567_v12 = vor.u32 %v565_v21, %v564_v2  ;;  %v4764_v59 = vpack.c.bf16 %v289_v14, %v289_v14  ;;  %v290_v51 = vmax.f32 %v274_v50, 0.0  ;;  %v5323_v4 = vld [vmem:[#allocation2 + $0x60] ss:$8 sps:$4 sm:$0xff]   ;;  %5112 = vmatpush3.bf16.msra.mxu0 %v5346_v0  ;;  %v5366_v0 = vld [vmem:[%s6554_s3 + $0x138] sm:$0xff]   ;;  %v892_v14 = vld [vmem:[#allocation2 + $0x10] sm:$0x1f] }
 0x11f   :  { %639 = vst [vmem:[#allocation2 + $0x78] sm:$0x1f] %v638_v48  ;;  %v4370_v39 = vcombine.low %v1557_v53, %v1561_v57  ;;  %v1434_v3 = vld [vmem:[#allocation2 + $0x68] sm:$0x1e]  ;;  %5113 = vmatprep.subr.bf16.mxu0 %v5352_v32  ;;  %v2138_v1 = vshll.u32 %v5956_v16, 16  ;;  %v6029_v5 = vshll.u32 %v4415_v30, 16  ;;  %4998 = vmatmul.mubr.bf16.gmra.mrb[8].mxu1 %v5323_v4 }
 0x120   :  { %v641_v37 = vsel %vm5791_vm10, %v567_v12, %v640_v56  ;;  %v569_v38 = vshrl.u32 %v4764_v59, 16  ;;  %v572_v53 = vshll.u32 %v4764_v59, 16  ;;  %v4765_v54 = vpack.c.bf16 %v290_v51, %v290_v51  ;;  %v1435_v58 = vld [vmem:[#allocation2 + $0x70] sm:$0x1e] }
 0x121   :  { %642 = vst [vmem:[#allocation2 + $0x80] sm:$0x1f] %v641_v37  ;;  %5061 = vmatprep.mubr.bf16.mxu0 %v4370_v39  ;;  %v4324_v16 = vcombine.low %v1434_v3, %v1434_v3  ;;  %v4325_v30 = vcombine.high %v1434_v3, %v1434_v3  ;;  %v4326_v7 = vcombine.low %v1435_v58, %v1435_v58  ;;  %v2140_v27 = vrot.slane %v2138_v1, 5  ;;  %v646_v48 = vld [vmem:[#allocation2 + $0x90] sm:$0x1f] }
 0x122   :  { %v4327_v40 = vcombine.high %v1435_v58, %v1435_v58  ;;  %v571_v22 = vrot.slane %v569_v38, 7  ;;  %v576_v21 = vshrl.u32 %v4765_v54, 16  ;;  %v579_v11 = vshll.u32 %v4765_v54, 16  ;;  %5114 = vmatpush3.bf16.msra.mxu0 %v5352_v32  ;;  %v893_v58 = vld [vmem:[#allocation2 + $0x18] sm:$0x1f] }
 0x123   :  { %v4345_v28 = vrot.slane %v4324_v16, 9  ;;  %v1568_v41 = vrot.slane %v4325_v30, 5  ;;  %v4346_v44 = vrot.slane %v4326_v7, 9  ;;  %5115 = vmatprep.subr.bf16.mxu0 %v5366_v0  ;;  %v2141_v57 = vor.u32 %v2140_v27, %v2137_v45 }
 0x124   :  { %v1572_v2 = vrot.slane %v4327_v40, 5  ;;  %v574_v50 = vor.u32 %v572_v53, %v571_v22  ;;  %v578_v56 = vrot.slane %v576_v21, 7  ;;  %v2146_v29 = vrot.slane %v6029_v5, 5  ;;  %v894_v21 = vld [vmem:[#allocation2 + $0x20] sm:$0x1f] }
 0x125   :  { %v1569_v12 = vsel %vm5811_vm15, %v4345_v28, %v1568_v41  ;;  %v2149_v32 = vshrl.u32 %v5993_v33, 16  ;;  %v2152_v51 = vshll.u32 %v5993_v33, 16  ;;  %v4242_v37 = vcombine.low %v892_v14, %v892_v14  ;;  %v895_v41 = vld [vmem:[#allocation2 + $0x28] sm:$0x1f] }
 0x126   :  { %v1573_v59 = vsel %vm5811_vm15, %v4346_v44, %v1572_v2  ;;  %v644_v4 = vsel %vm5791_vm10, %v574_v50, %v643_v6  ;;  %v581_v39 = vor.u32 %v579_v11, %v578_v56  ;;  %v4371_v3 = vcombine.low %v1565_v60, %v1569_v12  ;;  %v5332_v1 = vld [vmem:[#allocation2 + $0x70] ss:$8 sps:$4 sm:$0xff]   ;;  %5116 = vmatpush3.bf16.msra.mxu0 %v5366_v0 }
 0x127   :  { %v1436_v45 = vld [vmem:[#allocation2 + $0x78] sm:$0x1e]  ;;  %645 = vst [vmem:[#allocation2 + $0x88] sm:$0x1f] %v644_v4  ;;  %v2142_v53 = vrot.slane %v2141_v57, 4  ;;  %v2151_v54 = vrot.slane %v2149_v32, 4  ;;  %5165 = vmatprep.subr.bf16.mxu0 %v6040_v18  ;;  %5001 = vmatprep.mubr.bf16.mxu1 %v5332_v1  ;;  %v4243_v0 = vcombine.high %v892_v14, %v892_v14  ;;  %v4244_v28 = vcombine.low %v893_v58, %v893_v58 }
 0x128   :  { %v4328_v5 = vcombine.low %v1436_v45, %v1436_v45  ;;  %v4329_v38 = vcombine.high %v1436_v45, %v1436_v45  ;;  %v647_v33 = vsel %vm5791_vm10, %v581_v39, %v646_v48  ;;  %5062 = vmatmul.mubr.bf16.gmra.mrb[40].mxu0 %v4371_v3  ;;  %v1437_v6 = vld [vmem:[#allocation2 + $0x80] sm:$0x1e]  ;;  %v2154_v16 = vrot.slane %v2152_v51, 5 }
 0x129   :  { %v2158_v60 = vshll.u32 %v4417_v52, 16  ;;  %648 = vst [vmem:[#allocation2 + $0x90] sm:$0x1f] %v647_v33  ;;  %v4330_v40 = vcombine.low %v1437_v6, %v1437_v6  ;;  %v4331_v22 = vcombine.high %v1437_v6, %v1437_v6  ;;  %v2147_v11 = vsel %vm5820_vm0, %v2142_v53, %v2146_v29 }
 0x12a   :  { %v4347_v30 = vrot.slane %v4328_v5, 9  ;;  %v1576_v7 = vrot.slane %v4329_v38, 5  ;;  %v2155_v62 = vor.u32 %v2154_v16, %v2151_v54  ;;  %v4245_v52 = vcombine.high %v893_v58, %v893_v58 }
 0x12b   :  { %v2160_v27 = vrot.slane %v2158_v60, 5  ;;  %v4348_v2 = vrot.slane %v4330_v40, 9  ;;  %v1580_v15 = vrot.slane %v4331_v22, 5  ;;  %v1018_v56 = vshrl.u32 %v4242_v37, 16 }
 0x12c   :  { %v1577_v44 = vsel %vm5811_vm15, %v4347_v30, %v1576_v7  ;;  %v2156_v50 = vrot.slane %v2155_v62, 4  ;;  %v1021_v57 = vshll.u32 %v4242_v37, 16  ;;  %v1027_v12 = vshll.u32 %v4243_v0, 16 }
 0x12d   :  { %v4372_v14 = vcombine.low %v1573_v59, %v1577_v44  ;;  %v1581_v48 = vsel %vm5811_vm15, %v4348_v2, %v1580_v15  ;;  %v1032_v32 = vshrl.u32 %v4244_v28, 16  ;;  %v1035_v29 = vshll.u32 %v4244_v28, 16 }
 0x12e   :  { %v5341_v51 = vld [vmem:[#allocation2 + $0x80] ss:$8 sps:$4 sm:$0xff]   ;;  %v2161_v39 = vsel %vm5820_vm0, %v2156_v50, %v2160_v27  ;;  %v4246_v3 = vcombine.low %v894_v21, %v894_v21  ;;  %v4247_v1 = vcombine.high %v894_v21, %v894_v21  ;;  %v4248_v45 = vcombine.low %v895_v41, %v895_v41  ;;  %v2040_v21 = vld [vmem:[#allocation2 + $0x18] sm:$0x1f] }
 0x12f   :  { %5065 = vmatprep.mubr.bf16.mxu0 %v4372_v14  ;;  %v1438_v4 = vld [vmem:[#allocation2 + $0x88] sm:$0x1e]  ;;  %v4462_v38 = vcombine.low %v2147_v11, %v2161_v39  ;;  %v1020_v53 = vrot.slane %v1018_v56, 4  ;;  %5002 = vmatmul.mubr.bf16.gmra.mrb[12].mxu1 %v5341_v51  ;;  %v1023_v37 = vrot.slane %v1021_v57, 5  ;;  %v1029_v54 = vrot.slane %v1027_v12, 5 }
 0x130   :  { %v4332_v5 = vcombine.low %v1438_v4, %v1438_v4  ;;  %v4333_v59 = vcombine.high %v1438_v4, %v1438_v4  ;;  %v1034_v58 = vrot.slane %v1032_v32, 4  ;;  %v1037_v33 = vrot.slane %v1035_v29, 5  ;;  %5021 = vmatprep.mubr.bf16.mxu1 %v4286_v19  ;;  %v5367_v51 = vld [vmem:[%s6554_s3 + $0xc8] sm:$0xff]  }
 0x131   :  { %v1041_v60 = vshll.u32 %v4245_v52, 16  ;;  %v4249_v0 = vcombine.high %v895_v41, %v895_v41  ;;  %v1024_v30 = vor.u32 %v1023_v37, %v1020_v53  ;;  %v1046_v40 = vshrl.u32 %v4246_v3, 16 }
 0x132   :  { %v4349_v6 = vrot.slane %v4332_v5, 9  ;;  %v1584_v16 = vrot.slane %v4333_v59, 5  ;;  %v1038_v7 = vor.u32 %v1037_v33, %v1034_v58  ;;  %v1049_v22 = vshll.u32 %v4246_v3, 16 }
 0x133   :  { %v1043_v62 = vrot.slane %v1041_v60, 5  ;;  %v1055_v27 = vshll.u32 %v4247_v1, 16  ;;  %v1060_v28 = vshrl.u32 %v4248_v45, 16  ;;  %v1025_v2 = vrot.slane %v1024_v30, 4 }
 0x134   :  { %v1585_v11 = vsel %vm5811_vm15, %v4349_v6, %v1584_v16  ;;  %v1039_v15 = vrot.slane %v1038_v7, 4  ;;  %v1048_v63 = vrot.slane %v1046_v40, 4  ;;  %v1051_v19 = vrot.slane %v1049_v22, 5  ;;  %v2043_v16 = vld [vmem:[#allocation2 + $0x30] sm:$0x1f] }
 0x135   :  { %v4373_v44 = vcombine.low %v1581_v48, %v1585_v11  ;;  %v1057_v14 = vrot.slane %v1055_v27, 5  ;;  %v1062_v52 = vrot.slane %v1060_v28, 4  ;;  %v1063_v41 = vshll.u32 %v4248_v45, 16  ;;  %v5377_v40 = vld [vmem:[%s6554_s3 + $0xd0] sm:$0xff]  }
 0x136   :  { %v1030_v50 = vsel %vm5820_vm0, %v1025_v2, %v1029_v54  ;;  %v1044_v56 = vsel %vm5820_vm0, %v1039_v15, %v1043_v62  ;;  %v1069_v57 = vshll.u32 %v4249_v0, 16  ;;  %v4418_v12 = vcombine.low %v2040_v21, %v2040_v21  ;;  %v2042_v54 = vld [vmem:[#allocation2 + $0x28] sm:$0x1f] }
 0x137   :  { %5066 = vmatmul.mubr.bf16.gmra.mrb[44].mxu0 %v4373_v44  ;;  %v4287_v32 = vcombine.low %v1030_v50, %v1044_v56  ;;  %v1052_v48 = vor.u32 %v1051_v19, %v1048_v63  ;;  %v1065_v29 = vrot.slane %v1063_v41, 5  ;;  %v4419_v4 = vcombine.high %v2040_v21, %v2040_v21  ;;  %v5387_v19 = vld [vmem:[%s6554_s3 + $0xd8] sm:$0xff]   ;;  %v896_v56 = vld [vmem:[#allocation2 + $0x30] sm:$0x1f] }
 0x138   :  { %5117 = vmatprep.mubr.bf16.mxu0 %v4462_v38  ;;  %v1071_v39 = vrot.slane %v1069_v57, 5  ;;  %v4420_v3 = vcombine.low %v2041_v20, %v2041_v20  ;;  %v4421_v1 = vcombine.high %v2041_v20, %v2041_v20  ;;  %v2163_v45 = vshrl.u32 %v4418_v12, 16 }
 0x139   :  { %5022 = vmatmul.mubr.bf16.vlgmr.msra.gmra.mrb[16].mxu1 %v4287_v32  ;;  %v1053_v5 = vrot.slane %v1052_v48, 4  ;;  %v1066_v59 = vor.u32 %v1065_v29, %v1062_v52  ;;  %v2166_v53 = vshll.u32 %v4418_v12, 16  ;;  %v2172_v37 = vshll.u32 %v4419_v4, 16  ;;  %v897_v29 = vld [vmem:[#allocation2 + $0x38] sm:$0x1f] }
 0x13a   :  { %5070 = vmatpush3.bf16.msra.mxu1 %v6009_v42  ;;  %v2165_v38 = vrot.slane %v2163_v45, 4  ;;  %v2177_v58 = vshrl.u32 %v4420_v3, 16  ;;  %v2180_v33 = vshll.u32 %v4420_v3, 16  ;;  %v2186_v6 = vshll.u32 %v4421_v1, 16 }
 0x13b   :  { %v1058_v60 = vsel %vm5820_vm0, %v1053_v5, %v1057_v14  ;;  %v1067_v0 = vrot.slane %v1066_v59, 4  ;;  %5071 = vmatprep.subr.bf16.mxu1 %v5367_v51  ;;  %v2168_v30 = vrot.slane %v2166_v53, 5  ;;  %v2174_v7 = vrot.slane %v2172_v37, 5 }
 0x13c   :  { %v2179_v22 = vrot.slane %v2177_v58, 4  ;;  %v2182_v21 = vrot.slane %v2180_v33, 5  ;;  %v2188_v11 = vrot.slane %v2186_v6, 5  ;;  %v4422_v42 = vcombine.low %v2042_v54, %v2042_v54  ;;  %v5386_v58 = vld [vmem:[%s6554_s3 + $0x188] sm:$0xff]   ;;  %v5397_v33 = vld [vmem:[%s6554_s3 + $0xe0] sm:$0xff]  }
 0x13d   :  { %v1072_v62 = vsel %vm5820_vm0, %v1067_v0, %v1071_v39  ;;  %v2169_v27 = vor.u32 %v2168_v30, %v2165_v38  ;;  %v4423_v28 = vcombine.high %v2042_v54, %v2042_v54  ;;  %v4424_v44 = vcombine.low %v2043_v16, %v2043_v16 }
 0x13e   :  { %v4288_v2 = vcombine.low %v1058_v60, %v1072_v62  ;;  %5072 = vmatpush3.bf16.msra.mxu1 %v5367_v51  ;;  %v2183_v15 = vor.u32 %v2182_v21, %v2179_v22  ;;  %v4425_v63 = vcombine.high %v2043_v16, %v2043_v16  ;;  %v2191_v20 = vshrl.u32 %v4422_v42, 16  ;;  %v899_v21 = vld [vmem:[#allocation2 + $0x58] sm:$0x1f] }
 0x13f   :  { %v2170_v14 = vrot.slane %v2169_v27, 4  ;;  %v2194_v52 = vshll.u32 %v4422_v42, 16  ;;  %v2200_v41 = vshll.u32 %v4423_v28, 16  ;;  %v2205_v50 = vshrl.u32 %v4424_v44, 16  ;;  %5073 = vmatprep.subr.bf16.mxu1 %v5377_v40  ;;  %v2044_v28 = vld [vmem:[#allocation2 + $0x38] sm:$0x1f] }
 0x140   :  { %5025 = vmatprep.mubr.bf16.mxu1 %v4288_v2  ;;  %v2184_v57 = vrot.slane %v2183_v15, 4  ;;  %v2193_v12 = vrot.slane %v2191_v20, 4  ;;  %v2208_v32 = vshll.u32 %v4424_v44, 16  ;;  %v2214_v48 = vshll.u32 %v4425_v63, 16  ;;  %v5392_v20 = vld [vmem:[%s6554_s3 + $0x190] sm:$0xff]  }
 0x141   :  { %v2175_v51 = vsel %vm5820_vm0, %v2170_v14, %v2174_v7  ;;  %v2196_v4 = vrot.slane %v2194_v52, 5  ;;  %v2202_v39 = vrot.slane %v2200_v41, 5  ;;  %v2207_v3 = vrot.slane %v2205_v50, 4  ;;  %v5407_v50 = vld [vmem:[%s6554_s3 + $0xe8] sm:$0xff]  }
 0x142   :  { %v2189_v1 = vsel %vm5820_vm0, %v2184_v57, %v2188_v11  ;;  %v2210_v45 = vrot.slane %v2208_v32, 5  ;;  %v2216_v5 = vrot.slane %v2214_v48, 5  ;;  %v4250_v59 = vcombine.low %v896_v56, %v896_v56  ;;  %5074 = vmatpush3.bf16.msra.mxu1 %v5377_v40 }
 0x143   :  { %v4463_v53 = vcombine.low %v2175_v51, %v2189_v1  ;;  %v2197_v37 = vor.u32 %v2196_v4, %v2193_v12  ;;  %v4251_v54 = vcombine.high %v896_v56, %v896_v56  ;;  %v4252_v38 = vcombine.low %v897_v29, %v897_v29  ;;  %5075 = vmatprep.subr.bf16.mxu1 %v5387_v19 }
 0x144   :  { %v2211_v6 = vor.u32 %v2210_v45, %v2207_v3  ;;  %v4253_v16 = vcombine.high %v897_v29, %v897_v29  ;;  %v1074_v60 = vshrl.u32 %v4250_v59, 16  ;;  %v1077_v0 = vshll.u32 %v4250_v59, 16  ;;  %v5417_v59 = vld [vmem:[%s6554_s3 + $0xf0] sm:$0xff]  }
 0x145   :  { %5118 = vmatmul.mubr.bf16.vlgmr.msra.gmra.mrb[48].mxu0 %v4463_v53  ;;  %v2198_v30 = vrot.slane %v2197_v37, 4  ;;  %v1083_v7 = vshll.u32 %v4251_v54, 16  ;;  %v1088_v40 = vshrl.u32 %v4252_v38, 16  ;;  %v1091_v22 = vshll.u32 %v4252_v38, 16 }
 0x146   :  { %v2212_v11 = vrot.slane %v2211_v6, 4  ;;  %5166 = vmatpush3.bf16.msra.mxu0 %v6040_v18  ;;  %v1076_v42 = vrot.slane %v1074_v60, 4  ;;  %v1079_v62 = vrot.slane %v1077_v0, 5  ;;  %v1097_v27 = vshll.u32 %v4253_v16, 16  ;;  %5076 = vmatpush3.bf16.msra.mxu1 %v5387_v19  ;;  %v2045_v19 = vld [vmem:[#allocation2 + $0x40] sm:$0x1f] }
 0x147   :  { %v2203_v44 = vsel %vm5820_vm0, %v2198_v30, %v2202_v39  ;;  %v1085_v2 = vrot.slane %v1083_v7, 5  ;;  %v1090_v15 = vrot.slane %v1088_v40, 4  ;;  %v1093_v63 = vrot.slane %v1091_v22, 5  ;;  %5167 = vmatprep.subr.bf16.mxu0 %v5386_v58  ;;  %5077 = vmatprep.subr.bf16.mxu1 %v5397_v33  ;;  %v2046_v60 = vld [vmem:[#allocation2 + $0x58] sm:$0x1f] }
 0x148   :  { %v2217_v18 = vsel %vm5820_vm0, %v2212_v11, %v2216_v5  ;;  %v1080_v14 = vor.u32 %v1079_v62, %v1076_v42  ;;  %v1099_v52 = vrot.slane %v1097_v27, 5  ;;  %v4256_v41 = vcombine.low %v899_v21, %v899_v21  ;;  %v5406_v5 = vld [vmem:[%s6554_s3 + $0x198] sm:$0xff]   ;;  %v2047_v22 = vld [vmem:[#allocation2 + $0x60] sm:$0x1f] }
 0x149   :  { %v4464_v56 = vcombine.low %v2203_v44, %v2217_v18  ;;  %v1094_v57 = vor.u32 %v1093_v63, %v1090_v15  ;;  %v4257_v12 = vcombine.high %v899_v21, %v899_v21  ;;  %v4426_v32 = vcombine.low %v2044_v28, %v2044_v28  ;;  %v5412_v27 = vld [vmem:[%s6554_s3 + $0x1a0] sm:$0xff]  }
 0x14a   :  { %v1081_v48 = vrot.slane %v1080_v14, 4  ;;  %v1116_v29 = vshrl.u32 %v4256_v41, 16  ;;  %v1119_v51 = vshll.u32 %v4256_v41, 16  ;;  %5168 = vmatpush3.bf16.msra.mxu0 %v5386_v58  ;;  %v4427_v4 = vcombine.high %v2044_v28, %v2044_v28  ;;  %5078 = vmatpush3.bf16.msra.mxu1 %v5397_v33  ;;  %v5424_v28 = vld [vmem:[%s6554_s3 + $0xf8] sm:$0xff]  }
 0x14b   :  { %5121 = vmatprep.mubr.bf16.mxu0 %v4464_v56  ;;  %v1095_v39 = vrot.slane %v1094_v57, 4  ;;  %v1125_v3 = vshll.u32 %v4257_v12, 16  ;;  %v4428_v1 = vcombine.low %v2045_v19, %v2045_v19  ;;  %v4429_v45 = vcombine.high %v2045_v19, %v2045_v19  ;;  %5169 = vmatprep.subr.bf16.mxu0 %v5392_v20 }
 0x14c   :  { %v1086_v53 = vsel %vm5820_vm0, %v1081_v48, %v1085_v2  ;;  %v1118_v37 = vrot.slane %v1116_v29, 4  ;;  %v1121_v54 = vrot.slane %v1119_v51, 5  ;;  %v2219_v38 = vshrl.u32 %v4426_v32, 16  ;;  %5079 = vmatprep.subr.bf16.mxu1 %v5407_v50  ;;  %v900_v29 = vld [vmem:[#allocation2 + $0x60] sm:$0x1f]  ;;  %v5423_v51 = vld [vmem:[%s6554_s3 + $0x1a8] sm:$0xff]  }
 0x14d   :  { %v1100_v58 = vsel %vm5820_vm0, %v1095_v39, %v1099_v52  ;;  %v1127_v33 = vrot.slane %v1125_v3, 5  ;;  %v2222_v6 = vshll.u32 %v4426_v32, 16  ;;  %v2228_v16 = vshll.u32 %v4427_v4, 16  ;;  %v6134_v4 = vld [vmem:[%s6554_s3 + $0x140] sm:$0xff]  }
 0x14e   :  { %v4289_v0 = vcombine.low %v1086_v53, %v1100_v58  ;;  %v1122_v30 = vor.u32 %v1121_v54, %v1118_v37  ;;  %v2221_v7 = vrot.slane %v2219_v38, 4  ;;  %v2233_v40 = vshrl.u32 %v4428_v1, 16  ;;  %5170 = vmatpush3.bf16.msra.mxu0 %v5392_v20  ;;  %5080 = vmatpush3.bf16.msra.mxu1 %v5407_v50 }
 0x14f   :  { %v2224_v21 = vrot.slane %v2222_v6, 5  ;;  %v2230_v11 = vrot.slane %v2228_v16, 5  ;;  %v2236_v42 = vshll.u32 %v4428_v1, 16  ;;  %v2242_v62 = vshll.u32 %v4429_v45, 16  ;;  %5171 = vmatprep.subr.bf16.mxu0 %v5406_v5  ;;  %5081 = vmatprep.subr.bf16.mxu1 %v5417_v59 }
 0x150   :  { %5026 = vmatmul.mubr.bf16.gmra.mrb[20].mxu1 %v4289_v0  ;;  %v1123_v44 = vrot.slane %v1122_v30, 4  ;;  %v2235_v2 = vrot.slane %v2233_v40, 4  ;;  %v4430_v15 = vcombine.low %v2046_v60, %v2046_v60  ;;  %v4431_v63 = vcombine.high %v2046_v60, %v2046_v60 }
 0x151   :  { %v2225_v20 = vor.u32 %v2224_v21, %v2221_v7  ;;  %v2238_v18 = vrot.slane %v2236_v42, 5  ;;  %v2244_v14 = vrot.slane %v2242_v62, 5  ;;  %v4432_v52 = vcombine.low %v2047_v22, %v2047_v22  ;;  %v5429_v21 = vld [vmem:[%s6554_s3 + $0x1b0] sm:$0xff]  }
 0x152   :  { %v1128_v41 = vsel %vm5820_vm0, %v1123_v44, %v1127_v33  ;;  %v4433_v19 = vcombine.high %v2047_v22, %v2047_v22  ;;  %v2247_v50 = vshrl.u32 %v4430_v15, 16  ;;  %v2250_v56 = vshll.u32 %v4430_v15, 16  ;;  %5172 = vmatpush3.bf16.msra.mxu0 %v5406_v5  ;;  %5082 = vmatpush3.bf16.msra.mxu1 %v5417_v59 }
 0x153   :  { %v4290_v57 = vcombine.low %v5978_v46, %v1128_v41  ;;  %v2226_v12 = vrot.slane %v2225_v20, 4  ;;  %v2239_v32 = vor.u32 %v2238_v18, %v2235_v2  ;;  %v2256_v48 = vshll.u32 %v4431_v63, 16  ;;  %5173 = vmatprep.subr.bf16.mxu0 %v5412_v27  ;;  %5083 = vmatprep.subr.bf16.mxu1 %v5424_v28  ;;  %v901_v46 = vld [vmem:[#allocation2 + $0x68] sm:$0x1f]  ;;  %v903_v20 = vld [vmem:[#allocation2 + $0x78] sm:$0x1f] }
 0x154   :  { %v2249_v39 = vrot.slane %v2247_v50, 4  ;;  %v2252_v3 = vrot.slane %v2250_v56, 5  ;;  %v2261_v1 = vshrl.u32 %v4432_v52, 16  ;;  %v2264_v45 = vshll.u32 %v4432_v52, 16 }
 0x155   :  { %5029 = vmatprep.mubr.bf16.mxu1 %v4290_v57  ;;  %v2231_v5 = vsel %vm5820_vm0, %v2226_v12, %v2230_v11  ;;  %v2240_v59 = vrot.slane %v2239_v32, 4  ;;  %v2258_v53 = vrot.slane %v2256_v48, 5  ;;  %v2270_v37 = vshll.u32 %v4433_v19, 16  ;;  %v5434_v12 = vld [vmem:[%s6554_s3 + $0x1b8] sm:$0xff]  }
 0x156   :  { %v2253_v54 = vor.u32 %v2252_v3, %v2249_v39  ;;  %v2263_v38 = vrot.slane %v2261_v1, 4  ;;  %v2266_v58 = vrot.slane %v2264_v45, 5  ;;  %v4258_v33 = vcombine.low %v900_v29, %v900_v29  ;;  %5174 = vmatpush3.bf16.msra.mxu0 %v5412_v27  ;;  %5084 = vmatpush3.bf16.msra.mxu1 %v5424_v28  ;;  %v902_v28 = vld [vmem:[#allocation2 + $0x70] sm:$0x1f] }
 0x157   :  { %v2245_v6 = vsel %vm5820_vm0, %v2240_v59, %v2244_v14  ;;  %v2272_v16 = vrot.slane %v2270_v37, 5  ;;  %v4259_v60 = vcombine.high %v900_v29, %v900_v29  ;;  %v4260_v0 = vcombine.low %v901_v46, %v901_v46  ;;  %5175 = vmatprep.subr.bf16.mxu0 %v5423_v51  ;;  %5133 = vmatprep.subr.bf16.mxu1 %v6134_v4 }
 0x158   :  { %v4465_v30 = vcombine.low %v2231_v5, %v2245_v6  ;;  %v2254_v7 = vrot.slane %v2253_v54, 4  ;;  %v2267_v40 = vor.u32 %v2266_v58, %v2263_v38  ;;  %v4261_v22 = vcombine.high %v901_v46, %v901_v46  ;;  %v2048_v54 = vld [vmem:[#allocation2 + $0x68] sm:$0x1f] }
 0x159   :  { %v1130_v11 = vshrl.u32 %v4258_v33, 16  ;;  %v1133_v42 = vshll.u32 %v4258_v33, 16  ;;  %v1139_v62 = vshll.u32 %v4259_v60, 16  ;;  %v1144_v27 = vshrl.u32 %v4260_v0, 16 }
 0x15a   :  { %5122 = vmatmul.mubr.bf16.gmra.mrb[52].mxu0 %v4465_v30  ;;  %v2259_v44 = vsel %vm5820_vm0, %v2254_v7, %v2258_v53  ;;  %v2268_v2 = vrot.slane %v2267_v40, 4  ;;  %v1147_v15 = vshll.u32 %v4260_v0, 16  ;;  %v1153_v63 = vshll.u32 %v4261_v22, 16 }
 0x15b   :  { %v1132_v18 = vrot.slane %v1130_v11, 4  ;;  %v1135_v14 = vrot.slane %v1133_v42, 5  ;;  %v1141_v52 = vrot.slane %v1139_v62, 5  ;;  %v1146_v41 = vrot.slane %v1144_v27, 4  ;;  %5176 = vmatpush3.bf16.msra.mxu0 %v5423_v51  ;;  %v6154_v51 = vld [vmem:[%s6554_s3 + $0x200] sm:$0xff]  }
 0x15c   :  { %v2273_v19 = vsel %vm5820_vm0, %v2268_v2, %v2272_v16  ;;  %v1149_v50 = vrot.slane %v1147_v15, 5  ;;  %v1155_v56 = vrot.slane %v1153_v63, 5  ;;  %v4262_v57 = vcombine.low %v902_v28, %v902_v28  ;;  %5177 = vmatprep.subr.bf16.mxu0 %v5429_v21  ;;  %v2049_v16 = vld [vmem:[#allocation2 + $0x70] sm:$0x1f] }
 0x15d   :  { %v4466_v32 = vcombine.low %v2259_v44, %v2273_v19  ;;  %v1136_v48 = vor.u32 %v1135_v14, %v1132_v18  ;;  %v4263_v29 = vcombine.high %v902_v28, %v902_v28  ;;  %v4264_v39 = vcombine.low %v903_v20, %v903_v20 }
 0x15e   :  { %v1150_v3 = vor.u32 %v1149_v50, %v1146_v41  ;;  %v4265_v1 = vcombine.high %v903_v20, %v903_v20  ;;  %v1158_v45 = vshrl.u32 %v4262_v57, 16  ;;  %v1161_v46 = vshll.u32 %v4262_v57, 16  ;;  %v2050_v41 = vld [vmem:[#allocation2 + $0x78] sm:$0x1f] }
 0x15f   :  { %5125 = vmatprep.mubr.bf16.mxu0 %v4466_v32  ;;  %v1137_v5 = vrot.slane %v1136_v48, 4  ;;  %v1167_v59 = vshll.u32 %v4263_v29, 16  ;;  %v1172_v53 = vshrl.u32 %v4264_v39, 16  ;;  %v1175_v37 = vshll.u32 %v4264_v39, 16  ;;  %5178 = vmatpush3.bf16.msra.mxu0 %v5429_v21  ;;  %v2051_v32 = vld [vmem:[#allocation2 + $0x80] sm:$0x1f] }
 0x160   :  { %v1151_v38 = vrot.slane %v1150_v3, 4  ;;  %v1160_v58 = vrot.slane %v1158_v45, 4  ;;  %v1163_v33 = vrot.slane %v1161_v46, 5  ;;  %v1181_v6 = vshll.u32 %v4265_v1, 16  ;;  %5179 = vmatprep.subr.bf16.mxu0 %v5434_v12  ;;  %v904_v3 = vld [vmem:[#allocation2 + $0x80] sm:$0x1f] }
 0x161   :  { %v1142_v60 = vsel %vm5820_vm0, %v1137_v5, %v1141_v52  ;;  %v1169_v0 = vrot.slane %v1167_v59, 5  ;;  %v1174_v30 = vrot.slane %v1172_v53, 4  ;;  %v1177_v7 = vrot.slane %v1175_v37, 5 }
 0x162   :  { %v1156_v40 = vsel %vm5820_vm0, %v1151_v38, %v1155_v56  ;;  %v1164_v22 = vor.u32 %v1163_v33, %v1160_v58  ;;  %v1183_v11 = vrot.slane %v1181_v6, 5  ;;  %v4434_v42 = vcombine.low %v2048_v54, %v2048_v54 }
 0x163   :  { %v4291_v62 = vcombine.low %v1142_v60, %v1156_v40  ;;  %v1178_v21 = vor.u32 %v1177_v7, %v1174_v30  ;;  %v4435_v27 = vcombine.high %v2048_v54, %v2048_v54  ;;  %v4436_v28 = vcombine.low %v2049_v16, %v2049_v16  ;;  %5180 = vmatpush3.bf16.msra.mxu0 %v5434_v12 }
 0x164   :  { %v1165_v44 = vrot.slane %v1164_v22, 4  ;;  %v4437_v2 = vcombine.high %v2049_v16, %v2049_v16  ;;  %v2275_v15 = vshrl.u32 %v4434_v42, 16  ;;  %v2278_v63 = vshll.u32 %v4434_v42, 16  ;;  %5229 = vmatprep.subr.bf16.mxu0 %v6154_v51  ;;  %v905_v42 = vld [vmem:[#allocation2 + $0x88] sm:$0x1f] }
 0x165   :  { %5030 = vmatmul.mubr.bf16.gmra.mrb[24].mxu1 %v4291_v62  ;;  %v1179_v20 = vrot.slane %v1178_v21, 4  ;;  %v2284_v18 = vshll.u32 %v4435_v27, 16  ;;  %v2289_v14 = vshrl.u32 %v4436_v28, 16  ;;  %v2292_v52 = vshll.u32 %v4436_v28, 16 }
 0x166   :  { %v1170_v19 = vsel %vm5820_vm0, %v1165_v44, %v1169_v0  ;;  %v2277_v50 = vrot.slane %v2275_v15, 4  ;;  %v2280_v56 = vrot.slane %v2278_v63, 5  ;;  %v2298_v57 = vshll.u32 %v4437_v2, 16  ;;  %v2052_v44 = vld [vmem:[#allocation2 + $0x88] sm:$0x1f] }
 0x167   :  { %v1184_v12 = vsel %vm5820_vm0, %v1179_v20, %v1183_v11  ;;  %v2286_v48 = vrot.slane %v2284_v18, 5  ;;  %v2291_v29 = vrot.slane %v2289_v14, 4  ;;  %v2294_v39 = vrot.slane %v2292_v52, 5 }
 0x168   :  { %v4292_v1 = vcombine.low %v1170_v19, %v1184_v12  ;;  %v2281_v45 = vor.u32 %v2280_v56, %v2277_v50  ;;  %v2300_v46 = vrot.slane %v2298_v57, 5  ;;  %v4438_v5 = vcombine.low %v2050_v41, %v2050_v41 }
 0x169   :  { %v2295_v59 = vor.u32 %v2294_v39, %v2291_v29  ;;  %v4439_v53 = vcombine.high %v2050_v41, %v2050_v41  ;;  %v4440_v37 = vcombine.low %v2051_v32, %v2051_v32  ;;  %v4441_v54 = vcombine.high %v2051_v32, %v2051_v32  ;;  %v2053_v39 = vld [vmem:[#allocation2 + $0x90] sm:$0x1f] }
 0x16a   :  { %5033 = vmatprep.mubr.bf16.mxu1 %v4292_v1  ;;  %v2282_v38 = vrot.slane %v2281_v45, 4  ;;  %v2303_v58 = vshrl.u32 %v4438_v5, 16  ;;  %v2306_v33 = vshll.u32 %v4438_v5, 16  ;;  %v4266_v6 = vcombine.low %v904_v3, %v904_v3 }
 0x16b   :  { %v2296_v16 = vrot.slane %v2295_v59, 4  ;;  %v2312_v60 = vshll.u32 %v4439_v53, 16  ;;  %v2317_v0 = vshrl.u32 %v4440_v37, 16  ;;  %v2320_v30 = vshll.u32 %v4440_v37, 16 }
 0x16c   :  { %v2287_v7 = vsel %vm5820_vm0, %v2282_v38, %v2286_v48  ;;  %v2305_v40 = vrot.slane %v2303_v58, 4  ;;  %v2308_v22 = vrot.slane %v2306_v33, 5  ;;  %v2326_v11 = vshll.u32 %v4441_v54, 16 }
 0x16d   :  { %v2301_v62 = vsel %vm5820_vm0, %v2296_v16, %v2300_v46  ;;  %v2314_v21 = vrot.slane %v2312_v60, 5  ;;  %v2319_v27 = vrot.slane %v2317_v0, 4  ;;  %v2322_v28 = vrot.slane %v2320_v30, 5 }
 0x16e   :  { %v4467_v2 = vcombine.low %v2287_v7, %v2301_v62  ;;  %v2309_v15 = vor.u32 %v2308_v22, %v2305_v40  ;;  %v2328_v63 = vrot.slane %v2326_v11, 5  ;;  %v4267_v20 = vcombine.high %v904_v3, %v904_v3  ;;  %v2568_v11 = vld [vmem:[#allocation2 + $0x8] sm:$0x1e] }
 0x16f   :  { %v2323_v18 = vor.u32 %v2322_v28, %v2319_v27  ;;  %v4268_v14 = vcombine.low %v905_v42, %v905_v42  ;;  %v4269_v52 = vcombine.high %v905_v42, %v905_v42  ;;  %v1186_v41 = vshrl.u32 %v4266_v6, 16  ;;  %v2569_v28 = vld [vmem:[#allocation2 + $0x10] sm:$0x1e] }
 0x170   :  { %5126 = vmatmul.mubr.bf16.gmra.mrb[56].mxu0 %v4467_v2  ;;  %v2310_v19 = vrot.slane %v2309_v15, 4  ;;  %v1189_v50 = vshll.u32 %v4266_v6, 16  ;;  %v1195_v56 = vshll.u32 %v4267_v20, 16  ;;  %v4442_v57 = vcombine.low %v2052_v44, %v2052_v44  ;;  %v3711_v20 = vld [vmem:[#allocation2 + $0x10] sm:$0x1e] }
 0x171   :  { %v2324_v32 = vrot.slane %v2323_v18, 4  ;;  %v1188_v12 = vrot.slane %v1186_v41, 4  ;;  %v1200_v48 = vshrl.u32 %v4268_v14, 16  ;;  %v1203_v29 = vshll.u32 %v4268_v14, 16 }
 0x172   :  { %v2315_v1 = vsel %vm5820_vm0, %v2310_v19, %v2314_v21  ;;  %v1191_v45 = vrot.slane %v1189_v50, 5  ;;  %v1197_v46 = vrot.slane %v1195_v56, 5  ;;  %v1209_v3 = vshll.u32 %v4269_v52, 16 }
 0x173   :  { %v2329_v5 = vsel %vm5820_vm0, %v2324_v32, %v2328_v63  ;;  %v1202_v59 = vrot.slane %v1200_v48, 4  ;;  %v1205_v53 = vrot.slane %v1203_v29, 5  ;;  %v4443_v37 = vcombine.high %v2052_v44, %v2052_v44  ;;  %v3712_v32 = vld [vmem:[#allocation2 + $0x18] sm:$0x1e] }
 0x174   :  { %v4468_v54 = vcombine.low %v2315_v1, %v2329_v5  ;;  %v1192_v38 = vor.u32 %v1191_v45, %v1188_v12  ;;  %v1211_v58 = vrot.slane %v1209_v3, 5  ;;  %v4444_v33 = vcombine.low %v2053_v39, %v2053_v39  ;;  %v5422_v12 = vld [vmem:[#allocation2 + $0x8] ss:$8 sps:$4 sm:$0xff]  }
 0x175   :  { %v1206_v6 = vor.u32 %v1205_v53, %v1202_v59  ;;  %v4445_v16 = vcombine.high %v2053_v39, %v2053_v39  ;;  %v2331_v60 = vshrl.u32 %v4442_v57, 16  ;;  %v2334_v0 = vshll.u32 %v4442_v57, 16  ;;  %v6180_v59 = vld [vmem:[%s6556_s4] ss:$0 sm:$0xff] }
 0x176   :  { %5129 = vmatprep.mubr.bf16.mxu0 %v4468_v54  ;;  %v1193_v30 = vrot.slane %v1192_v38, 4  ;;  %v2340_v7 = vshll.u32 %v4443_v37, 16  ;;  %v2345_v40 = vshrl.u32 %v4444_v33, 16  ;;  %v2348_v22 = vshll.u32 %v4444_v33, 16 }
 0x177   :  { %v1207_v42 = vrot.slane %v1206_v6, 4  ;;  %v2333_v62 = vrot.slane %v2331_v60, 4  ;;  %v2336_v21 = vrot.slane %v2334_v0, 5  ;;  %v2354_v27 = vshll.u32 %v4445_v16, 16  ;;  %v2571_v0 = vld [vmem:[#allocation2 + $0x20] sm:$0x1e] }
 0x178   :  { %v1198_v44 = vsel %vm5820_vm0, %v1193_v30, %v1197_v46  ;;  %v2342_v2 = vrot.slane %v2340_v7, 5  ;;  %v2347_v15 = vrot.slane %v2345_v40, 4  ;;  %v2350_v63 = vrot.slane %v2348_v22, 5  ;;  %v2572_v30 = vld [vmem:[#allocation2 + $0x28] sm:$0x1e] }
 0x179   :  { %v1212_v18 = vsel %vm5820_vm0, %v1207_v42, %v1211_v58  ;;  %v2337_v14 = vor.u32 %v2336_v21, %v2333_v62  ;;  %v2356_v52 = vrot.slane %v2354_v27, 5  ;;  %v4478_v41 = vcombine.low %v2568_v11, %v2568_v11  ;;  %v2570_v58 = vld [vmem:[#allocation2 + $0x18] sm:$0x1e] }
 0x17a   :  { %v4293_v19 = vcombine.low %v1198_v44, %v1212_v18  ;;  %v2351_v50 = vor.u32 %v2350_v63, %v2347_v15  ;;  %v4479_v56 = vcombine.high %v2568_v11, %v2568_v11  ;;  %v4480_v57 = vcombine.low %v2569_v28, %v2569_v28  ;;  %v5430_v62 = vld [vmem:[#allocation2 + $0x10] ss:$8 sps:$4 sm:$0xff]   ;;  %v3713_v18 = vld [vmem:[#allocation2 + $0x20] sm:$0x1e] }
 0x17b   :  { %v2338_v48 = vrot.slane %v2337_v14, 4  ;;  %v4481_v29 = vcombine.high %v2569_v28, %v2569_v28  ;;  %v4510_v39 = vrot.slane %v4478_v41, 9  ;;  %v4654_v1 = vcombine.low %v3711_v20, %v3711_v20  ;;  %v2573_v44 = vld [vmem:[#allocation2 + $0x30] sm:$0x1e]  ;;  %v5432_v14 = vld [vmem:[#allocation2 + $0x18] ss:$8 sps:$4 sm:$0xff]  }
 0x17c   :  { %5034 = vmatmul.mubr.bf16.gmra.mrb[28].mxu1 %v4293_v19  ;;  %v2352_v45 = vrot.slane %v2351_v50, 4  ;;  %v2666_v46 = vrot.slane %v4479_v56, 5  ;;  %v4511_v3 = vrot.slane %v4480_v57, 9  ;;  %v4655_v5 = vcombine.high %v3711_v20, %v3711_v20  ;;  %v5433_v56 = vld [vmem:[#allocation2 + $0x28] ss:$8 sps:$4 sm:$0xff]  }
 0x17d   :  { %5085 = vmatprep.mubr.bf16.mxu1 %v5422_v12  ;;  %v2343_v53 = vsel %vm5820_vm0, %v2338_v48, %v2342_v2  ;;  %v2670_v37 = vrot.slane %v4481_v29, 5  ;;  %v4656_v54 = vcombine.low %v3712_v32, %v3712_v32  ;;  %v4657_v38 = vcombine.high %v3712_v32, %v3712_v32  ;;  %v3714_v29 = vld [vmem:[#allocation2 + $0x28] sm:$0x1e] }
 0x17e   :  { %v2357_v33 = vsel %vm5820_vm0, %v2352_v45, %v2356_v52  ;;  %v2667_v6 = vsel %vm5811_vm15, %v4510_v39, %v2666_v46  ;;  %v4686_v16 = vrot.slane %v4654_v1, 9  ;;  %v3809_v60 = vrot.slane %v4655_v5, 5 }
 0x17f   :  { %v4469_v7 = vcombine.low %v2343_v53, %v2357_v33  ;;  %v2671_v40 = vsel %vm5811_vm15, %v4511_v3, %v2670_v37  ;;  %v4687_v22 = vrot.slane %v4656_v54, 9  ;;  %v3813_v11 = vrot.slane %v4657_v38, 5  ;;  %v3715_v3 = vld [vmem:[#allocation2 + $0x30] sm:$0x1e] }
 0x180   :  { %v6192_v42 = vadd.f32 %v6180_v59, %v5783_v43  ;;  %v6194_v21 = vcombine.low %v2667_v6, %v2671_v40  ;;  %v4482_v27 = vcombine.low %v2570_v58, %v2570_v58  ;;  %v4483_v28 = vcombine.high %v2570_v58, %v2570_v58  ;;  %v5435_v43 = vld [vmem:[%s6554_s3 + $0x148] sm:$0xff]   ;;  %v5439_v38 = vld [vmem:[%s6554_s3 + $0x150] sm:$0xff]  }
 0x181   :  { %5130 = vmatmul.mubr.bf16.gmra.mrb[60].mxu0 %v4469_v7  ;;  %v3810_v2 = vsel %vm5811_vm15, %v4686_v16, %v3809_v60  ;;  %v4484_v15 = vcombine.low %v2571_v0, %v2571_v0  ;;  %v4485_v63 = vcombine.high %v2571_v0, %v2571_v0  ;;  %v4486_v20 = vcombine.low %v2572_v30, %v2572_v30  ;;  %v5442_v58 = vld [vmem:[%s6554_s3 + $0x208] sm:$0xff]   ;;  %v3716_v60 = vld [vmem:[#allocation2 + $0x38] sm:$0x1e] }
 0x182   :  { %5181 = vmatprep.mubr.bf16.mxu0 %v5430_v62  ;;  %v3814_v52 = vsel %vm5811_vm15, %v4687_v22, %v3813_v11  ;;  %v4512_v41 = vrot.slane %v4482_v27, 9  ;;  %v2674_v19 = vrot.slane %v4483_v28, 5  ;;  %v4487_v50 = vcombine.high %v2572_v30, %v2572_v30  ;;  %v5436_v0 = vld [vmem:[#allocation2 + $0x20] ss:$8 sps:$4 sm:$0xff]   ;;  %v2574_v11 = vld [vmem:[#allocation2 + $0x38] sm:$0x1e] }
 0x183   :  { %v4513_v57 = vrot.slane %v4484_v15, 9  ;;  %v2678_v32 = vrot.slane %v4485_v63, 5  ;;  %v4488_v12 = vcombine.low %v2573_v44, %v2573_v44  ;;  %v4489_v48 = vcombine.high %v2573_v44, %v2573_v44  ;;  %v5438_v62 = vld [vmem:[#allocation2 + $0x30] ss:$8 sps:$4 sm:$0xff]   ;;  %v2575_v15 = vld [vmem:[#allocation2 + $0x40] sm:$0x1e] }
 0x184   :  { %5086 = vmatmul.mubr.bf16.vlgmr.msra.gmra.mrb[32].mxu1 %v5432_v14  ;;  %v2675_v39 = vsel %vm5811_vm15, %v4512_v41, %v2674_v19  ;;  %v4514_v1 = vrot.slane %v4486_v20, 9  ;;  %v2682_v45 = vrot.slane %v4487_v50, 5  ;;  %v4658_v46 = vcombine.low %v3713_v18, %v3713_v18  ;;  %v5443_v63 = vld [vmem:[%s6554_s3 + $0x158] sm:$0xff]   ;;  %v5445_v19 = vld [vmem:[%s6554_s3 + $0x210] sm:$0xff]  }
 0x185   :  { %5134 = vmatpush3.bf16.msra.mxu1 %v6134_v4  ;;  %5089 = vmatprep.mubr.bf16.mxu1 %v5433_v56  ;;  %v2679_v5 = vsel %vm5811_vm15, %v4513_v57, %v2678_v32  ;;  %v4515_v53 = vrot.slane %v4488_v12, 9  ;;  %v2686_v37 = vrot.slane %v4489_v48, 5  ;;  %v4659_v54 = vcombine.high %v3713_v18, %v3713_v18  ;;  %v5440_v41 = vld [vmem:[#allocation2 + $0x38] ss:$8 sps:$4 sm:$0xff]  }
 0x186   :  { %5135 = vmatprep.subr.bf16.mxu1 %v5435_v43  ;;  %v6214_v33 = vcombine.low %v3810_v2, %v3814_v52  ;;  %v6216_v6 = vcombine.low %v2675_v39, %v2679_v5  ;;  %v4660_v4 = vcombine.low %v3714_v29, %v3714_v29  ;;  %v4661_v16 = vcombine.high %v3714_v29, %v3714_v29  ;;  %v2576_v32 = vld [vmem:[#allocation2 + $0x58] sm:$0x1e] }
 0x187   :  { %v2687_v30 = vsel %vm5811_vm15, %v4515_v53, %v2686_v37  ;;  %v4688_v7 = vrot.slane %v4658_v46, 9  ;;  %v3817_v40 = vrot.slane %v4659_v54, 5  ;;  %v4662_v22 = vcombine.low %v3715_v3, %v3715_v3  ;;  %v5441_v12 = vld [vmem:[#allocation2 + $0x58] ss:$8 sps:$4 sm:$0xff]  }
 0x188   :  { %v2683_v27 = vsel %vm5811_vm15, %v4514_v1, %v2682_v45  ;;  %v4689_v28 = vrot.slane %v4660_v4, 9  ;;  %v3821_v44 = vrot.slane %v4661_v16, 5  ;;  %v4663_v2 = vcombine.high %v3715_v3, %v3715_v3  ;;  %v2577_v1 = vld [vmem:[#allocation2 + $0x60] sm:$0x1e] }
 0x189   :  { %5136 = vmatpush3.bf16.msra.mxu1 %v5435_v43  ;;  %5182 = vmatmul.mubr.bf16.vlgmr.msra.gmra.mrb[64].mxu0 %v5436_v0  ;;  %v6225_v20 = vcombine.low %v2683_v27, %v2687_v30  ;;  %v4664_v18 = vcombine.low %v3716_v60, %v3716_v60  ;;  %v4665_v14 = vcombine.high %v3716_v60, %v3716_v60  ;;  %v4690_v52 = vrot.slane %v4662_v22, 9  ;;  %v3717_v53 = vld [vmem:[#allocation2 + $0x40] sm:$0x1e]  ;;  %v3718_v60 = vld [vmem:[#allocation2 + $0x48] sm:$0x1e]  ;;  %v5450_v30 = vld [vmem:[%s6554_s3 + $0x218] sm:$0xff]  }
 0x18a   :  { %5185 = vmatprep.mubr.bf16.mxu0 %v5438_v62  ;;  %5230 = vmatpush3.bf16.msra.mxu0 %v6154_v51  ;;  %v3822_v43 = vsel %vm5811_vm15, %v4689_v28, %v3821_v44  ;;  %v3825_v50 = vrot.slane %v4663_v2, 5  ;;  %v4490_v56 = vcombine.low %v2574_v11, %v2574_v11  ;;  %v4491_v57 = vcombine.high %v2574_v11, %v2574_v11  ;;  %v5447_v0 = vld [vmem:[%s6554_s3 + $0x160] sm:$0xff]  }
 0x18b   :  { %5137 = vmatprep.subr.bf16.mxu1 %v5439_v38  ;;  %5231 = vmatprep.subr.bf16.mxu0 %v5442_v58  ;;  %v3818_v48 = vsel %vm5811_vm15, %v4688_v7, %v3817_v40  ;;  %v4691_v29 = vrot.slane %v4664_v18, 9  ;;  %v3829_v51 = vrot.slane %v4665_v14, 5  ;;  %v4492_v39 = vcombine.low %v2575_v15, %v2575_v15  ;;  %v5444_v11 = vld [vmem:[#allocation2 + $0x40] ss:$8 sps:$4 sm:$0xff]  }
 0x18c   :  { %5090 = vmatmul.mubr.bf16.gmra.mrb[36].mxu1 %v5440_v41  ;;  %v6235_v45 = vcombine.low %v3818_v48, %v3822_v43  ;;  %v4493_v46 = vcombine.high %v2575_v15, %v2575_v15  ;;  %v4516_v3 = vrot.slane %v4490_v56, 9  ;;  %v2690_v5 = vrot.slane %v4491_v57, 5  ;;  %v3719_v44 = vld [vmem:[#allocation2 + $0x60] sm:$0x1e]  ;;  %v3720_v41 = vld [vmem:[#allocation2 + $0x68] sm:$0x1e] }
 0x18d   :  { %5138 = vmatpush3.bf16.msra.mxu1 %v5439_v38  ;;  %5093 = vmatprep.mubr.bf16.mxu1 %v5441_v12  ;;  %v3826_v37 = vsel %vm5811_vm15, %v4690_v52, %v3825_v50  ;;  %v4517_v54 = vrot.slane %v4492_v39, 9  ;;  %v4494_v4 = vcombine.low %v2576_v32, %v2576_v32  ;;  %v4495_v16 = vcombine.high %v2576_v32, %v2576_v32  ;;  %v5446_v2 = vld [vmem:[#allocation2 + $0x60] ss:$8 sps:$4 sm:$0xff]  }
 0x18e   :  { %5232 = vmatpush3.bf16.msra.mxu0 %v5442_v58  ;;  %5139 = vmatprep.subr.bf16.mxu1 %v5443_v63  ;;  %v3830_v38 = vsel %vm5811_vm15, %v4691_v29, %v3829_v51  ;;  %v2691_v7 = vsel %vm5811_vm15, %v4516_v3, %v2690_v5  ;;  %v2694_v40 = vrot.slane %v4493_v46, 5  ;;  %v4496_v22 = vcombine.low %v2577_v1, %v2577_v1  ;;  %v5448_v43 = vld [vmem:[#allocation2 + $0x68] ss:$8 sps:$4 sm:$0xff]   ;;  %v5453_v46 = vld [vmem:[%s6554_s3 + $0x220] sm:$0xff]  }
 0x18f   :  { %5233 = vmatprep.subr.bf16.mxu0 %v5445_v19  ;;  %v4497_v58 = vcombine.high %v2577_v1, %v2577_v1  ;;  %v4518_v62 = vrot.slane %v4494_v4, 9  ;;  %v2698_v27 = vrot.slane %v4495_v16, 5  ;;  %v4666_v28 = vcombine.low %v3717_v53, %v3717_v53  ;;  %v5451_v12 = vld [vmem:[%s6554_s3 + $0x168] sm:$0xff]  }
 0x190   :  { %v2695_v15 = vsel %vm5811_vm15, %v4517_v54, %v2694_v40  ;;  %v4519_v18 = vrot.slane %v4496_v22, 9  ;;  %v4667_v14 = vcombine.high %v3717_v53, %v3717_v53  ;;  %v4668_v52 = vcombine.low %v3718_v60, %v3718_v60  ;;  %v2578_v1 = vld [vmem:[#allocation2 + $0x68] sm:$0x1e] }
 0x191   :  { %5140 = vmatpush3.bf16.msra.mxu1 %v5443_v63  ;;  %5186 = vmatmul.mubr.bf16.gmra.mrb[68].mxu0 %v5444_v11  ;;  %v6251_v50 = vcombine.low %v3826_v37, %v3830_v38  ;;  %v6253_v56 = vcombine.low %v2691_v7, %v2695_v15  ;;  %v2702_v57 = vrot.slane %v4497_v58, 5  ;;  %v4669_v32 = vcombine.high %v3718_v60, %v3718_v60  ;;  %v5449_v63 = vld [vmem:[#allocation2 + $0x78] ss:$8 sps:$4 sm:$0xff]   ;;  %v2579_v37 = vld [vmem:[#allocation2 + $0x70] sm:$0x1e]  ;;  %v5461_v15 = vld [vmem:[%s6554_s3 + $0x228] sm:$0xff]  }
 0x192   :  { %5189 = vmatprep.mubr.bf16.mxu0 %v5446_v2  ;;  %5234 = vmatpush3.bf16.msra.mxu0 %v5445_v19  ;;  %v4692_v48 = vrot.slane %v4666_v28, 9  ;;  %v3833_v29 = vrot.slane %v4667_v14, 5  ;;  %v4693_v51 = vrot.slane %v4668_v52, 9  ;;  %v4670_v39 = vcombine.low %v3719_v44, %v3719_v44  ;;  %v2580_v38 = vld [vmem:[#allocation2 + $0x78] sm:$0x1e]  ;;  %v5455_v58 = vld [vmem:[%s6554_s3 + $0x170] sm:$0xff]  }
 0x193   :  { %5141 = vmatprep.subr.bf16.mxu1 %v5447_v0  ;;  %5235 = vmatprep.subr.bf16.mxu0 %v5450_v30  ;;  %v2703_v3 = vsel %vm5811_vm15, %v4519_v18, %v2702_v57  ;;  %v3837_v19 = vrot.slane %v4669_v32, 5  ;;  %v4671_v5 = vcombine.high %v3719_v44, %v3719_v44  ;;  %v4672_v53 = vcombine.low %v3720_v41, %v3720_v41  ;;  %v2581_v2 = vld [vmem:[#allocation2 + $0x80] sm:$0x1e] }
 0x194   :  { %5094 = vmatmul.mubr.bf16.gmra.mrb[40].mxu1 %v5448_v43  ;;  %v2699_v54 = vsel %vm5811_vm15, %v4518_v62, %v2698_v27  ;;  %v3834_v4 = vsel %vm5811_vm15, %v4692_v48, %v3833_v29  ;;  %v4673_v16 = vcombine.high %v3720_v41, %v3720_v41  ;;  %v4694_v60 = vrot.slane %v4670_v39, 9  ;;  %v3721_v41 = vld [vmem:[#allocation2 + $0x70] sm:$0x1e]  ;;  %v5454_v43 = vld [vmem:[#allocation2 + $0x80] ss:$8 sps:$4 sm:$0xff]  }
 0x195   :  { %5142 = vmatpush3.bf16.msra.mxu1 %v5447_v0  ;;  %5097 = vmatprep.mubr.bf16.mxu1 %v5449_v63  ;;  %v3838_v7 = vsel %vm5811_vm15, %v4693_v51, %v3837_v19  ;;  %v3841_v40 = vrot.slane %v4671_v5, 5  ;;  %v4695_v22 = vrot.slane %v4672_v53, 9  ;;  %v4498_v11 = vcombine.low %v2578_v1, %v2578_v1  ;;  %v5452_v0 = vld [vmem:[#allocation2 + $0x70] ss:$8 sps:$4 sm:$0xff]  }
 0x196   :  { %5236 = vmatpush3.bf16.msra.mxu0 %v5450_v30  ;;  %5143 = vmatprep.subr.bf16.mxu1 %v5451_v12  ;;  %v6272_v62 = vcombine.low %v2699_v54, %v2703_v3  ;;  %v3845_v27 = vrot.slane %v4673_v16, 5  ;;  %v4499_v28 = vcombine.high %v2578_v1, %v2578_v1  ;;  %v4500_v44 = vcombine.low %v2579_v37, %v2579_v37  ;;  %v5462_v51 = vld [vmem:[%s6554_s3 + $0x178] sm:$0xff]   ;;  %v5456_v5 = vld [vmem:[#allocation2 + $0x88] ss:$8 sps:$4 sm:$0xff]  }
 0x197   :  { %5237 = vmatprep.subr.bf16.mxu0 %v5453_v46  ;;  %v6277_v18 = vcombine.low %v3834_v4, %v3838_v7  ;;  %v4501_v30 = vcombine.high %v2579_v37, %v2579_v37  ;;  %v4520_v14 = vrot.slane %v4498_v11, 9  ;;  %v4502_v52 = vcombine.low %v2580_v38, %v2580_v38  ;;  %v3722_v19 = vld [vmem:[#allocation2 + $0x78] sm:$0x1e]  ;;  %v3723_v4 = vld [vmem:[#allocation2 + $0x80] sm:$0x1e]  ;;  %v5464_v16 = vld [vmem:[%s6554_s3 + $0x230] sm:$0xff]  }
 0x198   :  { %v3842_v57 = vsel %vm5811_vm15, %v4694_v60, %v3841_v40  ;;  %v2706_v32 = vrot.slane %v4499_v28, 5  ;;  %v4521_v48 = vrot.slane %v4500_v44, 9  ;;  %v4503_v29 = vcombine.high %v2580_v38, %v2580_v38  ;;  %v3724_v28 = vld [vmem:[#allocation2 + $0x88] sm:$0x1e] }
 0x199   :  { %5144 = vmatpush3.bf16.msra.mxu1 %v5451_v12  ;;  %5190 = vmatmul.mubr.bf16.gmra.mrb[72].mxu0 %v5452_v0  ;;  %v3846_v39 = vsel %vm5811_vm15, %v4695_v22, %v3845_v27  ;;  %v2710_v1 = vrot.slane %v4501_v30, 5  ;;  %v4504_v63 = vcombine.low %v2581_v2, %v2581_v2  ;;  %v4505_v3 = vcombine.high %v2581_v2, %v2581_v2 }
 0x19a   :  { %5193 = vmatprep.mubr.bf16.mxu0 %v5454_v43  ;;  %5238 = vmatpush3.bf16.msra.mxu0 %v5453_v46  ;;  %v2707_v53 = vsel %vm5811_vm15, %v4520_v14, %v2706_v32  ;;  %v4522_v37 = vrot.slane %v4502_v52, 9  ;;  %v2714_v12 = vrot.slane %v4503_v29, 5  ;;  %v4674_v54 = vcombine.low %v3721_v41, %v3721_v41  ;;  %v2582_v14 = vld [vmem:[#allocation2 + $0x88] sm:$0x1e]  ;;  %v2583_v32 = vld [vmem:[#allocation2 + $0x90] sm:$0x1e] }
 0x19b   :  { %5145 = vmatprep.subr.bf16.mxu1 %v5455_v58  ;;  %5239 = vmatprep.subr.bf16.mxu0 %v5461_v15  ;;  %v2711_v60 = vsel %vm5811_vm15, %v4521_v48, %v2710_v1  ;;  %v4523_v38 = vrot.slane %v4504_v63, 9  ;;  %v2718_v7 = vrot.slane %v4505_v3, 5  ;;  %v4675_v46 = vcombine.high %v3721_v41, %v3721_v41  ;;  %v5463_v48 = vld [vmem:[#allocation2 + $0x90] ss:$8 sps:$4 sm:$0xff]  }
 0x19c   :  { %5098 = vmatmul.mubr.bf16.gmra.mrb[44].mxu1 %v5456_v5  ;;  %v6293_v40 = vcombine.low %v3842_v57, %v3846_v39  ;;  %v6295_v22 = vcombine.low %v2707_v53, %v2711_v60  ;;  %v4676_v11 = vcombine.low %v3722_v19, %v3722_v19  ;;  %v4677_v27 = vcombine.high %v3722_v19, %v3722_v19  ;;  %v3181_v53 = vld [vmem:[#allocation2 + $0x10] sm:$0x1f]  ;;  %v3182_v60 = vld [vmem:[#allocation2 + $0x18] sm:$0x1f] }
 0x19d   :  { %5146 = vmatpush3.bf16.msra.mxu1 %v5455_v58  ;;  %5149 = vmatprep.mubr.bf16.mxu1 %v6194_v21  ;;  %v2719_v44 = vsel %vm5811_vm15, %v4523_v38, %v2718_v7  ;;  %v4696_v2 = vrot.slane %v4674_v54, 9  ;;  %v3849_v0 = vrot.slane %v4675_v46, 5  ;;  %v4678_v30 = vcombine.low %v3723_v4, %v3723_v4  ;;  %v5469_v21 = vld [vmem:[%s6554_s3 + $0x1c0] sm:$0xff]   ;;  %v5478_v58 = vld [vmem:[%s6554_s3 + $0x238] sm:$0xff]   ;;  %v5479_v38 = vld [vmem:[%s6554_s3 + $0x1c8] sm:$0xff]  }
 0x19e   :  { %5240 = vmatpush3.bf16.msra.mxu0 %v5461_v15  ;;  %5147 = vmatprep.subr.bf16.mxu1 %v5462_v51  ;;  %v2715_v52 = vsel %vm5811_vm15, %v4522_v37, %v2714_v12  ;;  %v4697_v41 = vrot.slane %v4676_v11, 9  ;;  %v3853_v43 = vrot.slane %v4677_v27, 5  ;;  %v4679_v57 = vcombine.high %v3723_v4, %v3723_v4 }
 0x19f   :  { %5241 = vmatprep.subr.bf16.mxu0 %v5464_v16  ;;  %v6308_v29 = vcombine.low %v2715_v52, %v2719_v44  ;;  %v4680_v15 = vcombine.low %v3724_v28, %v3724_v28  ;;  %v4681_v39 = vcombine.high %v3724_v28, %v3724_v28  ;;  %v4698_v1 = vrot.slane %v4678_v30, 9 }
 0x1a0   :  { %v3854_v63 = vsel %vm5811_vm15, %v4697_v41, %v3853_v43  ;;  %v3857_v3 = vrot.slane %v4679_v57, 5  ;;  %v4506_v19 = vcombine.low %v2582_v14, %v2582_v14  ;;  %v4507_v5 = vcombine.high %v2582_v14, %v2582_v14  ;;  %v5488_v57 = vld [vmem:[%s6554_s3 + $0x1d0] sm:$0xff]  }
 0x1a1   :  { %5148 = vmatpush3.bf16.msra.mxu1 %v5462_v51  ;;  %5194 = vmatmul.mubr.bf16.gmra.mrb[76].mxu0 %v5463_v48  ;;  %v3850_v37 = vsel %vm5811_vm15, %v4696_v2, %v3849_v0  ;;  %v4699_v12 = vrot.slane %v4680_v15, 9  ;;  %v3861_v54 = vrot.slane %v4681_v39, 5  ;;  %v4508_v4 = vcombine.low %v2583_v32, %v2583_v32  ;;  %v3726_v15 = vld [vmem:[#allocation2 + $0x98] sm:$0x1e] }
 0x1a2   :  { %5242 = vmatpush3.bf16.msra.mxu0 %v5464_v16  ;;  %5245 = vmatprep.mubr.bf16.mxu0 %v6214_v33  ;;  %v6318_v7 = vcombine.low %v3850_v37, %v3854_v63  ;;  %v3858_v51 = vsel %vm5811_vm15, %v4698_v1, %v3857_v3  ;;  %v4509_v46 = vcombine.high %v2583_v32, %v2583_v32  ;;  %v3725_v33 = vld [vmem:[#allocation2 + $0x90] sm:$0x1e]  ;;  %v4524_v44 = vrot.slane %v4506_v19, 9  ;;  %v3183_v3 = vld [vmem:[#allocation2 + $0x20] sm:$0x1f] }
 0x1a3   :  { %5197 = vmatprep.subr.bf16.mxu1 %v5469_v21  ;;  %5243 = vmatprep.subr.bf16.mxu0 %v5478_v58  ;;  %v3862_v11 = vsel %vm5811_vm15, %v4699_v12, %v3861_v54  ;;  %v6324_v27 = vrot.slane %v4508_v4, 9  ;;  %v4590_v16 = vcombine.low %v3181_v53, %v3181_v53  ;;  %v4591_v28 = vcombine.high %v3181_v53, %v3181_v53 }
 0x1a4   :  { %5150 = vmatmul.mubr.bf16.vlgmr.msra.gmra.mrb[48].mxu1 %v6216_v6  ;;  %v2722_v2 = vrot.slane %v4507_v5, 5  ;;  %v2726_v0 = vrot.slane %v4509_v46, 5  ;;  %v4592_v30 = vcombine.low %v3182_v60, %v3182_v60  ;;  %v4593_v14 = vcombine.high %v3182_v60, %v3182_v60  ;;  %v3184_v60 = vld [vmem:[#allocation2 + $0x28] sm:$0x1f] }
 0x1a5   :  { %5198 = vmatpush3.bf16.msra.mxu1 %v5469_v21  ;;  %5153 = vmatprep.mubr.bf16.mxu1 %v6225_v20  ;;  %v3278_v52 = vshrl.u32 %v4590_v16, 16  ;;  %v3281_v41 = vshll.u32 %v4590_v16, 16  ;;  %v3287_v43 = vshll.u32 %v4591_v28, 16  ;;  %v6331_v32 = vcombine.low %v3858_v51, %v3862_v11  ;;  %v5497_v51 = vld [vmem:[%s6554_s3 + $0x1d8] sm:$0xff]  }
 0x1a6   :  { %5244 = vmatpush3.bf16.msra.mxu0 %v5478_v58  ;;  %5199 = vmatprep.subr.bf16.mxu1 %v5479_v38  ;;  %v3292_v6 = vshrl.u32 %v4592_v30, 16  ;;  %v3295_v48 = vshll.u32 %v4592_v30, 16  ;;  %v4682_v39 = vcombine.low %v3725_v33, %v3725_v33  ;;  %v2727_v20 = vsel %vm5811_vm15, %v6324_v27, %v2726_v0 }
 0x1a7   :  { %v3280_v21 = vrot.slane %v3278_v52, 4  ;;  %v3283_v1 = vrot.slane %v3281_v41, 5  ;;  %v3289_v63 = vrot.slane %v3287_v43, 5  ;;  %v3301_v5 = vshll.u32 %v4593_v14, 16 }
 0x1a8   :  { %v3294_v58 = vrot.slane %v3292_v6, 4  ;;  %v3297_v19 = vrot.slane %v3295_v48, 5  ;;  %v4683_v53 = vcombine.high %v3725_v33, %v3725_v33  ;;  %v4684_v12 = vcombine.low %v3726_v15, %v3726_v15  ;;  %v3185_v48 = vld [vmem:[#allocation2 + $0x30] sm:$0x1f] }
 0x1a9   :  { %5200 = vmatpush3.bf16.msra.mxu1 %v5479_v38  ;;  %5246 = vmatmul.mubr.bf16.vlgmr.msra.gmra.mrb[80].mxu0 %v6235_v45  ;;  %v3284_v37 = vor.u32 %v3283_v1, %v3280_v21  ;;  %v4685_v54 = vcombine.high %v3726_v15, %v3726_v15  ;;  %v4700_v4 = vrot.slane %v4682_v39, 9  ;;  %v3303_v11 = vrot.slane %v3301_v5, 5 }
 0x1aa   :  { %5249 = vmatprep.mubr.bf16.mxu0 %v6251_v50  ;;  %5201 = vmatprep.subr.bf16.mxu1 %v5488_v57  ;;  %v3298_v46 = vor.u32 %v3297_v19, %v3294_v58  ;;  %v3865_v27 = vrot.slane %v4683_v53, 5  ;;  %v4594_v16 = vcombine.low %v3183_v3, %v3183_v3  ;;  %v4701_v38 = vrot.slane %v4684_v12, 9  ;;  %v5515_v12 = vld [vmem:[%s6554_s3 + $0x1e8] sm:$0xff]  }
 0x1ab   :  { %v3285_v28 = vrot.slane %v3284_v37, 4  ;;  %v3869_v33 = vrot.slane %v4685_v54, 5  ;;  %v4595_v45 = vcombine.high %v3183_v3, %v3183_v3  ;;  %v4596_v50 = vcombine.low %v3184_v60, %v3184_v60 }
 0x1ac   :  { %5154 = vmatmul.mubr.bf16.gmra.mrb[52].mxu1 %v6253_v56  ;;  %v3299_v0 = vrot.slane %v3298_v46, 4  ;;  %v3866_v30 = vsel %vm5811_vm15, %v4700_v4, %v3865_v27  ;;  %v4597_v14 = vcombine.high %v3184_v60, %v3184_v60  ;;  %v2723_v52 = vsel %vm5811_vm15, %v4524_v44, %v2722_v2  ;;  %v5506_v56 = vld [vmem:[%s6554_s3 + $0x1e0] sm:$0xff]   ;;  %v3186_v44 = vld [vmem:[#allocation2 + $0x38] sm:$0x1f] }
 0x1ad   :  { %5202 = vmatpush3.bf16.msra.mxu1 %v5488_v57  ;;  %5157 = vmatprep.mubr.bf16.mxu1 %v6272_v62  ;;  %v3870_v41 = vsel %vm5811_vm15, %v4701_v38, %v3869_v33  ;;  %v3306_v43 = vshrl.u32 %v4594_v16, 16  ;;  %v3309_v6 = vshll.u32 %v4594_v16, 16  ;;  %v6352_v15 = vcombine.low %v2723_v52, %v2727_v20  ;;  %v3187_v16 = vld [vmem:[#allocation2 + $0x40] sm:$0x1f]  ;;  %v5524_v52 = vld [vmem:[%s6554_s3 + $0x1f0] sm:$0xff]  }
 0x1ae   :  { %5203 = vmatprep.subr.bf16.mxu1 %v5497_v51  ;;  %v6356_v57 = vsel %vm5820_vm0, %v3285_v28, %v3289_v63  ;;  %v6360_v62 = vsel %vm5820_vm0, %v3299_v0, %v3303_v11  ;;  %v3320_v35 = vshrl.u32 %v4596_v50, 16  ;;  %v6362_v2 = vcombine.low %v3866_v30, %v3870_v41 }
 0x1af   :  { %v3308_v39 = vrot.slane %v3306_v43, 4  ;;  %v3311_v21 = vrot.slane %v3309_v6, 5  ;;  %v3323_v1 = vshll.u32 %v4596_v50, 16  ;;  %v3315_v3 = vshll.u32 %v4595_v45, 16  ;;  %v3188_v45 = vld [vmem:[#allocation2 + $0x48] sm:$0x1f] }
 0x1b0   :  { %v3322_v58 = vrot.slane %v3320_v35, 4  ;;  %v3329_v19 = vshll.u32 %v4597_v14, 16  ;;  %v4598_v20 = vcombine.low %v3185_v48, %v3185_v48  ;;  %v4599_v53 = vcombine.high %v3185_v48, %v3185_v48 }
 0x1b1   :  { %5204 = vmatpush3.bf16.msra.mxu1 %v5497_v51  ;;  %5250 = vmatmul.mubr.bf16.gmra.mrb[84].mxu0 %v6277_v18  ;;  %v3312_v63 = vor.u32 %v3311_v21, %v3308_v39  ;;  %v3325_v5 = vrot.slane %v3323_v1, 5  ;;  %v4600_v37 = vcombine.low %v3186_v44, %v3186_v44  ;;  %v4638_v54 = vcombine.low %v6356_v57, %v6360_v62 }
 0x1b2   :  { %5253 = vmatprep.mubr.bf16.mxu0 %v6293_v40  ;;  %5205 = vmatprep.subr.bf16.mxu1 %v5506_v56  ;;  %v4601_v4 = vcombine.high %v3186_v44, %v3186_v44  ;;  %v3334_v60 = vshrl.u32 %v4598_v20, 16  ;;  %v3337_v46 = vshll.u32 %v4598_v20, 16  ;;  %v3343_v18 = vshll.u32 %v4599_v53, 16  ;;  %v5533_v20 = vld [vmem:[%s6554_s3 + $0x1f8] sm:$0xff]  }
 0x1b3   :  { %v3313_v51 = vrot.slane %v3312_v63, 4  ;;  %v3326_v11 = vor.u32 %v3325_v5, %v3322_v58  ;;  %v3348_v27 = vshrl.u32 %v4600_v37, 16  ;;  %v3317_v28 = vrot.slane %v3315_v3, 5 }
 0x1b4   :  { %5158 = vmatmul.mubr.bf16.gmra.mrb[56].mxu1 %v6295_v22  ;;  %v3336_v40 = vrot.slane %v3334_v60, 4  ;;  %v3339_v38 = vrot.slane %v3337_v46, 5  ;;  %v3351_v33 = vshll.u32 %v4600_v37, 16  ;;  %v3331_v30 = vrot.slane %v3329_v19, 5  ;;  %v3189_v19 = vld [vmem:[#allocation2 + $0x60] sm:$0x1f] }
 0x1b5   :  { %5206 = vmatpush3.bf16.msra.mxu1 %v5506_v56  ;;  %5161 = vmatprep.mubr.bf16.mxu1 %v6308_v29  ;;  %v3327_v0 = vrot.slane %v3326_v11, 4  ;;  %v3350_v50 = vrot.slane %v3348_v27, 4  ;;  %v3357_v14 = vshll.u32 %v4601_v4, 16  ;;  %v6378_v22 = vsel %vm5820_vm0, %v3313_v51, %v3317_v28  ;;  %v3190_v46 = vld [vmem:[#allocation2 + $0x68] sm:$0x1f] }
 0x1b6   :  { %5207 = vmatprep.subr.bf16.mxu1 %v5515_v12  ;;  %v3340_v41 = vor.u32 %v3339_v38, %v3336_v40  ;;  %v3353_v43 = vrot.slane %v3351_v33, 5  ;;  %v4602_v6 = vcombine.low %v3187_v16, %v3187_v16  ;;  %v3345_v48 = vrot.slane %v3343_v18, 5  ;;  %v3191_v27 = vld [vmem:[#allocation2 + $0x70] sm:$0x1f] }
 0x1b7   :  { %v4603_v56 = vcombine.high %v3187_v16, %v3187_v16  ;;  %v4604_v57 = vcombine.low %v3188_v45, %v3188_v45  ;;  %v4605_v29 = vcombine.high %v3188_v45, %v3188_v45  ;;  %v3332_v62 = vsel %vm5820_vm0, %v3327_v0, %v3331_v30 }
 0x1b8   :  { %v3341_v35 = vrot.slane %v3340_v41, 4  ;;  %v3354_v44 = vor.u32 %v3353_v43, %v3350_v50  ;;  %v3362_v39 = vshrl.u32 %v4602_v6, 16  ;;  %v3365_v21 = vshll.u32 %v4602_v6, 16 }
 0x1b9   :  { %5208 = vmatpush3.bf16.msra.mxu1 %v5515_v12  ;;  %5254 = vmatmul.mubr.bf16.gmra.mrb[88].mxu0 %v6318_v7  ;;  %v3371_v1 = vshll.u32 %v4603_v56, 16  ;;  %v3376_v3 = vshrl.u32 %v4604_v57, 16  ;;  %v3379_v58 = vshll.u32 %v4604_v57, 16  ;;  %v3359_v5 = vrot.slane %v3357_v14, 5 }
 0x1ba   :  { %5257 = vmatprep.mubr.bf16.mxu0 %v6331_v32  ;;  %5209 = vmatprep.subr.bf16.mxu1 %v5524_v52  ;;  %v3355_v63 = vrot.slane %v3354_v44, 4  ;;  %v3364_v53 = vrot.slane %v3362_v39, 4  ;;  %v3385_v37 = vshll.u32 %v4605_v29, 16  ;;  %v4639_v12 = vcombine.low %v6378_v22, %v3332_v62 }
 0x1bb   :  { %v3367_v4 = vrot.slane %v3365_v21, 5  ;;  %v3378_v7 = vrot.slane %v3376_v3, 4  ;;  %v3381_v60 = vrot.slane %v3379_v58, 5  ;;  %v3346_v32 = vsel %vm5820_vm0, %v3341_v35, %v3345_v48 }
 0x1bc   :  { %5162 = vmatmul.mubr.bf16.gmra.mrb[60].mxu1 %v6352_v15  ;;  %v3373_v51 = vrot.slane %v3371_v1, 5  ;;  %v4606_v11 = vcombine.low %v3189_v19, %v3189_v19  ;;  %v4607_v18 = vcombine.high %v3189_v19, %v3189_v19  ;;  %v3360_v16 = vsel %vm5820_vm0, %v3355_v63, %v3359_v5 }
 0x1bd   :  { %5210 = vmatpush3.bf16.msra.mxu1 %v5524_v52  ;;  %5213 = vmatprep.mubr.bf16.mxu1 %v4638_v54  ;;  %v3368_v28 = vor.u32 %v3367_v4, %v3364_v53  ;;  %v3382_v40 = vor.u32 %v3381_v60, %v3378_v7  ;;  %v3387_v38 = vrot.slane %v3385_v37, 5  ;;  %v4608_v33 = vcombine.low %v3190_v46, %v3190_v46  ;;  %v3192_v54 = vld [vmem:[#allocation2 + $0x78] sm:$0x1f]  ;;  %v3193_v4 = vld [vmem:[#allocation2 + $0x80] sm:$0x1f] }
 0x1be   :  { %5211 = vmatprep.subr.bf16.mxu1 %v5533_v20  ;;  %v4609_v45 = vcombine.high %v3190_v46, %v3190_v46  ;;  %v3390_v0 = vshrl.u32 %v4606_v11, 16  ;;  %v3393_v15 = vshll.u32 %v4606_v11, 16  ;;  %v3399_v14 = vshll.u32 %v4607_v18, 16 }
 0x1bf   :  { %v3369_v30 = vrot.slane %v3368_v28, 4  ;;  %v3383_v50 = vrot.slane %v3382_v40, 4  ;;  %v4610_v22 = vcombine.low %v3191_v27, %v3191_v27  ;;  %v3404_v6 = vshrl.u32 %v4608_v33, 16 }
 0x1c0   :  { %v3392_v41 = vrot.slane %v3390_v0, 4  ;;  %v3395_v43 = vrot.slane %v3393_v15, 5  ;;  %v3407_v52 = vshll.u32 %v4608_v33, 16  ;;  %v4640_v48 = vcombine.low %v3346_v32, %v3360_v16 }
 0x1c1   :  { %5212 = vmatpush3.bf16.msra.mxu1 %v5533_v20  ;;  %5258 = vmatmul.mubr.bf16.gmra.mrb[92].mxu0 %v6362_v2  ;;  %v3374_v56 = vsel %vm5820_vm0, %v3369_v30, %v3373_v51  ;;  %v3388_v57 = vsel %vm5820_vm0, %v3383_v50, %v3387_v38  ;;  %v3406_v62 = vrot.slane %v3404_v6, 4  ;;  %v3413_v44 = vshll.u32 %v4609_v45, 16  ;;  %v3194_v51 = vld [vmem:[#allocation2 + $0x88] sm:$0x1f] }
 0x1c2   :  { %v3396_v29 = vor.u32 %v3395_v43, %v3392_v41  ;;  %v3409_v35 = vrot.slane %v3407_v52, 5  ;;  %v3401_v39 = vrot.slane %v3399_v14, 5  ;;  %v4611_v21 = vcombine.high %v3191_v27, %v3191_v27 }
 0x1c3   :  { %v4612_v1 = vcombine.low %v3192_v54, %v3192_v54  ;;  %v4613_v3 = vcombine.high %v3192_v54, %v3192_v54  ;;  %v3418_v20 = vshrl.u32 %v4610_v22, 16  ;;  %v3421_v2 = vshll.u32 %v4610_v22, 16  ;;  %v3195_v54 = vld [vmem:[#allocation2 + $0x90] sm:$0x1f] }
 0x1c4   :  { %5214 = vmatmul.mubr.bf16.vlgmr.msra.gmra.mrb[64].mxu1 %v4639_v12  ;;  %v3397_v58 = vrot.slane %v3396_v29, 4  ;;  %v3410_v19 = vor.u32 %v3409_v35, %v3406_v62  ;;  %v4641_v63 = vcombine.low %v3374_v56, %v3388_v57  ;;  %v3427_v5 = vshll.u32 %v4611_v21, 16  ;;  %v3196_v62 = vld [vmem:[#allocation2 + $0x98] sm:$0x1f] }
 0x1c5   :  { %5217 = vmatprep.mubr.bf16.mxu1 %v4640_v48  ;;  %v3432_v53 = vshrl.u32 %v4612_v1, 16  ;;  %v3435_v37 = vshll.u32 %v4612_v1, 16  ;;  %v3415_v60 = vrot.slane %v3413_v44, 5  ;;  %v3420_v46 = vrot.slane %v3418_v20, 4 }
 0x1c6   :  { %v3411_v7 = vrot.slane %v3410_v19, 4  ;;  %v3423_v32 = vrot.slane %v3421_v2, 5  ;;  %v3402_v11 = vsel %vm5820_vm0, %v3397_v58, %v3401_v39  ;;  %v3441_v27 = vshll.u32 %v4613_v3, 16 }
 0x1c7   :  { %v3434_v18 = vrot.slane %v3432_v53, 4  ;;  %v3437_v12 = vrot.slane %v3435_v37, 5  ;;  %v4614_v40 = vcombine.low %v3193_v4, %v3193_v4  ;;  %v4615_v38 = vcombine.high %v3193_v4, %v3193_v4 }
 0x1c8   :  { %v3416_v16 = vsel %vm5820_vm0, %v3411_v7, %v3415_v60  ;;  %v3424_v28 = vor.u32 %v3423_v32, %v3420_v46  ;;  %v3429_v33 = vrot.slane %v3427_v5, 5  ;;  %v4616_v0 = vcombine.low %v3194_v51, %v3194_v51 }
 0x1c9   :  { %v3438_v45 = vor.u32 %v3437_v12, %v3434_v18  ;;  %v4617_v15 = vcombine.high %v3194_v51, %v3194_v51  ;;  %v3446_v50 = vshrl.u32 %v4614_v40, 16  ;;  %v3449_v14 = vshll.u32 %v4614_v40, 16 }
 0x1ca   :  { %v3425_v30 = vrot.slane %v3424_v28, 4  ;;  %v3455_v22 = vshll.u32 %v4615_v38, 16  ;;  %v4642_v41 = vcombine.low %v3402_v11, %v3416_v16  ;;  %v3460_v6 = vshrl.u32 %v4616_v0, 16  ;;  %v6415_v38 = vld [vmem:[%s6556_s4] ss:$0 sm:$0xff] }
 0x1cb   :  { %v3439_v43 = vrot.slane %v3438_v45, 4  ;;  %v3463_v52 = vshll.u32 %v4616_v0, 16  ;;  %v300_v48 = vadd.f32 %v6180_v59, %v5789_v61  ;;  %v3448_v56 = vrot.slane %v3446_v50, 4 }
 0x1cc   :  { %5218 = vmatmul.mubr.bf16.gmra.mrb[68].mxu1 %v4641_v63  ;;  %v3451_v57 = vrot.slane %v3449_v14, 5  ;;  %v3469_v29 = vshll.u32 %v4617_v15, 16  ;;  %v3430_v35 = vsel %vm5820_vm0, %v3425_v30, %v3429_v33  ;;  %v3443_v44 = vrot.slane %v3441_v27, 5 }
 0x1cd   :  { %5221 = vmatprep.mubr.bf16.mxu1 %v4642_v41  ;;  %v3462_v39 = vrot.slane %v3460_v6, 4  ;;  %v3465_v21 = vrot.slane %v3463_v52, 5  ;;  %v3457_v3 = vrot.slane %v3455_v22, 5  ;;  %v4618_v58 = vcombine.low %v3195_v54, %v3195_v54 }
 0x1ce   :  { %v3452_v1 = vor.u32 %v3451_v57, %v3448_v56  ;;  %v4619_v19 = vcombine.high %v3195_v54, %v3195_v54  ;;  %v3444_v20 = vsel %vm5820_vm0, %v3439_v43, %v3443_v44  ;;  %v4620_v59 = vcombine.low %v3196_v62, %v3196_v62 }
 0x1cf   :  { %v3466_v61 = vor.u32 %v3465_v21, %v3462_v39  ;;  %v4621_v2 = vcombine.high %v3196_v62, %v3196_v62  ;;  %v3471_v5 = vrot.slane %v3469_v29, 5  ;;  %v3474_v53 = vshrl.u32 %v4618_v58, 16 }
 0x1d0   :  { %v3453_v63 = vrot.slane %v3452_v1, 4  ;;  %v3477_v37 = vshll.u32 %v4618_v58, 16  ;;  %v3488_v7 = vshrl.u32 %v4620_v59, 16  ;;  %v3491_v60 = vshll.u32 %v4620_v59, 16 }
 0x1d1   :  { %v3467_v4 = vrot.slane %v3466_v61, 4  ;;  %v3497_v46 = vshll.u32 %v4621_v2, 16  ;;  %v4643_v32 = vcombine.low %v3430_v35, %v3444_v20  ;;  %v3476_v51 = vrot.slane %v3474_v53, 4 }
 0x1d2   :  { %v3479_v11 = vrot.slane %v3477_v37, 5  ;;  %v3483_v18 = vshll.u32 %v4619_v19, 16  ;;  %v3458_v12 = vsel %vm5820_vm0, %v3453_v63, %v3457_v3  ;;  %v3490_v16 = vrot.slane %v3488_v7, 4  ;;  %v4991_v40 = vpop.f32.mrb[0].mxu1 }
 0x1d3   :  { %v3472_v27 = vsel %vm5820_vm0, %v3467_v4, %v3471_v5  ;;  %v3493_v28 = vrot.slane %v3491_v60, 5  ;;  %v301_v33 = vadd.f32 %v6415_v38, %v5796_v9  ;;  %v6419_v15 = vadd.f32 %v4991_v40, %v300_v48  ;;  %v811_v30 = vpop.f32.mrb[1].mxu1 }
 0x1d4   :  { %5222 = vmatmul.mubr.bf16.gmra.mrb[72].mxu1 %v4643_v32  ;;  %v4644_v45 = vcombine.low %v3458_v12, %v3472_v27  ;;  %v3480_v0 = vor.u32 %v3479_v11, %v3476_v51  ;;  %v299_v50 = vadd.f32 %v6415_v38, %v5786_v23  ;;  %v3499_v22 = vrot.slane %v3497_v46, 5  ;;  %v4992_v43 = vpop.f32.mrb[2].mxu1 }
 0x1d5   :  { %v3494_v14 = vor.u32 %v3493_v28, %v3490_v16  ;;  %v6424_v41 = vadd.f32 %v811_v30, %v6192_v42  ;;  %v3485_v52 = vrot.slane %v3483_v18, 5  ;;  %v6426_v54 = vadd.f32 %v4992_v43, %v301_v33  ;;  %v814_v9 = vpop.f32.mrb[3].mxu1 }
 0x1d6   :  { %5225 = vmatprep.mubr.bf16.mxu1 %v4644_v45  ;;  %v3481_v6 = vrot.slane %v3480_v0, 4  ;;  %v6428_v57 = vadd.f32 %v814_v9, %v299_v50  ;;  %v304_v39 = vadd.f32 %v6415_v38, %v5845_v17  ;;  %v302_v21 = vadd.f32 %v6415_v38, %v5807_v34 }
 0x1d7   :  { %v3495_v56 = vrot.slane %v3494_v14, 4  ;;  %v305_v3 = vadd.f32 %v6415_v38, %v5848_v31  ;;  %v303_v49 = vadd.f32 %v6415_v38, %v5816_v47  ;;  %v308_v34 = vadd.f32 %v6415_v38, %v5905_v10 }
 0x1d8   :  { %v3486_v48 = vsel %vm5820_vm0, %v3481_v6, %v3485_v52  ;;  %v306_v31 = vadd.f32 %v6415_v38, %v5872_v8  ;;  %v309_v7 = vadd.f32 %v6415_v38, %v5915_v25  ;;  %v307_v46 = vadd.f32 %v6415_v38, %v5879_v26 }
 0x1d9   :  { %v3500_v23 = vsel %vm5820_vm0, %v3495_v56, %v3499_v22  ;;  %v312_v8 = vadd.f32 %v6415_v38, %v5999_v24  ;;  %v310_v25 = vadd.f32 %v6415_v38, %v5947_v13  ;;  %v313_v33 = vadd.f32 %v6415_v38, %v6012_v55 }
 0x1da   :  { %v4645_v29 = vcombine.low %v3486_v48, %v3500_v23  ;;  %v311_v0 = vadd.f32 %v6415_v38, %v5964_v36 }
 0x1dc   :  { %5226 = vmatmul.mubr.bf16.gmra.mrb[76].mxu1 %v4645_v29  ;;  %v5055_v42 = vpop.f32.mrb[32].mxu0 }
 0x1dd   :  { %v1717_v62 = vpop.f32.mrb[33].mxu0 }
 0x1de   :  { %v5056_v35 = vpop.f32.mrb[34].mxu0 }
 0x1df   :  { %v1720_v44 = vpop.f32.mrb[35].mxu0 }
 0x1e2   :  { %v4995_v1 = vpop.f32.mrb[4].mxu1 }
 0x1e3   :  { %v880_v58 = vadd.f32 %v4995_v1, %v304_v39  ;;  %v827_v19 = vpop.f32.mrb[5].mxu1 }
 0x1e4   :  { %v878_v20 = vadd.f32 %v827_v19, %v302_v21  ;;  %v4996_v61 = vpop.f32.mrb[6].mxu1 }
 0x1e5   :  { %v881_v59 = vadd.f32 %v4996_v61, %v305_v3  ;;  %v830_v2 = vpop.f32.mrb[7].mxu1 }
 0x1e6   :  { %v879_v63 = vadd.f32 %v830_v2, %v303_v49 }
 0x1ec   :  { %v5059_v5 = vpop.f32.mrb[36].mxu0 }
 0x1ed   :  { %v1733_v53 = vpop.f32.mrb[37].mxu0 }
 0x1ee   :  { %v5060_v17 = vpop.f32.mrb[38].mxu0 }
 0x1ef   :  { %v1736_v37 = vpop.f32.mrb[39].mxu0 }
 0x1f2   :  { %v4999_v4 = vpop.f32.mrb[8].mxu1 }
 0x1f3   :  { %v884_v47 = vadd.f32 %v4999_v4, %v308_v34  ;;  %v843_v60 = vpop.f32.mrb[9].mxu1 }
 0x1f4   :  { %v882_v32 = vadd.f32 %v843_v60, %v306_v31  ;;  %v5000_v51 = vpop.f32.mrb[10].mxu1 }
 0x1f5   :  { %v885_v11 = vadd.f32 %v5000_v51, %v309_v7  ;;  %v846_v18 = vpop.f32.mrb[11].mxu1 }
 0x1f6   :  { %v883_v12 = vadd.f32 %v846_v18, %v307_v46 }
 0x1fb   :  { %v5063_v27 = vpop.f32.mrb[40].mxu0 }
 0x1fc   :  { %v1749_v16 = vpop.f32.mrb[41].mxu0 }
 0x1fd   :  { %v5064_v10 = vpop.f32.mrb[42].mxu0 }
 0x1fe   :  { %v1752_v28 = vpop.f32.mrb[43].mxu0 }
 0x202   :  { %v5003_v40 = vpop.f32.mrb[12].mxu1 }
 0x203   :  { %v888_v26 = vadd.f32 %v5003_v40, %v312_v8  ;;  %v859_v45 = vpop.f32.mrb[13].mxu1 }
 0x204   :  { %v886_v30 = vadd.f32 %v859_v45, %v310_v25  ;;  %v5004_v50 = vpop.f32.mrb[14].mxu1 }
 0x205   :  { %v889_v14 = vadd.f32 %v5004_v50, %v313_v33  ;;  %v862_v22 = vpop.f32.mrb[15].mxu1 }
 0x206   :  { %v887_v43 = vadd.f32 %v862_v22, %v311_v0 }
 0x20a   :  { %v5067_v6 = vpop.f32.mrb[44].mxu0 }
 0x20b   :  { %v1765_v52 = vpop.f32.mrb[45].mxu0 }
 0x20c   :  { %v5068_v24 = vpop.f32.mrb[46].mxu0  ;;  %v5023_v9 = vpop.f32.mrb[16].mxu1 }
 0x20d   :  { %v1768_v56 = vpop.f32.mrb[47].mxu0  ;;  %v1409_v13 = vadd.f32 %v5023_v9, %v6419_v15  ;;  %v1344_v48 = vpop.f32.mrb[17].mxu1 }
 0x20e   :  { %v1407_v55 = vadd.f32 %v1344_v48, %v6424_v41  ;;  %v5024_v23 = vpop.f32.mrb[18].mxu1 }
 0x20f   :  { %v1410_v29 = vadd.f32 %v5024_v23, %v6426_v54  ;;  %v1347_v39 = vpop.f32.mrb[19].mxu1  ;;  %v1782_v36 = vadd.f32 %v5055_v42, %v1409_v13 }
 0x210   :  { %v1408_v38 = vadd.f32 %v1347_v39, %v6428_v57  ;;  %v1780_v21 = vadd.f32 %v1717_v62, %v1407_v55 }
 0x211   :  { %v1783_v1 = vadd.f32 %v5056_v35, %v1410_v29 }
 0x212   :  { %v1781_v3 = vadd.f32 %v1720_v44, %v1408_v38 }
 0x218   :  { %v5119_v19 = vpop.f32.mrb[48].mxu0 }
 0x219   :  { %v2489_v49 = vpop.f32.mrb[49].mxu0 }
 0x21a   :  { %v5120_v61 = vpop.f32.mrb[50].mxu0 }
 0x21b   :  { %v2492_v2 = vpop.f32.mrb[51].mxu0 }
 0x223   :  { %v5027_v34 = vpop.f32.mrb[20].mxu1 }
 0x224   :  { %v1413_v31 = vadd.f32 %v5027_v34, %v880_v58  ;;  %v1360_v15 = vpop.f32.mrb[21].mxu1 }
 0x225   :  { %v1411_v4 = vadd.f32 %v1360_v15, %v878_v20  ;;  %v5028_v7 = vpop.f32.mrb[22].mxu1 }
 0x226   :  { %v1414_v41 = vadd.f32 %v5028_v7, %v881_v59  ;;  %v1363_v60 = vpop.f32.mrb[23].mxu1  ;;  %v1786_v46 = vadd.f32 %v5059_v5, %v1413_v31 }
 0x227   :  { %v1412_v54 = vadd.f32 %v1363_v60, %v879_v63  ;;  %v1784_v51 = vadd.f32 %v1733_v53, %v1411_v4 }
 0x228   :  { %v1787_v42 = vadd.f32 %v5060_v17, %v1414_v41 }
 0x229   :  { %v1785_v18 = vadd.f32 %v1736_v37, %v1412_v54 }
 0x22d   :  { %v5123_v57 = vpop.f32.mrb[52].mxu0 }
 0x22e   :  { %v2505_v62 = vpop.f32.mrb[53].mxu0 }
 0x22f   :  { %v5124_v35 = vpop.f32.mrb[54].mxu0 }
 0x230   :  { %v2508_v44 = vpop.f32.mrb[55].mxu0 }
 0x238   :  { %v5031_v8 = vpop.f32.mrb[24].mxu1 }
 0x239   :  { %v1417_v25 = vadd.f32 %v5031_v8, %v884_v47  ;;  %v1376_v40 = vpop.f32.mrb[25].mxu1 }
 0x23a   :  { %v1415_v33 = vadd.f32 %v1376_v40, %v882_v32  ;;  %v5032_v45 = vpop.f32.mrb[26].mxu1 }
 0x23b   :  { %v1418_v58 = vadd.f32 %v5032_v45, %v885_v11  ;;  %v1379_v0 = vpop.f32.mrb[27].mxu1  ;;  %v1790_v20 = vadd.f32 %v5063_v27, %v1417_v25 }
 0x23c   :  { %v1416_v50 = vadd.f32 %v1379_v0, %v883_v12  ;;  %v1788_v59 = vadd.f32 %v1749_v16, %v1415_v33 }
 0x23d   :  { %v1791_v22 = vadd.f32 %v5064_v10, %v1418_v58 }
 0x23e   :  { %v1789_v5 = vadd.f32 %v1752_v28, %v1416_v50 }
 0x243   :  { %v5127_v63 = vpop.f32.mrb[56].mxu0 }
 0x244   :  { %v2521_v53 = vpop.f32.mrb[57].mxu0 }
 0x245   :  { %v5128_v17 = vpop.f32.mrb[58].mxu0 }
 0x246   :  { %v2524_v37 = vpop.f32.mrb[59].mxu0 }
 0x24f   :  { %v5035_v9 = vpop.f32.mrb[28].mxu1 }
 0x250   :  { %v1421_v13 = vadd.f32 %v5035_v9, %v888_v26  ;;  %v1392_v48 = vpop.f32.mrb[29].mxu1 }
 0x251   :  { %v1419_v55 = vadd.f32 %v1392_v48, %v886_v30  ;;  %v5036_v23 = vpop.f32.mrb[30].mxu1 }
 0x252   :  { %v1422_v47 = vadd.f32 %v5036_v23, %v889_v14  ;;  %v1395_v29 = vpop.f32.mrb[31].mxu1  ;;  %v1794_v32 = vadd.f32 %v5067_v6, %v1421_v13 }
 0x253   :  { %v1420_v39 = vadd.f32 %v1395_v29, %v887_v43  ;;  %v1792_v11 = vadd.f32 %v1765_v52, %v1419_v55 }
 0x254   :  { %v5131_v38 = vpop.f32.mrb[60].mxu0  ;;  %v1795_v27 = vadd.f32 %v5068_v24, %v1422_v47 }
 0x255   :  { %v2537_v12 = vpop.f32.mrb[61].mxu0  ;;  %v1793_v16 = vadd.f32 %v1768_v56, %v1420_v39 }
 0x256   :  { %v5132_v10 = vpop.f32.mrb[62].mxu0 }
 0x257   :  { %v5087_v28 = vpop.f32.mrb[32].mxu1  ;;  %v2540_v34 = vpop.f32.mrb[63].mxu0 }
 0x258   :  { %v2024_v31 = vadd.f32 %v5087_v28, %v1782_v36  ;;  %v1959_v15 = vpop.f32.mrb[33].mxu1 }
 0x259   :  { %v2022_v4 = vadd.f32 %v1959_v15, %v1780_v21  ;;  %v5088_v7 = vpop.f32.mrb[34].mxu1 }
 0x25a   :  { %v2025_v26 = vadd.f32 %v5088_v7, %v1783_v1  ;;  %v1962_v41 = vpop.f32.mrb[35].mxu1  ;;  %v2554_v30 = vadd.f32 %v5119_v19, %v2024_v31 }
 0x25b   :  { %v2023_v60 = vadd.f32 %v1962_v41, %v1781_v3  ;;  %v2552_v14 = vadd.f32 %v2489_v49, %v2022_v4 }
 0x25c   :  { %v5183_v54 = vpop.f32.mrb[64].mxu0  ;;  %v2555_v6 = vadd.f32 %v5120_v61, %v2025_v26 }
 0x25d   :  { %v3102_v43 = vpop.f32.mrb[65].mxu0  ;;  %v2553_v52 = vadd.f32 %v2492_v2, %v2023_v60 }
 0x25e   :  { %v5184_v8 = vpop.f32.mrb[66].mxu0 }
 0x25f   :  { %v5091_v24 = vpop.f32.mrb[36].mxu1  ;;  %v3105_v25 = vpop.f32.mrb[67].mxu0 }
 0x260   :  { %v2028_v56 = vadd.f32 %v5091_v24, %v1786_v46  ;;  %v1975_v40 = vpop.f32.mrb[37].mxu1 }
 0x261   :  { %v2026_v33 = vadd.f32 %v1975_v40, %v1784_v51  ;;  %v5092_v45 = vpop.f32.mrb[38].mxu1 }
 0x262   :  { %v2029_v36 = vadd.f32 %v5092_v45, %v1787_v42  ;;  %v1978_v58 = vpop.f32.mrb[39].mxu1  ;;  %v2558_v21 = vadd.f32 %v5123_v57, %v2028_v56 }
 0x263   :  { %v2027_v0 = vadd.f32 %v1978_v58, %v1785_v18  ;;  %v2556_v1 = vadd.f32 %v2505_v62, %v2026_v33 }
 0x264   :  { %v5187_v50 = vpop.f32.mrb[68].mxu0  ;;  %v2559_v19 = vadd.f32 %v5124_v35, %v2029_v36 }
 0x265   :  { %v3118_v3 = vpop.f32.mrb[69].mxu0  ;;  %v2557_v49 = vadd.f32 %v2508_v44, %v2027_v0 }
 0x266   :  { %v5188_v9 = vpop.f32.mrb[70].mxu0 }
 0x267   :  { %v5095_v61 = vpop.f32.mrb[40].mxu1  ;;  %v3121_v13 = vpop.f32.mrb[71].mxu0 }
 0x268   :  { %v2032_v2 = vadd.f32 %v5095_v61, %v1790_v20  ;;  %v1991_v48 = vpop.f32.mrb[41].mxu1 }
 0x269   :  { %v2030_v55 = vadd.f32 %v1991_v48, %v1788_v59  ;;  %v5096_v23 = vpop.f32.mrb[42].mxu1 }
 0x26a   :  { %v2033_v46 = vadd.f32 %v5096_v23, %v1791_v22  ;;  %v1994_v47 = vpop.f32.mrb[43].mxu1  ;;  %v2562_v51 = vadd.f32 %v5127_v63, %v2032_v2 }
 0x26b   :  { %v2031_v29 = vadd.f32 %v1994_v47, %v1789_v5  ;;  %v2560_v42 = vadd.f32 %v2521_v53, %v2030_v55 }
 0x26c   :  { %v5191_v39 = vpop.f32.mrb[72].mxu0  ;;  %v2563_v57 = vadd.f32 %v5128_v17, %v2033_v46 }
 0x26d   :  { %v3134_v18 = vpop.f32.mrb[73].mxu0  ;;  %v2561_v62 = vadd.f32 %v2524_v37, %v2031_v29 }
 0x26e   :  { %v5192_v28 = vpop.f32.mrb[74].mxu0 }
 0x26f   :  { %v5099_v35 = vpop.f32.mrb[44].mxu1  ;;  %v3137_v31 = vpop.f32.mrb[75].mxu0 }
 0x270   :  { %v2036_v44 = vadd.f32 %v5099_v35, %v1794_v32  ;;  %v2007_v15 = vpop.f32.mrb[45].mxu1 }
 0x271   :  { %v2034_v4 = vadd.f32 %v2007_v15, %v1792_v11  ;;  %v5100_v7 = vpop.f32.mrb[46].mxu1 }
 0x272   :  { %v2037_v20 = vadd.f32 %v5100_v7, %v1795_v27  ;;  %v2010_v26 = vpop.f32.mrb[47].mxu1  ;;  %v2566_v59 = vadd.f32 %v5131_v38, %v2036_v44 }
 0x273   :  { %v2035_v41 = vadd.f32 %v2010_v26, %v1793_v16  ;;  %v2564_v22 = vadd.f32 %v2537_v12, %v2034_v4 }
 0x274   :  { %v5195_v60 = vpop.f32.mrb[76].mxu0  ;;  %v2567_v63 = vadd.f32 %v5132_v10, %v2037_v20 }
 0x275   :  { %v3150_v5 = vpop.f32.mrb[77].mxu0  ;;  %v2565_v53 = vadd.f32 %v2540_v34, %v2035_v41 }
 0x276   :  { %v5196_v24 = vpop.f32.mrb[78].mxu0 }
 0x277   :  { %v5151_v17 = vpop.f32.mrb[48].mxu1  ;;  %v3153_v56 = vpop.f32.mrb[79].mxu0 }
 0x278   :  { %v2924_v37 = vadd.f32 %v5151_v17, %v2554_v30  ;;  %v2859_v40 = vpop.f32.mrb[49].mxu1 }
 0x279   :  { %v2922_v33 = vadd.f32 %v2859_v40, %v2552_v14  ;;  %v5152_v45 = vpop.f32.mrb[50].mxu1 }
 0x27a   :  { %v2925_v32 = vadd.f32 %v5152_v45, %v2555_v6  ;;  %v2862_v36 = vpop.f32.mrb[51].mxu1  ;;  %v3167_v11 = vadd.f32 %v5183_v54, %v2924_v37 }
 0x27b   :  { %v2923_v58 = vadd.f32 %v2862_v36, %v2553_v52  ;;  %v3165_v27 = vadd.f32 %v3102_v43, %v2922_v33 }
 0x27c   :  { %v5247_v0 = vpop.f32.mrb[80].mxu0  ;;  %v3168_v38 = vadd.f32 %v5184_v8, %v2925_v32 }
 0x27d   :  { %v4002_v16 = vpop.f32.mrb[81].mxu0  ;;  %v3166_v12 = vadd.f32 %v3105_v25, %v2923_v58 }
 0x27e   :  { %v5248_v61 = vpop.f32.mrb[82].mxu0 }
 0x27f   :  { %v5155_v10 = vpop.f32.mrb[52].mxu1  ;;  %v4005_v2 = vpop.f32.mrb[83].mxu0 }
 0x280   :  { %v2928_v34 = vadd.f32 %v5155_v10, %v2558_v21  ;;  %v2875_v48 = vpop.f32.mrb[53].mxu1 }
 0x281   :  { %v2926_v55 = vadd.f32 %v2875_v48, %v2556_v1  ;;  %v5156_v23 = vpop.f32.mrb[54].mxu1 }
 0x282   :  { %v2929_v30 = vadd.f32 %v5156_v23, %v2559_v19  ;;  %v2878_v46 = vpop.f32.mrb[55].mxu1  ;;  %v3171_v14 = vadd.f32 %v5187_v50, %v2928_v34 }
 0x283   :  { %v2927_v47 = vadd.f32 %v2878_v46, %v2557_v49  ;;  %v3169_v6 = vadd.f32 %v3118_v3, %v2926_v55 }
 0x284   :  { %v6462_v29 = vpop.f32.mrb[84].mxu0  ;;  %v6464_v54 = vadd.f32 %v5188_v9, %v2929_v30 }
 0x285   :  { %v6466_v43 = vpop.f32.mrb[85].mxu0  ;;  %v6468_v52 = vadd.f32 %v3121_v13, %v2927_v47 }
 0x286   :  { %v6470_v8 = vpop.f32.mrb[86].mxu0 }
 0x287   :  { %v5159_v25 = vpop.f32.mrb[56].mxu1  ;;  %v6472_v21 = vpop.f32.mrb[87].mxu0 }
 0x288   :  { %v2932_v1 = vadd.f32 %v5159_v25, %v2562_v51  ;;  %v2891_v35 = vpop.f32.mrb[57].mxu1 }
 0x289   :  { %v2930_v19 = vadd.f32 %v2891_v35, %v2560_v42  ;;  %v5160_v44 = vpop.f32.mrb[58].mxu1 }
 0x28a   :  { %v2933_v50 = vadd.f32 %v5160_v44, %v2563_v57  ;;  %v2894_v49 = vpop.f32.mrb[59].mxu1  ;;  %v6474_v3 = vadd.f32 %v5191_v39, %v2932_v1 }
 0x28b   :  { %v2931_v15 = vadd.f32 %v2894_v49, %v2561_v62  ;;  %v6476_v9 = vadd.f32 %v3134_v18, %v2930_v19 }
 0x28c   :  { %v6478_v4 = vpop.f32.mrb[88].mxu0  ;;  %v6480_v13 = vadd.f32 %v5192_v28, %v2933_v50 }
 0x28d   :  { %v6482_v7 = vpop.f32.mrb[89].mxu0  ;;  %v6484_v20 = vadd.f32 %v3137_v31, %v2931_v15 }
 0x28e   :  { %v6486_v26 = vpop.f32.mrb[90].mxu0 }
 0x28f   :  { %v5163_v51 = vpop.f32.mrb[60].mxu1  ;;  %v6488_v42 = vpop.f32.mrb[91].mxu0 }
 0x290   :  { %v2936_v57 = vadd.f32 %v5163_v51, %v2566_v59  ;;  %v2907_v41 = vpop.f32.mrb[61].mxu1 }
 0x291   :  { %v2934_v39 = vadd.f32 %v2907_v41, %v2564_v22  ;;  %v5164_v17 = vpop.f32.mrb[62].mxu1 }
 0x292   :  { %v2937_v62 = vadd.f32 %v5164_v17, %v2567_v63  ;;  %v2910_v18 = vpop.f32.mrb[63].mxu1  ;;  %v6490_v37 = vadd.f32 %v5195_v60, %v2936_v57 }
 0x293   :  { %v2935_v40 = vadd.f32 %v2910_v18, %v2565_v53  ;;  %v6492_v28 = vadd.f32 %v3150_v5, %v2934_v39 }
 0x294   :  { %v6494_v33 = vpop.f32.mrb[92].mxu0  ;;  %v6496_v31 = vadd.f32 %v5196_v24, %v2937_v62 }
 0x295   :  { %v6498_v45 = vpop.f32.mrb[93].mxu0  ;;  %v6500_v32 = vadd.f32 %v3153_v56, %v2935_v40 }
 0x296   :  { %v6502_v36 = vpop.f32.mrb[94].mxu0 }
 0x297   :  { %v5215_v59 = vpop.f32.mrb[64].mxu1  ;;  %v6504_v22 = vpop.f32.mrb[95].mxu0 }
 0x298   :  { %v3697_v63 = vadd.f32 %v5215_v59, %v3167_v11  ;;  %v3632_v58 = vpop.f32.mrb[65].mxu1 }
 0x299   :  { %v3695_v60 = vadd.f32 %v3632_v58, %v3165_v27  ;;  %v5216_v10 = vpop.f32.mrb[66].mxu1 }
 0x29a   :  { %v4067_v53 = vadd.f32 %v5247_v0, %v3697_v63  ;;  %v3698_v5 = vadd.f32 %v5216_v10, %v3168_v38  ;;  %v3635_v34 = vpop.f32.mrb[67].mxu1 }
 0x29b   :  { %v4065_v48 = vadd.f32 %v4002_v16, %v3695_v60  ;;  %v3696_v55 = vadd.f32 %v3635_v34, %v3166_v12 }
 0x29c   :  { %v4068_v24 = vadd.f32 %v5248_v61, %v3698_v5  ;;  %v4083_v30 = vmax.f32 %v4067_v53, 0.0 }
 0x29d   :  { %v4066_v23 = vadd.f32 %v4005_v2, %v3696_v55  ;;  %v4081_v56 = vmax.f32 %v4065_v48, 0.0 }
 0x29e   :  { %v4084_v46 = vmax.f32 %v4068_v24, 0.0 }
 0x29f   :  { %v4082_v47 = vmax.f32 %v4066_v23, 0.0  ;;  %v5219_v25 = vpop.f32.mrb[68].mxu1 }
 0x2a0   :  { %v4790_v1 = vpack.c.bf16 %v4084_v46, %v4083_v30  ;;  %v3701_v35 = vadd.f32 %v5219_v25, %v3171_v14  ;;  %v3648_v19 = vpop.f32.mrb[69].mxu1 }
 0x2a1   :  { %v4785_v44 = vpack.c.bf16 %v4082_v47, %v4081_v56  ;;  %v3699_v11 = vadd.f32 %v3648_v19, %v3169_v6  ;;  %v5220_v50 = vpop.f32.mrb[70].mxu1 }
 0x2a2   :  { %4822 = vst [vmem:[%s6557_s5 + $0x8] sm:$0xff] %v4790_v1   ;;  %v4071_v27 = vadd.f32 %v6462_v29, %v3701_v35  ;;  %v3702_v0 = vadd.f32 %v5220_v50, %v6464_v54  ;;  %v3651_v38 = vpop.f32.mrb[71].mxu1 }
 0x2a3   :  { %4786 = vst [vmem:[%s6557_s5] sm:$0xff] %v4785_v44   ;;  %v4069_v16 = vadd.f32 %v6466_v43, %v3699_v11  ;;  %v3700_v12 = vadd.f32 %v3651_v38, %v6468_v52 }
 0x2a4   :  { %v4072_v61 = vadd.f32 %v6470_v8, %v3702_v0  ;;  %v4087_v14 = vmax.f32 %v4071_v27, 0.0 }
 0x2a5   :  { %v4070_v2 = vadd.f32 %v6472_v21, %v3700_v12  ;;  %v4085_v49 = vmax.f32 %v4069_v16, 0.0 }
 0x2a6   :  { %v4088_v6 = vmax.f32 %v4072_v61, 0.0 }
 0x2a7   :  { %v4086_v15 = vmax.f32 %v4070_v2, 0.0  ;;  %v5223_v29 = vpop.f32.mrb[72].mxu1 }
 0x2a8   :  { %v4800_v51 = vpack.c.bf16 %v4088_v6, %v4087_v14  ;;  %v3705_v54 = vadd.f32 %v5223_v29, %v6474_v3  ;;  %v3664_v57 = vpop.f32.mrb[73].mxu1 }
 0x2a9   :  { %v4795_v41 = vpack.c.bf16 %v4086_v15, %v4085_v49  ;;  %v3703_v39 = vadd.f32 %v3664_v57, %v6476_v9  ;;  %v5224_v17 = vpop.f32.mrb[74].mxu1 }
 0x2aa   :  { %4824 = vst [vmem:[%s6557_s5 + $0x18] sm:$0xff] %v4800_v51   ;;  %v4075_v43 = vadd.f32 %v6478_v4, %v3705_v54  ;;  %v3706_v52 = vadd.f32 %v5224_v17, %v6480_v13  ;;  %v3667_v8 = vpop.f32.mrb[75].mxu1 }
 0x2ab   :  { %4823 = vst [vmem:[%s6557_s5 + $0x10] sm:$0xff] %v4795_v41   ;;  %v4073_v21 = vadd.f32 %v6482_v7, %v3703_v39  ;;  %v3704_v3 = vadd.f32 %v3667_v8, %v6484_v20 }
 0x2ac   :  { %v4076_v9 = vadd.f32 %v6486_v26, %v3706_v52  ;;  %v4091_v18 = vmax.f32 %v4075_v43, 0.0 }
 0x2ad   :  { %v4074_v62 = vadd.f32 %v6488_v42, %v3704_v3  ;;  %v4089_v59 = vmax.f32 %v4073_v21, 0.0 }
 0x2ae   :  { %v4092_v40 = vmax.f32 %v4076_v9, 0.0 }
 0x2af   :  { %v4090_v63 = vmax.f32 %v4074_v62, 0.0  ;;  %v5227_v4 = vpop.f32.mrb[76].mxu1 }
 0x2b0   :  { %v4810_v58 = vpack.c.bf16 %v4092_v40, %v4091_v18  ;;  %v3709_v13 = vadd.f32 %v5227_v4, %v6490_v37  ;;  %v3680_v60 = vpop.f32.mrb[77].mxu1 }
 0x2b1   :  { %v4805_v10 = vpack.c.bf16 %v4090_v63, %v4089_v59  ;;  %v3707_v53 = vadd.f32 %v3680_v60, %v6492_v28  ;;  %v5228_v5 = vpop.f32.mrb[78].mxu1 }
 0x2b2   :  { %4826 = vst [vmem:[%s6557_s5 + $0x28] sm:$0xff] %v4810_v58   ;;  %v4079_v7 = vadd.f32 %v6494_v33, %v3709_v13  ;;  %v3710_v20 = vadd.f32 %v5228_v5, %v6496_v31  ;;  %v3683_v26 = vpop.f32.mrb[79].mxu1 }
 0x2b3   :  { %4825 = vst [vmem:[%s6557_s5 + $0x20] sm:$0xff] %v4805_v10   ;;  %v4077_v42 = vadd.f32 %v6498_v45, %v3707_v53  ;;  %v3708_v37 = vadd.f32 %v3683_v26, %v6500_v32 }
 0x2b4   :  { %v4080_v28 = vadd.f32 %v6502_v36, %v3710_v20  ;;  %v4095_v48 = vmax.f32 %v4079_v7, 0.0 }
 0x2b5   :  { %v4078_v34 = vadd.f32 %v6504_v22, %v3708_v37  ;;  %v4093_v24 = vmax.f32 %v4077_v42, 0.0 }
 0x2b6   :  { %v4096_v55 = vmax.f32 %v4080_v28, 0.0 }
 0x2b7   :  { %v4094_v23 = vmax.f32 %v4078_v34, 0.0 }
 0x2b8   :  { %v4820_v33 = vpack.c.bf16 %v4096_v55, %v4095_v48 }
 0x2b9   :  { %v4815_v30 = vpack.c.bf16 %v4094_v23, %v4093_v24 }
 0x2ba   :  { %4828 = vst [vmem:[%s6557_s5 + $0x38] sm:$0xff] %v4820_v33  }
 0x2bb   :  { %4827 = vst [vmem:[%s6557_s5 + $0x30] sm:$0xff] %v4815_v30  }

</bundles_post_ra>
